<compile_context>
chip_gen: v7x
topology: tpu7x:2x2x1
jax: 0.10.0
libtpu: 0.0.40
codegen_flags: <defaults>
</compile_context>

<pallas_src>
import functools

import jax
import jax.numpy as jnp
from jax.experimental import pallas as pl
from jax.experimental.pallas import tpu as pltpu

LN_EPS = 1e-5
GRID_SIZE = 5
SPLINE_ORDER = 3


def _round_up(x, m):
    return ((x + m - 1) // m) * m


def output_kan_kernel(tab_ref, x_ref, gamma_ref, gmean_ref, bmean_ref, wf_ref,
                      o_ref, pooled_ref, bflat_ref, *,
                      n_tokens, n_channel, n_knots, spline_order,
                      rd_offsets, c_lane, row_tile):
    """One grid step == TB batch samples.

    tab_ref:    (L,) SMEM  [knots..., 1/den1(k=1), 1/den2(k=1), ..., k=order]
    x_ref:      (TB, T, C) bf16 input block
    gamma_ref:  (T, C)     LayerNorm weight (f32)
    gmean_ref:  (1, C)     mean_t(gamma)
    bmean_ref:  (1, C)     mean_t(beta)
    wf_ref:     ((n_basis+1)*C_lane, O_pad) fused [base; spline] weight, bf16
    o_ref:      (TB, O_pad) output block (lane-dense)
    pooled_ref: (TB, C)     f32 scratch (LN + token-pooled activations)
    bflat_ref:  (TB, (n_basis+1)*C_lane) f32 scratch (flattened GEMM LHS)
    """
    C = n_channel
    TB = pooled_ref.shape[0]
    inv_t = 1.0 / n_tokens
    inv_tc = 1.0 / (n_tokens * n_channel)

    # ---- fused LayerNorm((T,C)) + mean over tokens (single pass over x) ----
    x = x_ref[...].astype(jnp.float32)               # (TB, T, C)
    gamma = gamma_ref[...]                           # (T, C)
    xs = jnp.sum(x, axis=1)                          # (TB, C)
    x2s = jnp.sum(x * x, axis=1)                     # (TB, C)
    s1 = jnp.sum(xs, axis=1, keepdims=True)          # (TB, 1)
    s2 = jnp.sum(x2s, axis=1, keepdims=True)         # (TB, 1)
    mean = s1 * inv_tc
    var = s2 * inv_tc - mean * mean                  # biased var (torch LN)
    rstd = jax.lax.rsqrt(var + LN_EPS)               # (TB, 1)
    xg_mean = jnp.sum(x * gamma[None, :, :], axis=1) * inv_t         # (TB, C)
    pooled_ref[...] = rstd * (xg_mean - mean * gmean_ref[...]) + bmean_ref[...]

    # ---- flattened GEMM LHS: slot 0 = SiLU(pooled), slots 1.. = B-splines ----
    if c_lane != C:
        # keep padding lanes zero (matching fused-weight rows are zero too)
        bflat_ref[...] = jnp.zeros_like(bflat_ref)

    n_basis = n_knots - 1 - spline_order
    for ci in range(TB // row_tile):                  # bounded vreg liveness
        r0 = ci * row_tile
        p = pooled_ref[r0:r0 + row_tile, :]           # (RT, C)
        bflat_ref[r0:r0 + row_tile, 0:C] = jax.nn.silu(p)

        # degree-0 indicators from monotone ">=" compares: ge[j] - ge[j+1]
        ge = [(p >= tab_ref[j]).astype(jnp.float32) for j in range(n_knots)]
        bases = [ge[j] - ge[j + 1] for j in range(n_knots - 1)]
        # (p - knot[j]) computed once, reused for left and right terms
        d = [p - tab_ref[j] for j in range(n_knots)]
        for k in range(1, spline_order + 1):
            off1, off2 = rd_offsets[k - 1]
            bases = [d[j] * tab_ref[off1 + j] * bases[j]
                     - d[j + k + 1] * tab_ref[off2 + j] * bases[j + 1]
                     for j in range(n_knots - 1 - k)]
        for j in range(n_basis):
            c0 = (1 + j) * c_lane                     # 128-aligned lane offset
            bflat_ref[r0:r0 + row_tile, c0:c0 + C] = bases[j]

    # ---- single fused (base + spline) GEMM: bf16 operands, f32 accumulate ----
    bflat = bflat_ref[...].astype(jnp.bfloat16)
    o_ref[...] = jnp.dot(bflat, wf_ref[...], preferred_element_type=jnp.float32)


def output_kan_forward(x, params, max_block_b=256):
    B, T, C = x.shape
    gamma = params["ln_weight"].astype(jnp.float32)          # (T, C)
    beta = params["ln_bias"].astype(jnp.float32)              # (T, C)
    grid_knots = params["grid"]                                # (C, n_knots)
    base_w = params["base_weight"].astype(jnp.float32)         # (O, C)
    spline_w = params["spline_weight"].astype(jnp.float32)     # (O, C, n_basis)
    spline_scaler = params["spline_scaler"].astype(jnp.float32)  # (O, C)
    O = base_w.shape[0]
    n_basis = spline_w.shape[-1]
    n_knots = grid_knots.shape[-1]
    spline_order = n_knots - 1 - n_basis
    n_slots = n_basis + 1

    O_pad = _round_up(O, 128)
    C_lane = _round_up(C, 128)

    # Kernel assumes a channel-shared KAN grid (no per-channel adaptation).
    try:
        uniform = bool(jnp.all(grid_knots == grid_knots[:1]))
    except Exception:                      # tracing: cannot check concretely
        uniform = True
    if not uniform:
        raise ValueError("output_kan_forward assumes a channel-shared KAN grid")

    # ---- layout / weight prep (plain JAX, once) ----
    gmean = jnp.mean(gamma, axis=0, keepdims=True)             # (1, C)
    bmean = jnp.mean(beta, axis=0, keepdims=True)              # (1, C)

    scaled = spline_w * spline_scaler[..., None]                # (O, C, n_basis)
    stack = jnp.concatenate(
        [jnp.transpose(base_w)[None],                           # slot 0: base
         jnp.transpose(scaled, (2, 1, 0))], axis=0)             # slots 1..: j
    stack = jnp.pad(stack, ((0, 0), (0, C_lane - C), (0, O_pad - O)))
    wf = stack.reshape(n_slots * C_lane, O_pad).astype(jnp.bfloat16)

    # ---- scalar knot table + precomputed reciprocal denominators (SMEM) ----
    knots = grid_knots[0].astype(jnp.float32)                   # (n_knots,)
    pieces = [knots]
    rd_offsets = []
    off = n_knots
    for k in range(1, spline_order + 1):
        d1 = 1.0 / (knots[k:-1] - knots[:-(k + 1)])             # 1/(g[j+k]-g[j])
        d2 = 1.0 / (knots[k + 1:] - knots[1:-k])                # 1/(g[j+k+1]-g[j+1])
        rd_offsets.append((off, off + d1.shape[0]))
        pieces += [d1, d2]
        off += d1.shape[0] + d2.shape[0]
    tab = jnp.concatenate(pieces).astype(jnp.float32)

    # ---- VMEM-budget-aware batch block (TB) ----
    try:
        vmem_cap = int(pltpu.get_tpu_info().vmem_capacity_bytes)
    except Exception:
        vmem_cap = 64 * 1024 * 1024                 # conservative (v7x per-TC)
    # bytes independent of TB (weights conservatively counted double-buffered)
    fixed = 2 * (T * C * 4 + 2 * C * 4 + n_slots * C_lane * O_pad * 2)
    # bytes per TB row: x bf16 (2x) + out f32 (2x) + bflat/pooled scratch (1x)
    per_row = 2 * (T * C * 2) + 2 * (O_pad * 4) + n_slots * C_lane * 4 + C * 4
    budget = int(0.5 * vmem_cap)
    if budget > fixed + 8 * per_row:
        tb_fit = ((budget - fixed) // per_row) // 8 * 8
    else:
        tb_fit = 8
    TB = max(8, min(tb_fit, max_block_b))
    Bp8 = _round_up(B, 8)
    TB = min(TB, Bp8)
    if Bp8 // TB < 2 and Bp8 >= 16:
        # >= 2 grid steps so ("parallel",) can feed both v7x TensorCores.
        TB = max(8, ((Bp8 // 2) // 8) * 8)
    Bp = _round_up(B, TB)

    need = fixed + TB * per_row
    vmem_limit = int(min(0.9 * vmem_cap, max(2 * need, 32 * 1024 * 1024)))

    xb = x
    if Bp != B:
        xb = jnp.pad(xb, ((0, Bp - B), (0, 0), (0, 0)))
    # x is the only O(B*T*C) HBM stream: ship it as bf16, upcast in-kernel.
    xb = xb.astype(jnp.bfloat16)

    kernel = functools.partial(
        output_kan_kernel, n_tokens=T, n_channel=C, n_knots=n_knots,
        spline_order=spline_order, rd_offsets=tuple(rd_offsets),
        c_lane=C_lane, row_tile=8)

    def call(single_buffer_weights):
        const_kw = (
            {"pipeline_mode": pl.Buffered(1)} if single_buffer_weights else {})
        grid_spec = pltpu.PrefetchScalarGridSpec(
            num_scalar_prefetch=0,
            grid=(Bp // TB,),
            in_specs=[
                pl.BlockSpec(memory_space=pltpu.MemorySpace.SMEM),   # knot table
                pl.BlockSpec((TB, T, C), lambda b: (b, 0, 0)),       # x (bf16)
                pl.BlockSpec((T, C), lambda b: (0, 0), **const_kw),  # gamma
                pl.BlockSpec((1, C), lambda b: (0, 0), **const_kw),  # mean_t(gamma)
                pl.BlockSpec((1, C), lambda b: (0, 0), **const_kw),  # mean_t(beta)
                pl.BlockSpec((n_slots * C_lane, O_pad),
                             lambda b: (0, 0), **const_kw),          # fused W
            ],
            out_specs=pl.BlockSpec((TB, O_pad), lambda b: (b, 0)),
            scratch_shapes=[
                pltpu.VMEM((TB, C), jnp.float32),                    # pooled
                pltpu.VMEM((TB, n_slots * C_lane), jnp.float32),     # bflat
            ],
        )
        return pl.pallas_call(
            kernel,
            out_shape=jax.ShapeDtypeStruct((Bp, O_pad), jnp.float32),
            grid_spec=grid_spec,
            compiler_params=pltpu.CompilerParams(
                dimension_semantics=("parallel",),
                vmem_limit_bytes=vmem_limit),
        )(tab, xb, gamma, gmean, bmean, wf)

    try:
        # Grid-invariant inputs single-buffered (halves their VMEM footprint).
        out = call(True)
    except Exception:
        # pipeline_mode=pl.Buffered(1) unsupported here; the VMEM budget above
        # already assumed double-buffered weights, so this is safe.
        out = call(False)

    return out[:B, :O]


def init_params(key, n_tokens, n_channel, n_output,
                grid_size=GRID_SIZE, spline_order=SPLINE_ORDER,
                grid_range=(-1.0, 1.0)):
    """Deterministic synthetic parameter init (shapes match KANLinear/LayerNorm)."""
    k1, k2, k3 = jax.random.split(key, 3)
    h = (grid_range[1] - grid_range[0]) / grid_size
    knots = (jnp.arange(-spline_order, grid_size + spline_order + 1,
                        dtype=jnp.float32) * h + grid_range[0])
    grid = jnp.tile(knots[None, :], (n_channel, 1))        # (C, n_knots)
    n_basis = grid_size + spline_order
    return dict(
        ln_weight=jnp.ones((n_tokens, n_channel), jnp.float32),
        ln_bias=jnp.zeros((n_tokens, n_channel), jnp.float32),
        grid=grid,
        base_weight=0.5 * jax.random.normal(k1, (n_output, n_channel), jnp.float32),
        spline_weight=0.1 * jax.random.normal(
            k2, (n_output, n_channel, n_basis), jnp.float32),
        spline_scaler=1.0 + 0.1 * jax.random.normal(
            k3, (n_output, n_channel), jnp.float32),
    )


def ref_forward(x, params, spline_order=SPLINE_ORDER):
    """Pure-JAX (f32) reference mirroring the PyTorch forward semantics."""
    gamma, beta = params["ln_weight"], params["ln_bias"]
    g = params["grid"]                                      # (C, n_knots)
    mean = x.mean(axis=(1, 2), keepdims=True)
    var = ((x - mean) ** 2).mean(axis=(1, 2), keepdims=True)
    xn = (x - mean) / jnp.sqrt(var + LN_EPS) * gamma + beta
    pooled = xn.mean(axis=1)                                # (B, C)

    xg = pooled[:, :, None]                                 # (B, C, 1)
    gb = g[None]                                            # (1, C, n_knots)
    bases = jnp.logical_and(xg >= gb[..., :-1], xg < gb[..., 1:]).astype(jnp.float32)
    for k in range(1, spline_order + 1):
        bases = ((xg - gb[..., :-(k + 1)]) / (gb[..., k:-1] - gb[..., :-(k + 1)])
                 * bases[..., :-1]
                 + (gb[..., k + 1:] - xg) / (gb[..., k + 1:] - gb[..., 1:-k])
                 * bases[..., 1:])

    base_out = jax.nn.silu(pooled) @ params["base_weight"].T
    scaled_w = params["spline_weight"] * params["spline_scaler"][..., None]
    sp_out = jnp.einsum("bcj,ocj->bo", bases, scaled_w)
    return base_out + sp_out


if __name__ == "__main__":
    B, n_tokens, n_channel, n_output = 16, 8, 32, 10

    key = jax.random.PRNGKey(0)
    kx, kp = jax.random.split(key)
    x = jax.random.normal(kx, (B, n_tokens, n_channel), jnp.float32)
    params = init_params(kp, n_tokens, n_channel, n_output)

    out = output_kan_forward(x, params)
    out = jax.block_until_ready(out)

    ref = ref_forward(x, params)
    assert out.shape == (B, n_output), out.shape
    # Tolerance widened vs pure-f32: x is streamed as bf16 and MXU operands are
    # bf16 (f32 accumulate), per the performance review.
    assert jnp.allclose(out, ref, rtol=3e-2, atol=3e-2), (out, ref)

    print("KERNEL_OK")
</pallas_src>

<mosaic_0001>
module attributes {stable_mosaic.version = 11 : i64} {
  func.func @output_kan_kernel(%arg0: i32, %arg1: memref<66xf32, #tpu.memory_space<smem>>, %arg2: memref<8x8x32xbf16, #tpu.memory_space<vmem>>, %arg3: memref<8x32xf32, #tpu.memory_space<vmem>>, %arg4: memref<1x32xf32, #tpu.memory_space<vmem>>, %arg5: memref<1x32xf32, #tpu.memory_space<vmem>>, %arg6: memref<1152x128xbf16, #tpu.memory_space<vmem>>, %arg7: memref<8x128xf32, #tpu.memory_space<vmem>>, %arg8: memref<8x32xf32, #tpu.memory_space<vmem>>, %arg9: memref<8x1152xf32, #tpu.memory_space<vmem>>) attributes {dimension_semantics = [#tpu.dimension_semantics<parallel>], iteration_bounds = array<i64: 2>, scalar_prefetch = 0 : i64, scratch_operands = 2 : i64, tpu.core_type = #tpu.core_type<tc>, window_params = [{transform_indices = @transform_0, window_bounds = array<i64: 66>}, {transform_indices = @transform_1, window_bounds = array<i64: 8, 8, 32>}, {pipeline_mode = #tpu.pipeline_mode<synchronous>, transform_indices = @transform_2, window_bounds = array<i64: 8, 32>}, {pipeline_mode = #tpu.pipeline_mode<synchronous>, transform_indices = @transform_3, window_bounds = array<i64: 1, 32>}, {pipeline_mode = #tpu.pipeline_mode<synchronous>, transform_indices = @transform_4, window_bounds = array<i64: 1, 32>}, {pipeline_mode = #tpu.pipeline_mode<synchronous>, transform_indices = @transform_5, window_bounds = array<i64: 1152, 128>}, {transform_indices = @transform_6, window_bounds = array<i64: 8, 128>}]} {
    %c0 = arith.constant 0 : index
    %c0_0 = arith.constant 0 : index
    %c0_1 = arith.constant 0 : index
    %0 = vector.load %arg2[%c0, %c0_0, %c0_1] : memref<8x8x32xbf16, #tpu.memory_space<vmem>>, vector<8x8x32xbf16>
    %1 = arith.extf %0 : vector<8x8x32xbf16> to vector<8x8x32xf32>
    %c0_2 = arith.constant 0 : index
    %c0_3 = arith.constant 0 : index
    %2 = vector.load %arg3[%c0_2, %c0_3] : memref<8x32xf32, #tpu.memory_space<vmem>>, vector<8x32xf32>
    %cst = arith.constant dense<0.000000e+00> : vector<8x32xf32>
    %3 = vector.multi_reduction <add>, %1, %cst [1] : vector<8x8x32xf32> to vector<8x32xf32>
    %4 = arith.mulf %1, %1 : vector<8x8x32xf32>
    %cst_4 = arith.constant dense<0.000000e+00> : vector<8x32xf32>
    %5 = vector.multi_reduction <add>, %4, %cst_4 [1] : vector<8x8x32xf32> to vector<8x32xf32>
    %cst_5 = arith.constant dense<0.000000e+00> : vector<8xf32>
    %6 = vector.multi_reduction <add>, %3, %cst_5 [1] : vector<8x32xf32> to vector<8xf32>
    %7 = vector.shape_cast %6 : vector<8xf32> to vector<8x1xf32>
    %cst_6 = arith.constant dense<0.000000e+00> : vector<8xf32>
    %8 = vector.multi_reduction <add>, %5, %cst_6 [1] : vector<8x32xf32> to vector<8xf32>
    %9 = vector.shape_cast %8 : vector<8xf32> to vector<8x1xf32>
    %cst_7 = arith.constant 3.906250e-03 : f32
    %10 = vector.broadcast %cst_7 : f32 to vector<8x1xf32>
    %11 = arith.mulf %7, %10 : vector<8x1xf32>
    %cst_8 = arith.constant 3.906250e-03 : f32
    %12 = vector.broadcast %cst_8 : f32 to vector<8x1xf32>
    %13 = arith.mulf %9, %12 : vector<8x1xf32>
    %14 = arith.mulf %11, %11 : vector<8x1xf32>
    %15 = arith.subf %13, %14 : vector<8x1xf32>
    %cst_9 = arith.constant 9.99999974E-6 : f32
    %16 = vector.broadcast %cst_9 : f32 to vector<8x1xf32>
    %17 = arith.addf %15, %16 : vector<8x1xf32>
    %18 = math.rsqrt %17 : vector<8x1xf32>
    %19 = vector.shape_cast %2 : vector<8x32xf32> to vector<1x8x32xf32>
    %20 = vector.broadcast %19 : vector<1x8x32xf32> to vector<8x8x32xf32>
    %21 = arith.mulf %1, %20 : vector<8x8x32xf32>
    %cst_10 = arith.constant dense<0.000000e+00> : vector<8x32xf32>
    %22 = vector.multi_reduction <add>, %21, %cst_10 [1] : vector<8x8x32xf32> to vector<8x32xf32>
    %cst_11 = arith.constant 1.250000e-01 : f32
    %23 = vector.broadcast %cst_11 : f32 to vector<8x32xf32>
    %24 = arith.mulf %22, %23 : vector<8x32xf32>
    %c0_12 = arith.constant 0 : index
    %c0_13 = arith.constant 0 : index
    %25 = vector.load %arg4[%c0_12, %c0_13] : memref<1x32xf32, #tpu.memory_space<vmem>>, vector<1x32xf32>
    %26 = vector.broadcast %11 : vector<8x1xf32> to vector<8x32xf32>
    %27 = vector.broadcast %25 : vector<1x32xf32> to vector<8x32xf32>
    %28 = arith.mulf %26, %27 : vector<8x32xf32>
    %29 = arith.subf %24, %28 : vector<8x32xf32>
    %30 = vector.broadcast %18 : vector<8x1xf32> to vector<8x32xf32>
    %31 = arith.mulf %30, %29 : vector<8x32xf32>
    %c0_14 = arith.constant 0 : index
    %c0_15 = arith.constant 0 : index
    %32 = vector.load %arg5[%c0_14, %c0_15] : memref<1x32xf32, #tpu.memory_space<vmem>>, vector<1x32xf32>
    %33 = vector.broadcast %32 : vector<1x32xf32> to vector<8x32xf32>
    %34 = arith.addf %31, %33 : vector<8x32xf32>
    %c0_16 = arith.constant 0 : index
    %c0_17 = arith.constant 0 : index
    %35 = vector.load %arg8[%c0_16, %c0_17] : memref<8x32xf32, #tpu.memory_space<vmem>>, vector<8x32xf32>
    tpu.vector_store %arg8[%c0_16, %c0_17], %34 {strides = array<i32>} : memref<8x32xf32, #tpu.memory_space<vmem>>, vector<8x32xf32>,
    %cst_18 = arith.constant 0.000000e+00 : f32
    %36 = vector.broadcast %cst_18 : f32 to vector<8x1152xf32>
    %c0_19 = arith.constant 0 : index
    %c0_20 = arith.constant 0 : index
    %37 = vector.load %arg9[%c0_19, %c0_20] : memref<8x1152xf32, #tpu.memory_space<vmem>>, vector<8x1152xf32>
    tpu.vector_store %arg9[%c0_19, %c0_20], %36 {strides = array<i32>} : memref<8x1152xf32, #tpu.memory_space<vmem>>, vector<8x1152xf32>,
    %c0_21 = arith.constant 0 : index
    %c0_22 = arith.constant 0 : index
    %38 = vector.load %arg8[%c0_21, %c0_22] : memref<8x32xf32, #tpu.memory_space<vmem>>, vector<8x32xf32>
    %39 = arith.negf %38 : vector<8x32xf32>
    %40 = math.exp %39 : vector<8x32xf32>
    %cst_23 = arith.constant 1.000000e+00 : f32
    %41 = vector.broadcast %cst_23 : f32 to vector<8x32xf32>
    %42 = arith.addf %41, %40 : vector<8x32xf32>
    %43 = arith.divf %41, %42 : vector<8x32xf32>
    %44 = arith.mulf %38, %43 : vector<8x32xf32>
    %c0_24 = arith.constant 0 : index
    %c0_25 = arith.constant 0 : index
    %45 = vector.load %arg9[%c0_24, %c0_25] : memref<8x1152xf32, #tpu.memory_space<vmem>>, vector<8x32xf32>
    tpu.vector_store %arg9[%c0_24, %c0_25], %44 {strides = array<i32>} : memref<8x1152xf32, #tpu.memory_space<vmem>>, vector<8x32xf32>,
    %c0_26 = arith.constant 0 : index
    %46 = memref.load %arg1[%c0_26] : memref<66xf32, #tpu.memory_space<smem>>
    %47 = vector.broadcast %46 : f32 to vector<8x32xf32>
    %48 = arith.cmpf oge, %38, %47 : vector<8x32xf32>
    %49 = arith.extui %48 : vector<8x32xi1> to vector<8x32xi32>
    %50 = arith.sitofp %49 : vector<8x32xi32> to vector<8x32xf32>
    %c1 = arith.constant 1 : index
    %51 = memref.load %arg1[%c1] : memref<66xf32, #tpu.memory_space<smem>>
    %52 = vector.broadcast %51 : f32 to vector<8x32xf32>
    %53 = arith.cmpf oge, %38, %52 : vector<8x32xf32>
    %54 = arith.extui %53 : vector<8x32xi1> to vector<8x32xi32>
    %55 = arith.sitofp %54 : vector<8x32xi32> to vector<8x32xf32>
    %c2 = arith.constant 2 : index
    %56 = memref.load %arg1[%c2] : memref<66xf32, #tpu.memory_space<smem>>
    %57 = vector.broadcast %56 : f32 to vector<8x32xf32>
    %58 = arith.cmpf oge, %38, %57 : vector<8x32xf32>
    %59 = arith.extui %58 : vector<8x32xi1> to vector<8x32xi32>
    %60 = arith.sitofp %59 : vector<8x32xi32> to vector<8x32xf32>
    %c3 = arith.constant 3 : index
    %61 = memref.load %arg1[%c3] : memref<66xf32, #tpu.memory_space<smem>>
    %62 = vector.broadcast %61 : f32 to vector<8x32xf32>
    %63 = arith.cmpf oge, %38, %62 : vector<8x32xf32>
    %64 = arith.extui %63 : vector<8x32xi1> to vector<8x32xi32>
    %65 = arith.sitofp %64 : vector<8x32xi32> to vector<8x32xf32>
    %c4 = arith.constant 4 : index
    %66 = memref.load %arg1[%c4] : memref<66xf32, #tpu.memory_space<smem>>
    %67 = vector.broadcast %66 : f32 to vector<8x32xf32>
    %68 = arith.cmpf oge, %38, %67 : vector<8x32xf32>
    %69 = arith.extui %68 : vector<8x32xi1> to vector<8x32xi32>
    %70 = arith.sitofp %69 : vector<8x32xi32> to vector<8x32xf32>
    %c5 = arith.constant 5 : index
    %71 = memref.load %arg1[%c5] : memref<66xf32, #tpu.memory_space<smem>>
    %72 = vector.broadcast %71 : f32 to vector<8x32xf32>
    %73 = arith.cmpf oge, %38, %72 : vector<8x32xf32>
    %74 = arith.extui %73 : vector<8x32xi1> to vector<8x32xi32>
    %75 = arith.sitofp %74 : vector<8x32xi32> to vector<8x32xf32>
    %c6 = arith.constant 6 : index
    %76 = memref.load %arg1[%c6] : memref<66xf32, #tpu.memory_space<smem>>
    %77 = vector.broadcast %76 : f32 to vector<8x32xf32>
    %78 = arith.cmpf oge, %38, %77 : vector<8x32xf32>
    %79 = arith.extui %78 : vector<8x32xi1> to vector<8x32xi32>
    %80 = arith.sitofp %79 : vector<8x32xi32> to vector<8x32xf32>
    %c7 = arith.constant 7 : index
    %81 = memref.load %arg1[%c7] : memref<66xf32, #tpu.memory_space<smem>>
    %82 = vector.broadcast %81 : f32 to vector<8x32xf32>
    %83 = arith.cmpf oge, %38, %82 : vector<8x32xf32>
    %84 = arith.extui %83 : vector<8x32xi1> to vector<8x32xi32>
    %85 = arith.sitofp %84 : vector<8x32xi32> to vector<8x32xf32>
    %c8 = arith.constant 8 : index
    %86 = memref.load %arg1[%c8] : memref<66xf32, #tpu.memory_space<smem>>
    %87 = vector.broadcast %86 : f32 to vector<8x32xf32>
    %88 = arith.cmpf oge, %38, %87 : vector<8x32xf32>
    %89 = arith.extui %88 : vector<8x32xi1> to vector<8x32xi32>
    %90 = arith.sitofp %89 : vector<8x32xi32> to vector<8x32xf32>
    %c9 = arith.constant 9 : index
    %91 = memref.load %arg1[%c9] : memref<66xf32, #tpu.memory_space<smem>>
    %92 = vector.broadcast %91 : f32 to vector<8x32xf32>
    %93 = arith.cmpf oge, %38, %92 : vector<8x32xf32>
    %94 = arith.extui %93 : vector<8x32xi1> to vector<8x32xi32>
    %95 = arith.sitofp %94 : vector<8x32xi32> to vector<8x32xf32>
    %c10 = arith.constant 10 : index
    %96 = memref.load %arg1[%c10] : memref<66xf32, #tpu.memory_space<smem>>
    %97 = vector.broadcast %96 : f32 to vector<8x32xf32>
    %98 = arith.cmpf oge, %38, %97 : vector<8x32xf32>
    %99 = arith.extui %98 : vector<8x32xi1> to vector<8x32xi32>
    %100 = arith.sitofp %99 : vector<8x32xi32> to vector<8x32xf32>
    %c11 = arith.constant 11 : index
    %101 = memref.load %arg1[%c11] : memref<66xf32, #tpu.memory_space<smem>>
    %102 = vector.broadcast %101 : f32 to vector<8x32xf32>
    %103 = arith.cmpf oge, %38, %102 : vector<8x32xf32>
    %104 = arith.extui %103 : vector<8x32xi1> to vector<8x32xi32>
    %105 = arith.sitofp %104 : vector<8x32xi32> to vector<8x32xf32>
    %106 = arith.subf %50, %55 : vector<8x32xf32>
    %107 = arith.subf %55, %60 : vector<8x32xf32>
    %108 = arith.subf %60, %65 : vector<8x32xf32>
    %109 = arith.subf %65, %70 : vector<8x32xf32>
    %110 = arith.subf %70, %75 : vector<8x32xf32>
    %111 = arith.subf %75, %80 : vector<8x32xf32>
    %112 = arith.subf %80, %85 : vector<8x32xf32>
    %113 = arith.subf %85, %90 : vector<8x32xf32>
    %114 = arith.subf %90, %95 : vector<8x32xf32>
    %115 = arith.subf %95, %100 : vector<8x32xf32>
    %116 = arith.subf %100, %105 : vector<8x32xf32>
    %c0_27 = arith.constant 0 : index
    %117 = memref.load %arg1[%c0_27] : memref<66xf32, #tpu.memory_space<smem>>
    %118 = vector.broadcast %117 : f32 to vector<8x32xf32>
    %119 = arith.subf %38, %118 : vector<8x32xf32>
    %c1_28 = arith.constant 1 : index
    %120 = memref.load %arg1[%c1_28] : memref<66xf32, #tpu.memory_space<smem>>
    %121 = vector.broadcast %120 : f32 to vector<8x32xf32>
    %122 = arith.subf %38, %121 : vector<8x32xf32>
    %c2_29 = arith.constant 2 : index
    %123 = memref.load %arg1[%c2_29] : memref<66xf32, #tpu.memory_space<smem>>
    %124 = vector.broadcast %123 : f32 to vector<8x32xf32>
    %125 = arith.subf %38, %124 : vector<8x32xf32>
    %c3_30 = arith.constant 3 : index
    %126 = memref.load %arg1[%c3_30] : memref<66xf32, #tpu.memory_space<smem>>
    %127 = vector.broadcast %126 : f32 to vector<8x32xf32>
    %128 = arith.subf %38, %127 : vector<8x32xf32>
    %c4_31 = arith.constant 4 : index
    %129 = memref.load %arg1[%c4_31] : memref<66xf32, #tpu.memory_space<smem>>
    %130 = vector.broadcast %129 : f32 to vector<8x32xf32>
    %131 = arith.subf %38, %130 : vector<8x32xf32>
    %c5_32 = arith.constant 5 : index
    %132 = memref.load %arg1[%c5_32] : memref<66xf32, #tpu.memory_space<smem>>
    %133 = vector.broadcast %132 : f32 to vector<8x32xf32>
    %134 = arith.subf %38, %133 : vector<8x32xf32>
    %c6_33 = arith.constant 6 : index
    %135 = memref.load %arg1[%c6_33] : memref<66xf32, #tpu.memory_space<smem>>
    %136 = vector.broadcast %135 : f32 to vector<8x32xf32>
    %137 = arith.subf %38, %136 : vector<8x32xf32>
    %c7_34 = arith.constant 7 : index
    %138 = memref.load %arg1[%c7_34] : memref<66xf32, #tpu.memory_space<smem>>
    %139 = vector.broadcast %138 : f32 to vector<8x32xf32>
    %140 = arith.subf %38, %139 : vector<8x32xf32>
    %c8_35 = arith.constant 8 : index
    %141 = memref.load %arg1[%c8_35] : memref<66xf32, #tpu.memory_space<smem>>
    %142 = vector.broadcast %141 : f32 to vector<8x32xf32>
    %143 = arith.subf %38, %142 : vector<8x32xf32>
    %c9_36 = arith.constant 9 : index
    %144 = memref.load %arg1[%c9_36] : memref<66xf32, #tpu.memory_space<smem>>
    %145 = vector.broadcast %144 : f32 to vector<8x32xf32>
    %146 = arith.subf %38, %145 : vector<8x32xf32>
    %c10_37 = arith.constant 10 : index
    %147 = memref.load %arg1[%c10_37] : memref<66xf32, #tpu.memory_space<smem>>
    %148 = vector.broadcast %147 : f32 to vector<8x32xf32>
    %149 = arith.subf %38, %148 : vector<8x32xf32>
    %c11_38 = arith.constant 11 : index
    %150 = memref.load %arg1[%c11_38] : memref<66xf32, #tpu.memory_space<smem>>
    %151 = vector.broadcast %150 : f32 to vector<8x32xf32>
    %152 = arith.subf %38, %151 : vector<8x32xf32>
    %c12 = arith.constant 12 : index
    %153 = memref.load %arg1[%c12] : memref<66xf32, #tpu.memory_space<smem>>
    %154 = vector.broadcast %153 : f32 to vector<8x32xf32>
    %155 = arith.mulf %119, %154 : vector<8x32xf32>
    %156 = arith.mulf %155, %106 : vector<8x32xf32>
    %c22 = arith.constant 22 : index
    %157 = memref.load %arg1[%c22] : memref<66xf32, #tpu.memory_space<smem>>
    %158 = vector.broadcast %157 : f32 to vector<8x32xf32>
    %159 = arith.mulf %125, %158 : vector<8x32xf32>
    %160 = arith.mulf %159, %107 : vector<8x32xf32>
    %161 = arith.subf %156, %160 : vector<8x32xf32>
    %c13 = arith.constant 13 : index
    %162 = memref.load %arg1[%c13] : memref<66xf32, #tpu.memory_space<smem>>
    %163 = vector.broadcast %162 : f32 to vector<8x32xf32>
    %164 = arith.mulf %122, %163 : vector<8x32xf32>
    %165 = arith.mulf %164, %107 : vector<8x32xf32>
    %c23 = arith.constant 23 : index
    %166 = memref.load %arg1[%c23] : memref<66xf32, #tpu.memory_space<smem>>
    %167 = vector.broadcast %166 : f32 to vector<8x32xf32>
    %168 = arith.mulf %128, %167 : vector<8x32xf32>
    %169 = arith.mulf %168, %108 : vector<8x32xf32>
    %170 = arith.subf %165, %169 : vector<8x32xf32>
    %c14 = arith.constant 14 : index
    %171 = memref.load %arg1[%c14] : memref<66xf32, #tpu.memory_space<smem>>
    %172 = vector.broadcast %171 : f32 to vector<8x32xf32>
    %173 = arith.mulf %125, %172 : vector<8x32xf32>
    %174 = arith.mulf %173, %108 : vector<8x32xf32>
    %c24 = arith.constant 24 : index
    %175 = memref.load %arg1[%c24] : memref<66xf32, #tpu.memory_space<smem>>
    %176 = vector.broadcast %175 : f32 to vector<8x32xf32>
    %177 = arith.mulf %131, %176 : vector<8x32xf32>
    %178 = arith.mulf %177, %109 : vector<8x32xf32>
    %179 = arith.subf %174, %178 : vector<8x32xf32>
    %c15 = arith.constant 15 : index
    %180 = memref.load %arg1[%c15] : memref<66xf32, #tpu.memory_space<smem>>
    %181 = vector.broadcast %180 : f32 to vector<8x32xf32>
    %182 = arith.mulf %128, %181 : vector<8x32xf32>
    %183 = arith.mulf %182, %109 : vector<8x32xf32>
    %c25 = arith.constant 25 : index
    %184 = memref.load %arg1[%c25] : memref<66xf32, #tpu.memory_space<smem>>
    %185 = vector.broadcast %184 : f32 to vector<8x32xf32>
    %186 = arith.mulf %134, %185 : vector<8x32xf32>
    %187 = arith.mulf %186, %110 : vector<8x32xf32>
    %188 = arith.subf %183, %187 : vector<8x32xf32>
    %c16 = arith.constant 16 : index
    %189 = memref.load %arg1[%c16] : memref<66xf32, #tpu.memory_space<smem>>
    %190 = vector.broadcast %189 : f32 to vector<8x32xf32>
    %191 = arith.mulf %131, %190 : vector<8x32xf32>
    %192 = arith.mulf %191, %110 : vector<8x32xf32>
    %c26 = arith.constant 26 : index
    %193 = memref.load %arg1[%c26] : memref<66xf32, #tpu.memory_space<smem>>
    %194 = vector.broadcast %193 : f32 to vector<8x32xf32>
    %195 = arith.mulf %137, %194 : vector<8x32xf32>
    %196 = arith.mulf %195, %111 : vector<8x32xf32>
    %197 = arith.subf %192, %196 : vector<8x32xf32>
    %c17 = arith.constant 17 : index
    %198 = memref.load %arg1[%c17] : memref<66xf32, #tpu.memory_space<smem>>
    %199 = vector.broadcast %198 : f32 to vector<8x32xf32>
    %200 = arith.mulf %134, %199 : vector<8x32xf32>
    %201 = arith.mulf %200, %111 : vector<8x32xf32>
    %c27 = arith.constant 27 : index
    %202 = memref.load %arg1[%c27] : memref<66xf32, #tpu.memory_space<smem>>
    %203 = vector.broadcast %202 : f32 to vector<8x32xf32>
    %204 = arith.mulf %140, %203 : vector<8x32xf32>
    %205 = arith.mulf %204, %112 : vector<8x32xf32>
    %206 = arith.subf %201, %205 : vector<8x32xf32>
    %c18 = arith.constant 18 : index
    %207 = memref.load %arg1[%c18] : memref<66xf32, #tpu.memory_space<smem>>
    %208 = vector.broadcast %207 : f32 to vector<8x32xf32>
    %209 = arith.mulf %137, %208 : vector<8x32xf32>
    %210 = arith.mulf %209, %112 : vector<8x32xf32>
    %c28 = arith.constant 28 : index
    %211 = memref.load %arg1[%c28] : memref<66xf32, #tpu.memory_space<smem>>
    %212 = vector.broadcast %211 : f32 to vector<8x32xf32>
    %213 = arith.mulf %143, %212 : vector<8x32xf32>
    %214 = arith.mulf %213, %113 : vector<8x32xf32>
    %215 = arith.subf %210, %214 : vector<8x32xf32>
    %c19 = arith.constant 19 : index
    %216 = memref.load %arg1[%c19] : memref<66xf32, #tpu.memory_space<smem>>
    %217 = vector.broadcast %216 : f32 to vector<8x32xf32>
    %218 = arith.mulf %140, %217 : vector<8x32xf32>
    %219 = arith.mulf %218, %113 : vector<8x32xf32>
    %c29 = arith.constant 29 : index
    %220 = memref.load %arg1[%c29] : memref<66xf32, #tpu.memory_space<smem>>
    %221 = vector.broadcast %220 : f32 to vector<8x32xf32>
    %222 = arith.mulf %146, %221 : vector<8x32xf32>
    %223 = arith.mulf %222, %114 : vector<8x32xf32>
    %224 = arith.subf %219, %223 : vector<8x32xf32>
    %c20 = arith.constant 20 : index
    %225 = memref.load %arg1[%c20] : memref<66xf32, #tpu.memory_space<smem>>
    %226 = vector.broadcast %225 : f32 to vector<8x32xf32>
    %227 = arith.mulf %143, %226 : vector<8x32xf32>
    %228 = arith.mulf %227, %114 : vector<8x32xf32>
    %c30 = arith.constant 30 : index
    %229 = memref.load %arg1[%c30] : memref<66xf32, #tpu.memory_space<smem>>
    %230 = vector.broadcast %229 : f32 to vector<8x32xf32>
    %231 = arith.mulf %149, %230 : vector<8x32xf32>
    %232 = arith.mulf %231, %115 : vector<8x32xf32>
    %233 = arith.subf %228, %232 : vector<8x32xf32>
    %c21 = arith.constant 21 : index
    %234 = memref.load %arg1[%c21] : memref<66xf32, #tpu.memory_space<smem>>
    %235 = vector.broadcast %234 : f32 to vector<8x32xf32>
    %236 = arith.mulf %146, %235 : vector<8x32xf32>
    %237 = arith.mulf %236, %115 : vector<8x32xf32>
    %c31 = arith.constant 31 : index
    %238 = memref.load %arg1[%c31] : memref<66xf32, #tpu.memory_space<smem>>
    %239 = vector.broadcast %238 : f32 to vector<8x32xf32>
    %240 = arith.mulf %152, %239 : vector<8x32xf32>
    %241 = arith.mulf %240, %116 : vector<8x32xf32>
    %242 = arith.subf %237, %241 : vector<8x32xf32>
    %c32 = arith.constant 32 : index
    %243 = memref.load %arg1[%c32] : memref<66xf32, #tpu.memory_space<smem>>
    %244 = vector.broadcast %243 : f32 to vector<8x32xf32>
    %245 = arith.mulf %119, %244 : vector<8x32xf32>
    %246 = arith.mulf %245, %161 : vector<8x32xf32>
    %c41 = arith.constant 41 : index
    %247 = memref.load %arg1[%c41] : memref<66xf32, #tpu.memory_space<smem>>
    %248 = vector.broadcast %247 : f32 to vector<8x32xf32>
    %249 = arith.mulf %128, %248 : vector<8x32xf32>
    %250 = arith.mulf %249, %170 : vector<8x32xf32>
    %251 = arith.subf %246, %250 : vector<8x32xf32>
    %c33 = arith.constant 33 : index
    %252 = memref.load %arg1[%c33] : memref<66xf32, #tpu.memory_space<smem>>
    %253 = vector.broadcast %252 : f32 to vector<8x32xf32>
    %254 = arith.mulf %122, %253 : vector<8x32xf32>
    %255 = arith.mulf %254, %170 : vector<8x32xf32>
    %c42 = arith.constant 42 : index
    %256 = memref.load %arg1[%c42] : memref<66xf32, #tpu.memory_space<smem>>
    %257 = vector.broadcast %256 : f32 to vector<8x32xf32>
    %258 = arith.mulf %131, %257 : vector<8x32xf32>
    %259 = arith.mulf %258, %179 : vector<8x32xf32>
    %260 = arith.subf %255, %259 : vector<8x32xf32>
    %c34 = arith.constant 34 : index
    %261 = memref.load %arg1[%c34] : memref<66xf32, #tpu.memory_space<smem>>
    %262 = vector.broadcast %261 : f32 to vector<8x32xf32>
    %263 = arith.mulf %125, %262 : vector<8x32xf32>
    %264 = arith.mulf %263, %179 : vector<8x32xf32>
    %c43 = arith.constant 43 : index
    %265 = memref.load %arg1[%c43] : memref<66xf32, #tpu.memory_space<smem>>
    %266 = vector.broadcast %265 : f32 to vector<8x32xf32>
    %267 = arith.mulf %134, %266 : vector<8x32xf32>
    %268 = arith.mulf %267, %188 : vector<8x32xf32>
    %269 = arith.subf %264, %268 : vector<8x32xf32>
    %c35 = arith.constant 35 : index
    %270 = memref.load %arg1[%c35] : memref<66xf32, #tpu.memory_space<smem>>
    %271 = vector.broadcast %270 : f32 to vector<8x32xf32>
    %272 = arith.mulf %128, %271 : vector<8x32xf32>
    %273 = arith.mulf %272, %188 : vector<8x32xf32>
    %c44 = arith.constant 44 : index
    %274 = memref.load %arg1[%c44] : memref<66xf32, #tpu.memory_space<smem>>
    %275 = vector.broadcast %274 : f32 to vector<8x32xf32>
    %276 = arith.mulf %137, %275 : vector<8x32xf32>
    %277 = arith.mulf %276, %197 : vector<8x32xf32>
    %278 = arith.subf %273, %277 : vector<8x32xf32>
    %c36 = arith.constant 36 : index
    %279 = memref.load %arg1[%c36] : memref<66xf32, #tpu.memory_space<smem>>
    %280 = vector.broadcast %279 : f32 to vector<8x32xf32>
    %281 = arith.mulf %131, %280 : vector<8x32xf32>
    %282 = arith.mulf %281, %197 : vector<8x32xf32>
    %c45 = arith.constant 45 : index
    %283 = memref.load %arg1[%c45] : memref<66xf32, #tpu.memory_space<smem>>
    %284 = vector.broadcast %283 : f32 to vector<8x32xf32>
    %285 = arith.mulf %140, %284 : vector<8x32xf32>
    %286 = arith.mulf %285, %206 : vector<8x32xf32>
    %287 = arith.subf %282, %286 : vector<8x32xf32>
    %c37 = arith.constant 37 : index
    %288 = memref.load %arg1[%c37] : memref<66xf32, #tpu.memory_space<smem>>
    %289 = vector.broadcast %288 : f32 to vector<8x32xf32>
    %290 = arith.mulf %134, %289 : vector<8x32xf32>
    %291 = arith.mulf %290, %206 : vector<8x32xf32>
    %c46 = arith.constant 46 : index
    %292 = memref.load %arg1[%c46] : memref<66xf32, #tpu.memory_space<smem>>
    %293 = vector.broadcast %292 : f32 to vector<8x32xf32>
    %294 = arith.mulf %143, %293 : vector<8x32xf32>
    %295 = arith.mulf %294, %215 : vector<8x32xf32>
    %296 = arith.subf %291, %295 : vector<8x32xf32>
    %c38 = arith.constant 38 : index
    %297 = memref.load %arg1[%c38] : memref<66xf32, #tpu.memory_space<smem>>
    %298 = vector.broadcast %297 : f32 to vector<8x32xf32>
    %299 = arith.mulf %137, %298 : vector<8x32xf32>
    %300 = arith.mulf %299, %215 : vector<8x32xf32>
    %c47 = arith.constant 47 : index
    %301 = memref.load %arg1[%c47] : memref<66xf32, #tpu.memory_space<smem>>
    %302 = vector.broadcast %301 : f32 to vector<8x32xf32>
    %303 = arith.mulf %146, %302 : vector<8x32xf32>
    %304 = arith.mulf %303, %224 : vector<8x32xf32>
    %305 = arith.subf %300, %304 : vector<8x32xf32>
    %c39 = arith.constant 39 : index
    %306 = memref.load %arg1[%c39] : memref<66xf32, #tpu.memory_space<smem>>
    %307 = vector.broadcast %306 : f32 to vector<8x32xf32>
    %308 = arith.mulf %140, %307 : vector<8x32xf32>
    %309 = arith.mulf %308, %224 : vector<8x32xf32>
    %c48 = arith.constant 48 : index
    %310 = memref.load %arg1[%c48] : memref<66xf32, #tpu.memory_space<smem>>
    %311 = vector.broadcast %310 : f32 to vector<8x32xf32>
    %312 = arith.mulf %149, %311 : vector<8x32xf32>
    %313 = arith.mulf %312, %233 : vector<8x32xf32>
    %314 = arith.subf %309, %313 : vector<8x32xf32>
    %c40 = arith.constant 40 : index
    %315 = memref.load %arg1[%c40] : memref<66xf32, #tpu.memory_space<smem>>
    %316 = vector.broadcast %315 : f32 to vector<8x32xf32>
    %317 = arith.mulf %143, %316 : vector<8x32xf32>
    %318 = arith.mulf %317, %233 : vector<8x32xf32>
    %c49 = arith.constant 49 : index
    %319 = memref.load %arg1[%c49] : memref<66xf32, #tpu.memory_space<smem>>
    %320 = vector.broadcast %319 : f32 to vector<8x32xf32>
    %321 = arith.mulf %152, %320 : vector<8x32xf32>
    %322 = arith.mulf %321, %242 : vector<8x32xf32>
    %323 = arith.subf %318, %322 : vector<8x32xf32>
    %c50 = arith.constant 50 : index
    %324 = memref.load %arg1[%c50] : memref<66xf32, #tpu.memory_space<smem>>
    %325 = vector.broadcast %324 : f32 to vector<8x32xf32>
    %326 = arith.mulf %119, %325 : vector<8x32xf32>
    %327 = arith.mulf %326, %251 : vector<8x32xf32>
    %c58 = arith.constant 58 : index
    %328 = memref.load %arg1[%c58] : memref<66xf32, #tpu.memory_space<smem>>
    %329 = vector.broadcast %328 : f32 to vector<8x32xf32>
    %330 = arith.mulf %131, %329 : vector<8x32xf32>
    %331 = arith.mulf %330, %260 : vector<8x32xf32>
    %332 = arith.subf %327, %331 : vector<8x32xf32>
    %c51 = arith.constant 51 : index
    %333 = memref.load %arg1[%c51] : memref<66xf32, #tpu.memory_space<smem>>
    %334 = vector.broadcast %333 : f32 to vector<8x32xf32>
    %335 = arith.mulf %122, %334 : vector<8x32xf32>
    %336 = arith.mulf %335, %260 : vector<8x32xf32>
    %c59 = arith.constant 59 : index
    %337 = memref.load %arg1[%c59] : memref<66xf32, #tpu.memory_space<smem>>
    %338 = vector.broadcast %337 : f32 to vector<8x32xf32>
    %339 = arith.mulf %134, %338 : vector<8x32xf32>
    %340 = arith.mulf %339, %269 : vector<8x32xf32>
    %341 = arith.subf %336, %340 : vector<8x32xf32>
    %c52 = arith.constant 52 : index
    %342 = memref.load %arg1[%c52] : memref<66xf32, #tpu.memory_space<smem>>
    %343 = vector.broadcast %342 : f32 to vector<8x32xf32>
    %344 = arith.mulf %125, %343 : vector<8x32xf32>
    %345 = arith.mulf %344, %269 : vector<8x32xf32>
    %c60 = arith.constant 60 : index
    %346 = memref.load %arg1[%c60] : memref<66xf32, #tpu.memory_space<smem>>
    %347 = vector.broadcast %346 : f32 to vector<8x32xf32>
    %348 = arith.mulf %137, %347 : vector<8x32xf32>
    %349 = arith.mulf %348, %278 : vector<8x32xf32>
    %350 = arith.subf %345, %349 : vector<8x32xf32>
    %c53 = arith.constant 53 : index
    %351 = memref.load %arg1[%c53] : memref<66xf32, #tpu.memory_space<smem>>
    %352 = vector.broadcast %351 : f32 to vector<8x32xf32>
    %353 = arith.mulf %128, %352 : vector<8x32xf32>
    %354 = arith.mulf %353, %278 : vector<8x32xf32>
    %c61 = arith.constant 61 : index
    %355 = memref.load %arg1[%c61] : memref<66xf32, #tpu.memory_space<smem>>
    %356 = vector.broadcast %355 : f32 to vector<8x32xf32>
    %357 = arith.mulf %140, %356 : vector<8x32xf32>
    %358 = arith.mulf %357, %287 : vector<8x32xf32>
    %359 = arith.subf %354, %358 : vector<8x32xf32>
    %c54 = arith.constant 54 : index
    %360 = memref.load %arg1[%c54] : memref<66xf32, #tpu.memory_space<smem>>
    %361 = vector.broadcast %360 : f32 to vector<8x32xf32>
    %362 = arith.mulf %131, %361 : vector<8x32xf32>
    %363 = arith.mulf %362, %287 : vector<8x32xf32>
    %c62 = arith.constant 62 : index
    %364 = memref.load %arg1[%c62] : memref<66xf32, #tpu.memory_space<smem>>
    %365 = vector.broadcast %364 : f32 to vector<8x32xf32>
    %366 = arith.mulf %143, %365 : vector<8x32xf32>
    %367 = arith.mulf %366, %296 : vector<8x32xf32>
    %368 = arith.subf %363, %367 : vector<8x32xf32>
    %c55 = arith.constant 55 : index
    %369 = memref.load %arg1[%c55] : memref<66xf32, #tpu.memory_space<smem>>
    %370 = vector.broadcast %369 : f32 to vector<8x32xf32>
    %371 = arith.mulf %134, %370 : vector<8x32xf32>
    %372 = arith.mulf %371, %296 : vector<8x32xf32>
    %c63 = arith.constant 63 : index
    %373 = memref.load %arg1[%c63] : memref<66xf32, #tpu.memory_space<smem>>
    %374 = vector.broadcast %373 : f32 to vector<8x32xf32>
    %375 = arith.mulf %146, %374 : vector<8x32xf32>
    %376 = arith.mulf %375, %305 : vector<8x32xf32>
    %377 = arith.subf %372, %376 : vector<8x32xf32>
    %c56 = arith.constant 56 : index
    %378 = memref.load %arg1[%c56] : memref<66xf32, #tpu.memory_space<smem>>
    %379 = vector.broadcast %378 : f32 to vector<8x32xf32>
    %380 = arith.mulf %137, %379 : vector<8x32xf32>
    %381 = arith.mulf %380, %305 : vector<8x32xf32>
    %c64 = arith.constant 64 : index
    %382 = memref.load %arg1[%c64] : memref<66xf32, #tpu.memory_space<smem>>
    %383 = vector.broadcast %382 : f32 to vector<8x32xf32>
    %384 = arith.mulf %149, %383 : vector<8x32xf32>
    %385 = arith.mulf %384, %314 : vector<8x32xf32>
    %386 = arith.subf %381, %385 : vector<8x32xf32>
    %c57 = arith.constant 57 : index
    %387 = memref.load %arg1[%c57] : memref<66xf32, #tpu.memory_space<smem>>
    %388 = vector.broadcast %387 : f32 to vector<8x32xf32>
    %389 = arith.mulf %140, %388 : vector<8x32xf32>
    %390 = arith.mulf %389, %314 : vector<8x32xf32>
    %c65 = arith.constant 65 : index
    %391 = memref.load %arg1[%c65] : memref<66xf32, #tpu.memory_space<smem>>
    %392 = vector.broadcast %391 : f32 to vector<8x32xf32>
    %393 = arith.mulf %152, %392 : vector<8x32xf32>
    %394 = arith.mulf %393, %323 : vector<8x32xf32>
    %395 = arith.subf %390, %394 : vector<8x32xf32>
    %c0_39 = arith.constant 0 : index
    %c128 = arith.constant 128 : index
    %396 = vector.load %arg9[%c0_39, %c128] : memref<8x1152xf32, #tpu.memory_space<vmem>>, vector<8x32xf32>
    tpu.vector_store %arg9[%c0_39, %c128], %332 {strides = array<i32>} : memref<8x1152xf32, #tpu.memory_space<vmem>>, vector<8x32xf32>,
    %c0_40 = arith.constant 0 : index
    %c256 = arith.constant 256 : index
    %397 = vector.load %arg9[%c0_40, %c256] : memref<8x1152xf32, #tpu.memory_space<vmem>>, vector<8x32xf32>
    tpu.vector_store %arg9[%c0_40, %c256], %341 {strides = array<i32>} : memref<8x1152xf32, #tpu.memory_space<vmem>>, vector<8x32xf32>,
    %c0_41 = arith.constant 0 : index
    %c384 = arith.constant 384 : index
    %398 = vector.load %arg9[%c0_41, %c384] : memref<8x1152xf32, #tpu.memory_space<vmem>>, vector<8x32xf32>
    tpu.vector_store %arg9[%c0_41, %c384], %350 {strides = array<i32>} : memref<8x1152xf32, #tpu.memory_space<vmem>>, vector<8x32xf32>,
    %c0_42 = arith.constant 0 : index
    %c512 = arith.constant 512 : index
    %399 = vector.load %arg9[%c0_42, %c512] : memref<8x1152xf32, #tpu.memory_space<vmem>>, vector<8x32xf32>
    tpu.vector_store %arg9[%c0_42, %c512], %359 {strides = array<i32>} : memref<8x1152xf32, #tpu.memory_space<vmem>>, vector<8x32xf32>,
    %c0_43 = arith.constant 0 : index
    %c640 = arith.constant 640 : index
    %400 = vector.load %arg9[%c0_43, %c640] : memref<8x1152xf32, #tpu.memory_space<vmem>>, vector<8x32xf32>
    tpu.vector_store %arg9[%c0_43, %c640], %368 {strides = array<i32>} : memref<8x1152xf32, #tpu.memory_space<vmem>>, vector<8x32xf32>,
    %c0_44 = arith.constant 0 : index
    %c768 = arith.constant 768 : index
    %401 = vector.load %arg9[%c0_44, %c768] : memref<8x1152xf32, #tpu.memory_space<vmem>>, vector<8x32xf32>
    tpu.vector_store %arg9[%c0_44, %c768], %377 {strides = array<i32>} : memref<8x1152xf32, #tpu.memory_space<vmem>>, vector<8x32xf32>,
    %c0_45 = arith.constant 0 : index
    %c896 = arith.constant 896 : index
    %402 = vector.load %arg9[%c0_45, %c896] : memref<8x1152xf32, #tpu.memory_space<vmem>>, vector<8x32xf32>
    tpu.vector_store %arg9[%c0_45, %c896], %386 {strides = array<i32>} : memref<8x1152xf32, #tpu.memory_space<vmem>>, vector<8x32xf32>,
    %c0_46 = arith.constant 0 : index
    %c1024 = arith.constant 1024 : index
    %403 = vector.load %arg9[%c0_46, %c1024] : memref<8x1152xf32, #tpu.memory_space<vmem>>, vector<8x32xf32>
    tpu.vector_store %arg9[%c0_46, %c1024], %395 {strides = array<i32>} : memref<8x1152xf32, #tpu.memory_space<vmem>>, vector<8x32xf32>,
    %c0_47 = arith.constant 0 : index
    %c0_48 = arith.constant 0 : index
    %404 = vector.load %arg9[%c0_47, %c0_48] : memref<8x1152xf32, #tpu.memory_space<vmem>>, vector<8x1152xf32>
    %405 = arith.truncf %404 : vector<8x1152xf32> to vector<8x1152xbf16>
    %c0_49 = arith.constant 0 : index
    %c0_50 = arith.constant 0 : index
    %406 = vector.load %arg6[%c0_49, %c0_50] : memref<1152x128xbf16, #tpu.memory_space<vmem>>, vector<1152x128xbf16>
    %cst_51 = arith.constant dense<0.000000e+00> : vector<8x128xf32>
    %407 = tpu.matmul %405, %406, %cst_51 {dimension_numbers = #tpu.dot_dimension_numbers<[1], [0], [0], [1], [0, 0, 1, 1], [], []>} : vector<8x1152xbf16>, vector<1152x128xbf16>, vector<8x128xf32> -> vector<8x128xf32>
    %c0_52 = arith.constant 0 : index
    %c0_53 = arith.constant 0 : index
    %408 = vector.load %arg7[%c0_52, %c0_53] : memref<8x128xf32, #tpu.memory_space<vmem>>, vector<8x128xf32>
    tpu.vector_store %arg7[%c0_52, %c0_53], %407 {strides = array<i32>} : memref<8x128xf32, #tpu.memory_space<vmem>>, vector<8x128xf32>,
    return
  }
  func.func @transform_0(%arg0: i32) -> i32 {
    %c0_i32 = arith.constant 0 : i32
    %c0_i32_0 = arith.constant 0 : i32
    return %c0_i32 : i32
  }
  func.func @transform_1(%arg0: i32) -> (i32, i32, i32) {
    %c0_i32 = arith.constant 0 : i32
    %c0_i32_0 = arith.constant 0 : i32
    %c0_i32_1 = arith.constant 0 : i32
    return %arg0, %c0_i32, %c0_i32_0 : i32, i32, i32
  }
  func.func @transform_2(%arg0: i32) -> (i32, i32) {
    %c0_i32 = arith.constant 0 : i32
    %c0_i32_0 = arith.constant 0 : i32
    %c0_i32_1 = arith.constant 0 : i32
    return %c0_i32, %c0_i32_0 : i32, i32
  }
  func.func @transform_3(%arg0: i32) -> (i32, i32) {
    %c0_i32 = arith.constant 0 : i32
    %c0_i32_0 = arith.constant 0 : i32
    %c0_i32_1 = arith.constant 0 : i32
    return %c0_i32, %c0_i32_0 : i32, i32
  }
  func.func @transform_4(%arg0: i32) -> (i32, i32) {
    %c0_i32 = arith.constant 0 : i32
    %c0_i32_0 = arith.constant 0 : i32
    %c0_i32_1 = arith.constant 0 : i32
    return %c0_i32, %c0_i32_0 : i32, i32
  }
  func.func @transform_5(%arg0: i32) -> (i32, i32) {
    %c0_i32 = arith.constant 0 : i32
    %c0_i32_0 = arith.constant 0 : i32
    %c0_i32_1 = arith.constant 0 : i32
    return %c0_i32, %c0_i32_0 : i32, i32
  }
  func.func @transform_6(%arg0: i32) -> (i32, i32) {
    %c0_i32 = arith.constant 0 : i32
    %c0_i32_0 = arith.constant 0 : i32
    return %arg0, %c0_i32 : i32, i32
  }
}

module attributes {stable_mosaic.version = 11 : i64} {
  func.func @output_kan_kernel(%arg0: i32, %arg1: memref<66xf32, #tpu.memory_space<smem>>, %arg2: memref<8x8x32xbf16, #tpu.memory_space<vmem>>, %arg3: memref<8x32xf32, #tpu.memory_space<vmem>>, %arg4: memref<1x32xf32, #tpu.memory_space<vmem>>, %arg5: memref<1x32xf32, #tpu.memory_space<vmem>>, %arg6: memref<1152x128xbf16, #tpu.memory_space<vmem>>, %arg7: memref<8x128xf32, #tpu.memory_space<vmem>>, %arg8: memref<8x32xf32, #tpu.memory_space<vmem>>, %arg9: memref<8x1152xf32, #tpu.memory_space<vmem>>) attributes {dimension_semantics = [#tpu.dimension_semantics<parallel>], iteration_bounds = array<i64: 2>, scalar_prefetch = 0 : i64, scratch_operands = 2 : i64, tpu.core_type = #tpu.core_type<tc>, window_params = [{transform_indices = @transform_0, window_bounds = array<i64: 66>}, {transform_indices = @transform_1, window_bounds = array<i64: 8, 8, 32>}, {pipeline_mode = #tpu.pipeline_mode<synchronous>, transform_indices = @transform_2, window_bounds = array<i64: 8, 32>}, {pipeline_mode = #tpu.pipeline_mode<synchronous>, transform_indices = @transform_3, window_bounds = array<i64: 1, 32>}, {pipeline_mode = #tpu.pipeline_mode<synchronous>, transform_indices = @transform_4, window_bounds = array<i64: 1, 32>}, {pipeline_mode = #tpu.pipeline_mode<synchronous>, transform_indices = @transform_5, window_bounds = array<i64: 1152, 128>}, {transform_indices = @transform_6, window_bounds = array<i64: 8, 128>}]} {
    %c0 = arith.constant 0 : index
    %c0_0 = arith.constant 0 : index
    %c0_1 = arith.constant 0 : index
    %0 = vector.load %arg2[%c0, %c0_0, %c0_1] : memref<8x8x32xbf16, #tpu.memory_space<vmem>>, vector<8x8x32xbf16>
    %1 = arith.extf %0 : vector<8x8x32xbf16> to vector<8x8x32xf32>
    %c0_2 = arith.constant 0 : index
    %c0_3 = arith.constant 0 : index
    %2 = vector.load %arg3[%c0_2, %c0_3] : memref<8x32xf32, #tpu.memory_space<vmem>>, vector<8x32xf32>
    %cst = arith.constant dense<0.000000e+00> : vector<8x32xf32>
    %3 = vector.multi_reduction <add>, %1, %cst [1] : vector<8x8x32xf32> to vector<8x32xf32>
    %4 = arith.mulf %1, %1 : vector<8x8x32xf32>
    %cst_4 = arith.constant dense<0.000000e+00> : vector<8x32xf32>
    %5 = vector.multi_reduction <add>, %4, %cst_4 [1] : vector<8x8x32xf32> to vector<8x32xf32>
    %cst_5 = arith.constant dense<0.000000e+00> : vector<8xf32>
    %6 = vector.multi_reduction <add>, %3, %cst_5 [1] : vector<8x32xf32> to vector<8xf32>
    %7 = vector.shape_cast %6 : vector<8xf32> to vector<8x1xf32>
    %cst_6 = arith.constant dense<0.000000e+00> : vector<8xf32>
    %8 = vector.multi_reduction <add>, %5, %cst_6 [1] : vector<8x32xf32> to vector<8xf32>
    %9 = vector.shape_cast %8 : vector<8xf32> to vector<8x1xf32>
    %cst_7 = arith.constant 3.906250e-03 : f32
    %10 = vector.broadcast %cst_7 : f32 to vector<8x1xf32>
    %11 = arith.mulf %7, %10 : vector<8x1xf32>
    %cst_8 = arith.constant 3.906250e-03 : f32
    %12 = vector.broadcast %cst_8 : f32 to vector<8x1xf32>
    %13 = arith.mulf %9, %12 : vector<8x1xf32>
    %14 = arith.mulf %11, %11 : vector<8x1xf32>
    %15 = arith.subf %13, %14 : vector<8x1xf32>
    %cst_9 = arith.constant 9.99999974E-6 : f32
    %16 = vector.broadcast %cst_9 : f32 to vector<8x1xf32>
    %17 = arith.addf %15, %16 : vector<8x1xf32>
    %18 = math.rsqrt %17 : vector<8x1xf32>
    %19 = vector.shape_cast %2 : vector<8x32xf32> to vector<1x8x32xf32>
    %20 = vector.broadcast %19 : vector<1x8x32xf32> to vector<8x8x32xf32>
    %21 = arith.mulf %1, %20 : vector<8x8x32xf32>
    %cst_10 = arith.constant dense<0.000000e+00> : vector<8x32xf32>
    %22 = vector.multi_reduction <add>, %21, %cst_10 [1] : vector<8x8x32xf32> to vector<8x32xf32>
    %cst_11 = arith.constant 1.250000e-01 : f32
    %23 = vector.broadcast %cst_11 : f32 to vector<8x32xf32>
    %24 = arith.mulf %22, %23 : vector<8x32xf32>
    %c0_12 = arith.constant 0 : index
    %c0_13 = arith.constant 0 : index
    %25 = vector.load %arg4[%c0_12, %c0_13] : memref<1x32xf32, #tpu.memory_space<vmem>>, vector<1x32xf32>
    %26 = vector.broadcast %11 : vector<8x1xf32> to vector<8x32xf32>
    %27 = vector.broadcast %25 : vector<1x32xf32> to vector<8x32xf32>
    %28 = arith.mulf %26, %27 : vector<8x32xf32>
    %29 = arith.subf %24, %28 : vector<8x32xf32>
    %30 = vector.broadcast %18 : vector<8x1xf32> to vector<8x32xf32>
    %31 = arith.mulf %30, %29 : vector<8x32xf32>
    %c0_14 = arith.constant 0 : index
    %c0_15 = arith.constant 0 : index
    %32 = vector.load %arg5[%c0_14, %c0_15] : memref<1x32xf32, #tpu.memory_space<vmem>>, vector<1x32xf32>
    %33 = vector.broadcast %32 : vector<1x32xf32> to vector<8x32xf32>
    %34 = arith.addf %31, %33 : vector<8x32xf32>
    %c0_16 = arith.constant 0 : index
    %c0_17 = arith.constant 0 : index
    %35 = vector.load %arg8[%c0_16, %c0_17] : memref<8x32xf32, #tpu.memory_space<vmem>>, vector<8x32xf32>
    tpu.vector_store %arg8[%c0_16, %c0_17], %34 {strides = array<i32>} : memref<8x32xf32, #tpu.memory_space<vmem>>, vector<8x32xf32>,
    %cst_18 = arith.constant 0.000000e+00 : f32
    %36 = vector.broadcast %cst_18 : f32 to vector<8x1152xf32>
    %c0_19 = arith.constant 0 : index
    %c0_20 = arith.constant 0 : index
    %37 = vector.load %arg9[%c0_19, %c0_20] : memref<8x1152xf32, #tpu.memory_space<vmem>>, vector<8x1152xf32>
    tpu.vector_store %arg9[%c0_19, %c0_20], %36 {strides = array<i32>} : memref<8x1152xf32, #tpu.memory_space<vmem>>, vector<8x1152xf32>,
    %c0_21 = arith.constant 0 : index
    %c0_22 = arith.constant 0 : index
    %38 = vector.load %arg8[%c0_21, %c0_22] : memref<8x32xf32, #tpu.memory_space<vmem>>, vector<8x32xf32>
    %39 = arith.negf %38 : vector<8x32xf32>
    %40 = math.exp %39 : vector<8x32xf32>
    %cst_23 = arith.constant 1.000000e+00 : f32
    %41 = vector.broadcast %cst_23 : f32 to vector<8x32xf32>
    %42 = arith.addf %41, %40 : vector<8x32xf32>
    %43 = arith.divf %41, %42 : vector<8x32xf32>
    %44 = arith.mulf %38, %43 : vector<8x32xf32>
    %c0_24 = arith.constant 0 : index
    %c0_25 = arith.constant 0 : index
    %45 = vector.load %arg9[%c0_24, %c0_25] : memref<8x1152xf32, #tpu.memory_space<vmem>>, vector<8x32xf32>
    tpu.vector_store %arg9[%c0_24, %c0_25], %44 {strides = array<i32>} : memref<8x1152xf32, #tpu.memory_space<vmem>>, vector<8x32xf32>,
    %c0_26 = arith.constant 0 : index
    %46 = memref.load %arg1[%c0_26] : memref<66xf32, #tpu.memory_space<smem>>
    %47 = vector.broadcast %46 : f32 to vector<8x32xf32>
    %48 = arith.cmpf oge, %38, %47 : vector<8x32xf32>
    %49 = arith.extui %48 : vector<8x32xi1> to vector<8x32xi32>
    %50 = arith.sitofp %49 : vector<8x32xi32> to vector<8x32xf32>
    %c1 = arith.constant 1 : index
    %51 = memref.load %arg1[%c1] : memref<66xf32, #tpu.memory_space<smem>>
    %52 = vector.broadcast %51 : f32 to vector<8x32xf32>
    %53 = arith.cmpf oge, %38, %52 : vector<8x32xf32>
    %54 = arith.extui %53 : vector<8x32xi1> to vector<8x32xi32>
    %55 = arith.sitofp %54 : vector<8x32xi32> to vector<8x32xf32>
    %c2 = arith.constant 2 : index
    %56 = memref.load %arg1[%c2] : memref<66xf32, #tpu.memory_space<smem>>
    %57 = vector.broadcast %56 : f32 to vector<8x32xf32>
    %58 = arith.cmpf oge, %38, %57 : vector<8x32xf32>
    %59 = arith.extui %58 : vector<8x32xi1> to vector<8x32xi32>
    %60 = arith.sitofp %59 : vector<8x32xi32> to vector<8x32xf32>
    %c3 = arith.constant 3 : index
    %61 = memref.load %arg1[%c3] : memref<66xf32, #tpu.memory_space<smem>>
    %62 = vector.broadcast %61 : f32 to vector<8x32xf32>
    %63 = arith.cmpf oge, %38, %62 : vector<8x32xf32>
    %64 = arith.extui %63 : vector<8x32xi1> to vector<8x32xi32>
    %65 = arith.sitofp %64 : vector<8x32xi32> to vector<8x32xf32>
    %c4 = arith.constant 4 : index
    %66 = memref.load %arg1[%c4] : memref<66xf32, #tpu.memory_space<smem>>
    %67 = vector.broadcast %66 : f32 to vector<8x32xf32>
    %68 = arith.cmpf oge, %38, %67 : vector<8x32xf32>
    %69 = arith.extui %68 : vector<8x32xi1> to vector<8x32xi32>
    %70 = arith.sitofp %69 : vector<8x32xi32> to vector<8x32xf32>
    %c5 = arith.constant 5 : index
    %71 = memref.load %arg1[%c5] : memref<66xf32, #tpu.memory_space<smem>>
    %72 = vector.broadcast %71 : f32 to vector<8x32xf32>
    %73 = arith.cmpf oge, %38, %72 : vector<8x32xf32>
    %74 = arith.extui %73 : vector<8x32xi1> to vector<8x32xi32>
    %75 = arith.sitofp %74 : vector<8x32xi32> to vector<8x32xf32>
    %c6 = arith.constant 6 : index
    %76 = memref.load %arg1[%c6] : memref<66xf32, #tpu.memory_space<smem>>
    %77 = vector.broadcast %76 : f32 to vector<8x32xf32>
    %78 = arith.cmpf oge, %38, %77 : vector<8x32xf32>
    %79 = arith.extui %78 : vector<8x32xi1> to vector<8x32xi32>
    %80 = arith.sitofp %79 : vector<8x32xi32> to vector<8x32xf32>
    %c7 = arith.constant 7 : index
    %81 = memref.load %arg1[%c7] : memref<66xf32, #tpu.memory_space<smem>>
    %82 = vector.broadcast %81 : f32 to vector<8x32xf32>
    %83 = arith.cmpf oge, %38, %82 : vector<8x32xf32>
    %84 = arith.extui %83 : vector<8x32xi1> to vector<8x32xi32>
    %85 = arith.sitofp %84 : vector<8x32xi32> to vector<8x32xf32>
    %c8 = arith.constant 8 : index
    %86 = memref.load %arg1[%c8] : memref<66xf32, #tpu.memory_space<smem>>
    %87 = vector.broadcast %86 : f32 to vector<8x32xf32>
    %88 = arith.cmpf oge, %38, %87 : vector<8x32xf32>
    %89 = arith.extui %88 : vector<8x32xi1> to vector<8x32xi32>
    %90 = arith.sitofp %89 : vector<8x32xi32> to vector<8x32xf32>
    %c9 = arith.constant 9 : index
    %91 = memref.load %arg1[%c9] : memref<66xf32, #tpu.memory_space<smem>>
    %92 = vector.broadcast %91 : f32 to vector<8x32xf32>
    %93 = arith.cmpf oge, %38, %92 : vector<8x32xf32>
    %94 = arith.extui %93 : vector<8x32xi1> to vector<8x32xi32>
    %95 = arith.sitofp %94 : vector<8x32xi32> to vector<8x32xf32>
    %c10 = arith.constant 10 : index
    %96 = memref.load %arg1[%c10] : memref<66xf32, #tpu.memory_space<smem>>
    %97 = vector.broadcast %96 : f32 to vector<8x32xf32>
    %98 = arith.cmpf oge, %38, %97 : vector<8x32xf32>
    %99 = arith.extui %98 : vector<8x32xi1> to vector<8x32xi32>
    %100 = arith.sitofp %99 : vector<8x32xi32> to vector<8x32xf32>
    %c11 = arith.constant 11 : index
    %101 = memref.load %arg1[%c11] : memref<66xf32, #tpu.memory_space<smem>>
    %102 = vector.broadcast %101 : f32 to vector<8x32xf32>
    %103 = arith.cmpf oge, %38, %102 : vector<8x32xf32>
    %104 = arith.extui %103 : vector<8x32xi1> to vector<8x32xi32>
    %105 = arith.sitofp %104 : vector<8x32xi32> to vector<8x32xf32>
    %106 = arith.subf %50, %55 : vector<8x32xf32>
    %107 = arith.subf %55, %60 : vector<8x32xf32>
    %108 = arith.subf %60, %65 : vector<8x32xf32>
    %109 = arith.subf %65, %70 : vector<8x32xf32>
    %110 = arith.subf %70, %75 : vector<8x32xf32>
    %111 = arith.subf %75, %80 : vector<8x32xf32>
    %112 = arith.subf %80, %85 : vector<8x32xf32>
    %113 = arith.subf %85, %90 : vector<8x32xf32>
    %114 = arith.subf %90, %95 : vector<8x32xf32>
    %115 = arith.subf %95, %100 : vector<8x32xf32>
    %116 = arith.subf %100, %105 : vector<8x32xf32>
    %c0_27 = arith.constant 0 : index
    %117 = memref.load %arg1[%c0_27] : memref<66xf32, #tpu.memory_space<smem>>
    %118 = vector.broadcast %117 : f32 to vector<8x32xf32>
    %119 = arith.subf %38, %118 : vector<8x32xf32>
    %c1_28 = arith.constant 1 : index
    %120 = memref.load %arg1[%c1_28] : memref<66xf32, #tpu.memory_space<smem>>
    %121 = vector.broadcast %120 : f32 to vector<8x32xf32>
    %122 = arith.subf %38, %121 : vector<8x32xf32>
    %c2_29 = arith.constant 2 : index
    %123 = memref.load %arg1[%c2_29] : memref<66xf32, #tpu.memory_space<smem>>
    %124 = vector.broadcast %123 : f32 to vector<8x32xf32>
    %125 = arith.subf %38, %124 : vector<8x32xf32>
    %c3_30 = arith.constant 3 : index
    %126 = memref.load %arg1[%c3_30] : memref<66xf32, #tpu.memory_space<smem>>
    %127 = vector.broadcast %126 : f32 to vector<8x32xf32>
    %128 = arith.subf %38, %127 : vector<8x32xf32>
    %c4_31 = arith.constant 4 : index
    %129 = memref.load %arg1[%c4_31] : memref<66xf32, #tpu.memory_space<smem>>
    %130 = vector.broadcast %129 : f32 to vector<8x32xf32>
    %131 = arith.subf %38, %130 : vector<8x32xf32>
    %c5_32 = arith.constant 5 : index
    %132 = memref.load %arg1[%c5_32] : memref<66xf32, #tpu.memory_space<smem>>
    %133 = vector.broadcast %132 : f32 to vector<8x32xf32>
    %134 = arith.subf %38, %133 : vector<8x32xf32>
    %c6_33 = arith.constant 6 : index
    %135 = memref.load %arg1[%c6_33] : memref<66xf32, #tpu.memory_space<smem>>
    %136 = vector.broadcast %135 : f32 to vector<8x32xf32>
    %137 = arith.subf %38, %136 : vector<8x32xf32>
    %c7_34 = arith.constant 7 : index
    %138 = memref.load %arg1[%c7_34] : memref<66xf32, #tpu.memory_space<smem>>
    %139 = vector.broadcast %138 : f32 to vector<8x32xf32>
    %140 = arith.subf %38, %139 : vector<8x32xf32>
    %c8_35 = arith.constant 8 : index
    %141 = memref.load %arg1[%c8_35] : memref<66xf32, #tpu.memory_space<smem>>
    %142 = vector.broadcast %141 : f32 to vector<8x32xf32>
    %143 = arith.subf %38, %142 : vector<8x32xf32>
    %c9_36 = arith.constant 9 : index
    %144 = memref.load %arg1[%c9_36] : memref<66xf32, #tpu.memory_space<smem>>
    %145 = vector.broadcast %144 : f32 to vector<8x32xf32>
    %146 = arith.subf %38, %145 : vector<8x32xf32>
    %c10_37 = arith.constant 10 : index
    %147 = memref.load %arg1[%c10_37] : memref<66xf32, #tpu.memory_space<smem>>
    %148 = vector.broadcast %147 : f32 to vector<8x32xf32>
    %149 = arith.subf %38, %148 : vector<8x32xf32>
    %c11_38 = arith.constant 11 : index
    %150 = memref.load %arg1[%c11_38] : memref<66xf32, #tpu.memory_space<smem>>
    %151 = vector.broadcast %150 : f32 to vector<8x32xf32>
    %152 = arith.subf %38, %151 : vector<8x32xf32>
    %c12 = arith.constant 12 : index
    %153 = memref.load %arg1[%c12] : memref<66xf32, #tpu.memory_space<smem>>
    %154 = vector.broadcast %153 : f32 to vector<8x32xf32>
    %155 = arith.mulf %119, %154 : vector<8x32xf32>
    %156 = arith.mulf %155, %106 : vector<8x32xf32>
    %c22 = arith.constant 22 : index
    %157 = memref.load %arg1[%c22] : memref<66xf32, #tpu.memory_space<smem>>
    %158 = vector.broadcast %157 : f32 to vector<8x32xf32>
    %159 = arith.mulf %125, %158 : vector<8x32xf32>
    %160 = arith.mulf %159, %107 : vector<8x32xf32>
    %161 = arith.subf %156, %160 : vector<8x32xf32>
    %c13 = arith.constant 13 : index
    %162 = memref.load %arg1[%c13] : memref<66xf32, #tpu.memory_space<smem>>
    %163 = vector.broadcast %162 : f32 to vector<8x32xf32>
    %164 = arith.mulf %122, %163 : vector<8x32xf32>
    %165 = arith.mulf %164, %107 : vector<8x32xf32>
    %c23 = arith.constant 23 : index
    %166 = memref.load %arg1[%c23] : memref<66xf32, #tpu.memory_space<smem>>
    %167 = vector.broadcast %166 : f32 to vector<8x32xf32>
    %168 = arith.mulf %128, %167 : vector<8x32xf32>
    %169 = arith.mulf %168, %108 : vector<8x32xf32>
    %170 = arith.subf %165, %169 : vector<8x32xf32>
    %c14 = arith.constant 14 : index
    %171 = memref.load %arg1[%c14] : memref<66xf32, #tpu.memory_space<smem>>
    %172 = vector.broadcast %171 : f32 to vector<8x32xf32>
    %173 = arith.mulf %125, %172 : vector<8x32xf32>
    %174 = arith.mulf %173, %108 : vector<8x32xf32>
    %c24 = arith.constant 24 : index
    %175 = memref.load %arg1[%c24] : memref<66xf32, #tpu.memory_space<smem>>
    %176 = vector.broadcast %175 : f32 to vector<8x32xf32>
    %177 = arith.mulf %131, %176 : vector<8x32xf32>
    %178 = arith.mulf %177, %109 : vector<8x32xf32>
    %179 = arith.subf %174, %178 : vector<8x32xf32>
    %c15 = arith.constant 15 : index
    %180 = memref.load %arg1[%c15] : memref<66xf32, #tpu.memory_space<smem>>
    %181 = vector.broadcast %180 : f32 to vector<8x32xf32>
    %182 = arith.mulf %128, %181 : vector<8x32xf32>
    %183 = arith.mulf %182, %109 : vector<8x32xf32>
    %c25 = arith.constant 25 : index
    %184 = memref.load %arg1[%c25] : memref<66xf32, #tpu.memory_space<smem>>
    %185 = vector.broadcast %184 : f32 to vector<8x32xf32>
    %186 = arith.mulf %134, %185 : vector<8x32xf32>
    %187 = arith.mulf %186, %110 : vector<8x32xf32>
    %188 = arith.subf %183, %187 : vector<8x32xf32>
    %c16 = arith.constant 16 : index
    %189 = memref.load %arg1[%c16] : memref<66xf32, #tpu.memory_space<smem>>
    %190 = vector.broadcast %189 : f32 to vector<8x32xf32>
    %191 = arith.mulf %131, %190 : vector<8x32xf32>
    %192 = arith.mulf %191, %110 : vector<8x32xf32>
    %c26 = arith.constant 26 : index
    %193 = memref.load %arg1[%c26] : memref<66xf32, #tpu.memory_space<smem>>
    %194 = vector.broadcast %193 : f32 to vector<8x32xf32>
    %195 = arith.mulf %137, %194 : vector<8x32xf32>
    %196 = arith.mulf %195, %111 : vector<8x32xf32>
    %197 = arith.subf %192, %196 : vector<8x32xf32>
    %c17 = arith.constant 17 : index
    %198 = memref.load %arg1[%c17] : memref<66xf32, #tpu.memory_space<smem>>
    %199 = vector.broadcast %198 : f32 to vector<8x32xf32>
    %200 = arith.mulf %134, %199 : vector<8x32xf32>
    %201 = arith.mulf %200, %111 : vector<8x32xf32>
    %c27 = arith.constant 27 : index
    %202 = memref.load %arg1[%c27] : memref<66xf32, #tpu.memory_space<smem>>
    %203 = vector.broadcast %202 : f32 to vector<8x32xf32>
    %204 = arith.mulf %140, %203 : vector<8x32xf32>
    %205 = arith.mulf %204, %112 : vector<8x32xf32>
    %206 = arith.subf %201, %205 : vector<8x32xf32>
    %c18 = arith.constant 18 : index
    %207 = memref.load %arg1[%c18] : memref<66xf32, #tpu.memory_space<smem>>
    %208 = vector.broadcast %207 : f32 to vector<8x32xf32>
    %209 = arith.mulf %137, %208 : vector<8x32xf32>
    %210 = arith.mulf %209, %112 : vector<8x32xf32>
    %c28 = arith.constant 28 : index
    %211 = memref.load %arg1[%c28] : memref<66xf32, #tpu.memory_space<smem>>
    %212 = vector.broadcast %211 : f32 to vector<8x32xf32>
    %213 = arith.mulf %143, %212 : vector<8x32xf32>
    %214 = arith.mulf %213, %113 : vector<8x32xf32>
    %215 = arith.subf %210, %214 : vector<8x32xf32>
    %c19 = arith.constant 19 : index
    %216 = memref.load %arg1[%c19] : memref<66xf32, #tpu.memory_space<smem>>
    %217 = vector.broadcast %216 : f32 to vector<8x32xf32>
    %218 = arith.mulf %140, %217 : vector<8x32xf32>
    %219 = arith.mulf %218, %113 : vector<8x32xf32>
    %c29 = arith.constant 29 : index
    %220 = memref.load %arg1[%c29] : memref<66xf32, #tpu.memory_space<smem>>
    %221 = vector.broadcast %220 : f32 to vector<8x32xf32>
    %222 = arith.mulf %146, %221 : vector<8x32xf32>
    %223 = arith.mulf %222, %114 : vector<8x32xf32>
    %224 = arith.subf %219, %223 : vector<8x32xf32>
    %c20 = arith.constant 20 : index
    %225 = memref.load %arg1[%c20] : memref<66xf32, #tpu.memory_space<smem>>
    %226 = vector.broadcast %225 : f32 to vector<8x32xf32>
    %227 = arith.mulf %143, %226 : vector<8x32xf32>
    %228 = arith.mulf %227, %114 : vector<8x32xf32>
    %c30 = arith.constant 30 : index
    %229 = memref.load %arg1[%c30] : memref<66xf32, #tpu.memory_space<smem>>
    %230 = vector.broadcast %229 : f32 to vector<8x32xf32>
    %231 = arith.mulf %149, %230 : vector<8x32xf32>
    %232 = arith.mulf %231, %115 : vector<8x32xf32>
    %233 = arith.subf %228, %232 : vector<8x32xf32>
    %c21 = arith.constant 21 : index
    %234 = memref.load %arg1[%c21] : memref<66xf32, #tpu.memory_space<smem>>
    %235 = vector.broadcast %234 : f32 to vector<8x32xf32>
    %236 = arith.mulf %146, %235 : vector<8x32xf32>
    %237 = arith.mulf %236, %115 : vector<8x32xf32>
    %c31 = arith.constant 31 : index
    %238 = memref.load %arg1[%c31] : memref<66xf32, #tpu.memory_space<smem>>
    %239 = vector.broadcast %238 : f32 to vector<8x32xf32>
    %240 = arith.mulf %152, %239 : vector<8x32xf32>
    %241 = arith.mulf %240, %116 : vector<8x32xf32>
    %242 = arith.subf %237, %241 : vector<8x32xf32>
    %c32 = arith.constant 32 : index
    %243 = memref.load %arg1[%c32] : memref<66xf32, #tpu.memory_space<smem>>
    %244 = vector.broadcast %243 : f32 to vector<8x32xf32>
    %245 = arith.mulf %119, %244 : vector<8x32xf32>
    %246 = arith.mulf %245, %161 : vector<8x32xf32>
    %c41 = arith.constant 41 : index
    %247 = memref.load %arg1[%c41] : memref<66xf32, #tpu.memory_space<smem>>
    %248 = vector.broadcast %247 : f32 to vector<8x32xf32>
    %249 = arith.mulf %128, %248 : vector<8x32xf32>
    %250 = arith.mulf %249, %170 : vector<8x32xf32>
    %251 = arith.subf %246, %250 : vector<8x32xf32>
    %c33 = arith.constant 33 : index
    %252 = memref.load %arg1[%c33] : memref<66xf32, #tpu.memory_space<smem>>
    %253 = vector.broadcast %252 : f32 to vector<8x32xf32>
    %254 = arith.mulf %122, %253 : vector<8x32xf32>
    %255 = arith.mulf %254, %170 : vector<8x32xf32>
    %c42 = arith.constant 42 : index
    %256 = memref.load %arg1[%c42] : memref<66xf32, #tpu.memory_space<smem>>
    %257 = vector.broadcast %256 : f32 to vector<8x32xf32>
    %258 = arith.mulf %131, %257 : vector<8x32xf32>
    %259 = arith.mulf %258, %179 : vector<8x32xf32>
    %260 = arith.subf %255, %259 : vector<8x32xf32>
    %c34 = arith.constant 34 : index
    %261 = memref.load %arg1[%c34] : memref<66xf32, #tpu.memory_space<smem>>
    %262 = vector.broadcast %261 : f32 to vector<8x32xf32>
    %263 = arith.mulf %125, %262 : vector<8x32xf32>
    %264 = arith.mulf %263, %179 : vector<8x32xf32>
    %c43 = arith.constant 43 : index
    %265 = memref.load %arg1[%c43] : memref<66xf32, #tpu.memory_space<smem>>
    %266 = vector.broadcast %265 : f32 to vector<8x32xf32>
    %267 = arith.mulf %134, %266 : vector<8x32xf32>
    %268 = arith.mulf %267, %188 : vector<8x32xf32>
    %269 = arith.subf %264, %268 : vector<8x32xf32>
    %c35 = arith.constant 35 : index
    %270 = memref.load %arg1[%c35] : memref<66xf32, #tpu.memory_space<smem>>
    %271 = vector.broadcast %270 : f32 to vector<8x32xf32>
    %272 = arith.mulf %128, %271 : vector<8x32xf32>
    %273 = arith.mulf %272, %188 : vector<8x32xf32>
    %c44 = arith.constant 44 : index
    %274 = memref.load %arg1[%c44] : memref<66xf32, #tpu.memory_space<smem>>
    %275 = vector.broadcast %274 : f32 to vector<8x32xf32>
    %276 = arith.mulf %137, %275 : vector<8x32xf32>
    %277 = arith.mulf %276, %197 : vector<8x32xf32>
    %278 = arith.subf %273, %277 : vector<8x32xf32>
    %c36 = arith.constant 36 : index
    %279 = memref.load %arg1[%c36] : memref<66xf32, #tpu.memory_space<smem>>
    %280 = vector.broadcast %279 : f32 to vector<8x32xf32>
    %281 = arith.mulf %131, %280 : vector<8x32xf32>
    %282 = arith.mulf %281, %197 : vector<8x32xf32>
    %c45 = arith.constant 45 : index
    %283 = memref.load %arg1[%c45] : memref<66xf32, #tpu.memory_space<smem>>
    %284 = vector.broadcast %283 : f32 to vector<8x32xf32>
    %285 = arith.mulf %140, %284 : vector<8x32xf32>
    %286 = arith.mulf %285, %206 : vector<8x32xf32>
    %287 = arith.subf %282, %286 : vector<8x32xf32>
    %c37 = arith.constant 37 : index
    %288 = memref.load %arg1[%c37] : memref<66xf32, #tpu.memory_space<smem>>
    %289 = vector.broadcast %288 : f32 to vector<8x32xf32>
    %290 = arith.mulf %134, %289 : vector<8x32xf32>
    %291 = arith.mulf %290, %206 : vector<8x32xf32>
    %c46 = arith.constant 46 : index
    %292 = memref.load %arg1[%c46] : memref<66xf32, #tpu.memory_space<smem>>
    %293 = vector.broadcast %292 : f32 to vector<8x32xf32>
    %294 = arith.mulf %143, %293 : vector<8x32xf32>
    %295 = arith.mulf %294, %215 : vector<8x32xf32>
    %296 = arith.subf %291, %295 : vector<8x32xf32>
    %c38 = arith.constant 38 : index
    %297 = memref.load %arg1[%c38] : memref<66xf32, #tpu.memory_space<smem>>
    %298 = vector.broadcast %297 : f32 to vector<8x32xf32>
    %299 = arith.mulf %137, %298 : vector<8x32xf32>
    %300 = arith.mulf %299, %215 : vector<8x32xf32>
    %c47 = arith.constant 47 : index
    %301 = memref.load %arg1[%c47] : memref<66xf32, #tpu.memory_space<smem>>
    %302 = vector.broadcast %301 : f32 to vector<8x32xf32>
    %303 = arith.mulf %146, %302 : vector<8x32xf32>
    %304 = arith.mulf %303, %224 : vector<8x32xf32>
    %305 = arith.subf %300, %304 : vector<8x32xf32>
    %c39 = arith.constant 39 : index
    %306 = memref.load %arg1[%c39] : memref<66xf32, #tpu.memory_space<smem>>
    %307 = vector.broadcast %306 : f32 to vector<8x32xf32>
    %308 = arith.mulf %140, %307 : vector<8x32xf32>
    %309 = arith.mulf %308, %224 : vector<8x32xf32>
    %c48 = arith.constant 48 : index
    %310 = memref.load %arg1[%c48] : memref<66xf32, #tpu.memory_space<smem>>
    %311 = vector.broadcast %310 : f32 to vector<8x32xf32>
    %312 = arith.mulf %149, %311 : vector<8x32xf32>
    %313 = arith.mulf %312, %233 : vector<8x32xf32>
    %314 = arith.subf %309, %313 : vector<8x32xf32>
    %c40 = arith.constant 40 : index
    %315 = memref.load %arg1[%c40] : memref<66xf32, #tpu.memory_space<smem>>
    %316 = vector.broadcast %315 : f32 to vector<8x32xf32>
    %317 = arith.mulf %143, %316 : vector<8x32xf32>
    %318 = arith.mulf %317, %233 : vector<8x32xf32>
    %c49 = arith.constant 49 : index
    %319 = memref.load %arg1[%c49] : memref<66xf32, #tpu.memory_space<smem>>
    %320 = vector.broadcast %319 : f32 to vector<8x32xf32>
    %321 = arith.mulf %152, %320 : vector<8x32xf32>
    %322 = arith.mulf %321, %242 : vector<8x32xf32>
    %323 = arith.subf %318, %322 : vector<8x32xf32>
    %c50 = arith.constant 50 : index
    %324 = memref.load %arg1[%c50] : memref<66xf32, #tpu.memory_space<smem>>
    %325 = vector.broadcast %324 : f32 to vector<8x32xf32>
    %326 = arith.mulf %119, %325 : vector<8x32xf32>
    %327 = arith.mulf %326, %251 : vector<8x32xf32>
    %c58 = arith.constant 58 : index
    %328 = memref.load %arg1[%c58] : memref<66xf32, #tpu.memory_space<smem>>
    %329 = vector.broadcast %328 : f32 to vector<8x32xf32>
    %330 = arith.mulf %131, %329 : vector<8x32xf32>
    %331 = arith.mulf %330, %260 : vector<8x32xf32>
    %332 = arith.subf %327, %331 : vector<8x32xf32>
    %c51 = arith.constant 51 : index
    %333 = memref.load %arg1[%c51] : memref<66xf32, #tpu.memory_space<smem>>
    %334 = vector.broadcast %333 : f32 to vector<8x32xf32>
    %335 = arith.mulf %122, %334 : vector<8x32xf32>
    %336 = arith.mulf %335, %260 : vector<8x32xf32>
    %c59 = arith.constant 59 : index
    %337 = memref.load %arg1[%c59] : memref<66xf32, #tpu.memory_space<smem>>
    %338 = vector.broadcast %337 : f32 to vector<8x32xf32>
    %339 = arith.mulf %134, %338 : vector<8x32xf32>
    %340 = arith.mulf %339, %269 : vector<8x32xf32>
    %341 = arith.subf %336, %340 : vector<8x32xf32>
    %c52 = arith.constant 52 : index
    %342 = memref.load %arg1[%c52] : memref<66xf32, #tpu.memory_space<smem>>
    %343 = vector.broadcast %342 : f32 to vector<8x32xf32>
    %344 = arith.mulf %125, %343 : vector<8x32xf32>
    %345 = arith.mulf %344, %269 : vector<8x32xf32>
    %c60 = arith.constant 60 : index
    %346 = memref.load %arg1[%c60] : memref<66xf32, #tpu.memory_space<smem>>
    %347 = vector.broadcast %346 : f32 to vector<8x32xf32>
    %348 = arith.mulf %137, %347 : vector<8x32xf32>
    %349 = arith.mulf %348, %278 : vector<8x32xf32>
    %350 = arith.subf %345, %349 : vector<8x32xf32>
    %c53 = arith.constant 53 : index
    %351 = memref.load %arg1[%c53] : memref<66xf32, #tpu.memory_space<smem>>
    %352 = vector.broadcast %351 : f32 to vector<8x32xf32>
    %353 = arith.mulf %128, %352 : vector<8x32xf32>
    %354 = arith.mulf %353, %278 : vector<8x32xf32>
    %c61 = arith.constant 61 : index
    %355 = memref.load %arg1[%c61] : memref<66xf32, #tpu.memory_space<smem>>
    %356 = vector.broadcast %355 : f32 to vector<8x32xf32>
    %357 = arith.mulf %140, %356 : vector<8x32xf32>
    %358 = arith.mulf %357, %287 : vector<8x32xf32>
    %359 = arith.subf %354, %358 : vector<8x32xf32>
    %c54 = arith.constant 54 : index
    %360 = memref.load %arg1[%c54] : memref<66xf32, #tpu.memory_space<smem>>
    %361 = vector.broadcast %360 : f32 to vector<8x32xf32>
    %362 = arith.mulf %131, %361 : vector<8x32xf32>
    %363 = arith.mulf %362, %287 : vector<8x32xf32>
    %c62 = arith.constant 62 : index
    %364 = memref.load %arg1[%c62] : memref<66xf32, #tpu.memory_space<smem>>
    %365 = vector.broadcast %364 : f32 to vector<8x32xf32>
    %366 = arith.mulf %143, %365 : vector<8x32xf32>
    %367 = arith.mulf %366, %296 : vector<8x32xf32>
    %368 = arith.subf %363, %367 : vector<8x32xf32>
    %c55 = arith.constant 55 : index
    %369 = memref.load %arg1[%c55] : memref<66xf32, #tpu.memory_space<smem>>
    %370 = vector.broadcast %369 : f32 to vector<8x32xf32>
    %371 = arith.mulf %134, %370 : vector<8x32xf32>
    %372 = arith.mulf %371, %296 : vector<8x32xf32>
    %c63 = arith.constant 63 : index
    %373 = memref.load %arg1[%c63] : memref<66xf32, #tpu.memory_space<smem>>
    %374 = vector.broadcast %373 : f32 to vector<8x32xf32>
    %375 = arith.mulf %146, %374 : vector<8x32xf32>
    %376 = arith.mulf %375, %305 : vector<8x32xf32>
    %377 = arith.subf %372, %376 : vector<8x32xf32>
    %c56 = arith.constant 56 : index
    %378 = memref.load %arg1[%c56] : memref<66xf32, #tpu.memory_space<smem>>
    %379 = vector.broadcast %378 : f32 to vector<8x32xf32>
    %380 = arith.mulf %137, %379 : vector<8x32xf32>
    %381 = arith.mulf %380, %305 : vector<8x32xf32>
    %c64 = arith.constant 64 : index
    %382 = memref.load %arg1[%c64] : memref<66xf32, #tpu.memory_space<smem>>
    %383 = vector.broadcast %382 : f32 to vector<8x32xf32>
    %384 = arith.mulf %149, %383 : vector<8x32xf32>
    %385 = arith.mulf %384, %314 : vector<8x32xf32>
    %386 = arith.subf %381, %385 : vector<8x32xf32>
    %c57 = arith.constant 57 : index
    %387 = memref.load %arg1[%c57] : memref<66xf32, #tpu.memory_space<smem>>
    %388 = vector.broadcast %387 : f32 to vector<8x32xf32>
    %389 = arith.mulf %140, %388 : vector<8x32xf32>
    %390 = arith.mulf %389, %314 : vector<8x32xf32>
    %c65 = arith.constant 65 : index
    %391 = memref.load %arg1[%c65] : memref<66xf32, #tpu.memory_space<smem>>
    %392 = vector.broadcast %391 : f32 to vector<8x32xf32>
    %393 = arith.mulf %152, %392 : vector<8x32xf32>
    %394 = arith.mulf %393, %323 : vector<8x32xf32>
    %395 = arith.subf %390, %394 : vector<8x32xf32>
    %c0_39 = arith.constant 0 : index
    %c128 = arith.constant 128 : index
    %396 = vector.load %arg9[%c0_39, %c128] : memref<8x1152xf32, #tpu.memory_space<vmem>>, vector<8x32xf32>
    tpu.vector_store %arg9[%c0_39, %c128], %332 {strides = array<i32>} : memref<8x1152xf32, #tpu.memory_space<vmem>>, vector<8x32xf32>,
    %c0_40 = arith.constant 0 : index
    %c256 = arith.constant 256 : index
    %397 = vector.load %arg9[%c0_40, %c256] : memref<8x1152xf32, #tpu.memory_space<vmem>>, vector<8x32xf32>
    tpu.vector_store %arg9[%c0_40, %c256], %341 {strides = array<i32>} : memref<8x1152xf32, #tpu.memory_space<vmem>>, vector<8x32xf32>,
    %c0_41 = arith.constant 0 : index
    %c384 = arith.constant 384 : index
    %398 = vector.load %arg9[%c0_41, %c384] : memref<8x1152xf32, #tpu.memory_space<vmem>>, vector<8x32xf32>
    tpu.vector_store %arg9[%c0_41, %c384], %350 {strides = array<i32>} : memref<8x1152xf32, #tpu.memory_space<vmem>>, vector<8x32xf32>,
    %c0_42 = arith.constant 0 : index
    %c512 = arith.constant 512 : index
    %399 = vector.load %arg9[%c0_42, %c512] : memref<8x1152xf32, #tpu.memory_space<vmem>>, vector<8x32xf32>
    tpu.vector_store %arg9[%c0_42, %c512], %359 {strides = array<i32>} : memref<8x1152xf32, #tpu.memory_space<vmem>>, vector<8x32xf32>,
    %c0_43 = arith.constant 0 : index
    %c640 = arith.constant 640 : index
    %400 = vector.load %arg9[%c0_43, %c640] : memref<8x1152xf32, #tpu.memory_space<vmem>>, vector<8x32xf32>
    tpu.vector_store %arg9[%c0_43, %c640], %368 {strides = array<i32>} : memref<8x1152xf32, #tpu.memory_space<vmem>>, vector<8x32xf32>,
    %c0_44 = arith.constant 0 : index
    %c768 = arith.constant 768 : index
    %401 = vector.load %arg9[%c0_44, %c768] : memref<8x1152xf32, #tpu.memory_space<vmem>>, vector<8x32xf32>
    tpu.vector_store %arg9[%c0_44, %c768], %377 {strides = array<i32>} : memref<8x1152xf32, #tpu.memory_space<vmem>>, vector<8x32xf32>,
    %c0_45 = arith.constant 0 : index
    %c896 = arith.constant 896 : index
    %402 = vector.load %arg9[%c0_45, %c896] : memref<8x1152xf32, #tpu.memory_space<vmem>>, vector<8x32xf32>
    tpu.vector_store %arg9[%c0_45, %c896], %386 {strides = array<i32>} : memref<8x1152xf32, #tpu.memory_space<vmem>>, vector<8x32xf32>,
    %c0_46 = arith.constant 0 : index
    %c1024 = arith.constant 1024 : index
    %403 = vector.load %arg9[%c0_46, %c1024] : memref<8x1152xf32, #tpu.memory_space<vmem>>, vector<8x32xf32>
    tpu.vector_store %arg9[%c0_46, %c1024], %395 {strides = array<i32>} : memref<8x1152xf32, #tpu.memory_space<vmem>>, vector<8x32xf32>,
    %c0_47 = arith.constant 0 : index
    %c0_48 = arith.constant 0 : index
    %404 = vector.load %arg9[%c0_47, %c0_48] : memref<8x1152xf32, #tpu.memory_space<vmem>>, vector<8x1152xf32>
    %405 = arith.truncf %404 : vector<8x1152xf32> to vector<8x1152xbf16>
    %c0_49 = arith.constant 0 : index
    %c0_50 = arith.constant 0 : index
    %406 = vector.load %arg6[%c0_49, %c0_50] : memref<1152x128xbf16, #tpu.memory_space<vmem>>, vector<1152x128xbf16>
    %cst_51 = arith.constant dense<0.000000e+00> : vector<8x128xf32>
    %407 = tpu.matmul %405, %406, %cst_51 {dimension_numbers = #tpu.dot_dimension_numbers<[1], [0], [0], [1], [0, 0, 1, 1], [], []>} : vector<8x1152xbf16>, vector<1152x128xbf16>, vector<8x128xf32> -> vector<8x128xf32>
    %c0_52 = arith.constant 0 : index
    %c0_53 = arith.constant 0 : index
    %408 = vector.load %arg7[%c0_52, %c0_53] : memref<8x128xf32, #tpu.memory_space<vmem>>, vector<8x128xf32>
    tpu.vector_store %arg7[%c0_52, %c0_53], %407 {strides = array<i32>} : memref<8x128xf32, #tpu.memory_space<vmem>>, vector<8x128xf32>,
    return
  }
  func.func @transform_0(%arg0: i32) -> i32 {
    %c0_i32 = arith.constant 0 : i32
    %c0_i32_0 = arith.constant 0 : i32
    return %c0_i32 : i32
  }
  func.func @transform_1(%arg0: i32) -> (i32, i32, i32) {
    %c0_i32 = arith.constant 0 : i32
    %c0_i32_0 = arith.constant 0 : i32
    %c0_i32_1 = arith.constant 0 : i32
    return %arg0, %c0_i32, %c0_i32_0 : i32, i32, i32
  }
  func.func @transform_2(%arg0: i32) -> (i32, i32) {
    %c0_i32 = arith.constant 0 : i32
    %c0_i32_0 = arith.constant 0 : i32
    %c0_i32_1 = arith.constant 0 : i32
    return %c0_i32, %c0_i32_0 : i32, i32
  }
  func.func @transform_3(%arg0: i32) -> (i32, i32) {
    %c0_i32 = arith.constant 0 : i32
    %c0_i32_0 = arith.constant 0 : i32
    %c0_i32_1 = arith.constant 0 : i32
    return %c0_i32, %c0_i32_0 : i32, i32
  }
  func.func @transform_4(%arg0: i32) -> (i32, i32) {
    %c0_i32 = arith.constant 0 : i32
    %c0_i32_0 = arith.constant 0 : i32
    %c0_i32_1 = arith.constant 0 : i32
    return %c0_i32, %c0_i32_0 : i32, i32
  }
  func.func @transform_5(%arg0: i32) -> (i32, i32) {
    %c0_i32 = arith.constant 0 : i32
    %c0_i32_0 = arith.constant 0 : i32
    %c0_i32_1 = arith.constant 0 : i32
    return %c0_i32, %c0_i32_0 : i32, i32
  }
  func.func @transform_6(%arg0: i32) -> (i32, i32) {
    %c0_i32 = arith.constant 0 : i32
    %c0_i32_0 = arith.constant 0 : i32
    return %arg0, %c0_i32 : i32, i32
  }
}

</mosaic_0001>

<bundles_post_ra>
// kernel: tpu_custom_call.1
= control target key start
LH: loop header
LB: loop body
LE: loop exit
PB: predicated region body
PF: predicated region fallthrough
CT: control target
= control target key end

     0   :  { %s3453_s0 = inlined_call_operand.hbm [shape: f32[66], index: 0, kind: input, shape index: {}]   ;;  %s3454_s1 = inlined_call_operand.hbm [shape: bf16[16,8,32], index: 1, kind: input, shape index: {}]   ;;  %s3455_s2 = inlined_call_operand.hbm [shape: f32[8,32], index: 2, kind: input, shape index: {}]   ;;  %s3456_s3 = inlined_call_operand.vmem [shape: f32[1,32], index: 3, kind: input, shape index: {}]   ;;  %s3457_s4 = inlined_call_operand.vmem [shape: f32[1,32], index: 4, kind: input, shape index: {}]   ;;  %s3458_s5 = inlined_call_operand.hbm [shape: bf16[1152,128], index: 5, kind: input, shape index: {}]   ;;  %s3459_s6 = inlined_call_operand.hbm [shape: f32[16,128], index: 6, kind: output, shape index: {}]  }
   0x1   :  { %3537 = sst [smem:[#allocation74_spill]] %s3453_s0 }
   0x2   :  { %3538 = sst [smem:[#allocation75_spill]] %s3454_s1 }
   0x3   :  { %3539 = sst [smem:[#allocation76_spill]] %s3455_s2 }
   0x4   :  { %3540 = sst [smem:[#allocation77_spill]] %s3456_s3 }
   0x5   :  { %3541 = sst [smem:[#allocation78_spill]] %s3457_s4 }
   0x6   :  { %3542 = sst [smem:[#allocation79_spill]] %s3458_s5 }
   0x7   :  { %3543 = sst [smem:[#allocation80_spill]] %s3459_s6 }
   0x8   :  { %11 = vsyncpa [#allocation7], 0 }
   0x9   :  { %12 = vsyncpa [#allocation5], 0 }
   0xa   :  { %14 = vsyncpa [#allocation5 + $0x1], 0 }
   0xb   :  { %15 = vsyncpa [#allocation10], 0 }
   0xc   :  { %16 = vsyncpa [#allocation6], 0 }
   0xd   :  { %18 = vsyncpa [#allocation6 + $0x1], 0  ;;  %s2585_s21 = smov 0   ;;  %s2587_s22 = smov 0  }
   0xe   :  { %s2589_s23 = smov 0   ;;  %s2591_s24 = smov 0  }
   0xf LB: > { %3544 = sst [smem:[#allocation17_spill]] %s2527_s21  ;;  %s2606_s25 = sadd.s32 4294967295, %s2539_s24   ;;  %s2539_s24 = sphi %s2591_s24, %s3722_s24   ;;  %s2535_s23 = sphi %s2589_s23, %s3725_s23   ;;  %s2531_s22 = sphi %s2587_s22, %s3724_s22   ;;  %s2527_s21 = sphi %s2585_s21, %s3723_s21  }
  0x10   : > { %3545 = sst [smem:[#allocation18_spill]] %s2531_s22  ;;  %s1899_s26 = sadd.s32 4294967294, %s2539_s24  }
  0x11   : > { %3546 = sst [smem:[#allocation19_spill]] %s2535_s23  ;;  %p65_p0 = scmp.ne.s32.totalorder %s2531_s22, %s2527_s21 }
  0x12   : > { %3547 = sst [smem:[#allocation20_spill]] %s2539_s24  ;;  %p3460_p1 = scmp.eq.s32.totalorder %s2606_s25, 0 }
  0x13   : > { %3548 = sst [smem:[#allocation21_spill]] %s2606_s25  ;;  %p179_p3 = scmp.eq.s32.totalorder %s1899_s26, 1 }
  0x14   : > { %p2615_p4 = por %p3460_p1, %p65_p0  ;;  %p1900_p5 = scmp.ge.s32.totalorder %s2539_s24, 1 }
  0x15   : > { %p2620_p6 = por %p179_p3, %p65_p0  ;;  %p186_p7 = scmp.lt.s32.totalorder %s2539_s24, 3 }
  0x16   : > { %s3549_s27 = scalar_select %p2615_p4, 1, 0 }
  0x17   : > { %s3550_s28 = scalar_select %p2620_p6, 1, 0 }
  0x18   : > { %p2625_p8 = pnand %p1900_p5, %p186_p7  ;;  %s2541_s30 = smov [#allocation9]  }
  0x19   : > { %3551 = sst [smem:[#allocation22_spill]] %s3550_s28  ;;  %s208_s7 = sshll.u32 %s2541_s30, 4  ;;  %s209_s7 = int_to_ptr.vmem [resolvable:$true] %s208_s7 }
  0x1a   : > { %s3552_s29 = scalar_select %p2625_p8, 1, 0 }
  0x1b   : > { %p2223_p10 = pneg %p2625_p8  ;;  %s2542_s9 = smov [#allocation11]  }
  0x1c   : > { %s224_s10 = sshll.u32 %s2542_s9, 4  ;;  %s3554_s2 = sld [smem:[#allocation76_spill]]  ;;  %s2638_s10 = int_to_ptr.vmem [resolvable:$true] %s224_s10 }
  0x1d   : > { %p2634_p11 = pnand %p2223_p10, %p3460_p1 }
  0x1f   : > { %p2648_p13 = pneg %p2634_p11 }
  0x22   : > { %s2366_s13 = scalar_lea.hbm %s3554_s2, 128 }
  0x23   : > { %p2367_p12 = scmp.ne.s32.totalorder %s3554_s2, %s2366_s13  ;;  %p2373_p5 = scmp.lt.u32.totalorder %s2366_s13, %s3554_s2 }
  0x25   : > { %p2369_p0 = pnand %p2648_p13, %p2367_p12 }
  0x27   : > { %p2370_p3 = pneg %p2369_p0 }
  0x29   : > { %p2375_p7 = pnand %p2373_p5, %p2370_p3 }
  0x2b   : > { %2378 = shalt.err (!%p2375_p7)
}
  0x2c   : > { %s2379_s19 = scalar_lea.vmem %s209_s7, 128  ;;  %p2387_p2 = scmp.lt.s32.totalorder %s209_s7, %s209_s7 }
  0x2d   : > { %p2380_p10 = scmp.ne.s32.totalorder %s209_s7, %s2379_s19  ;;  %p2388_p6 = scmp.lt.s32.totalorder %s2379_s19, %s2379_s19 }
  0x2f   : > { %p2382_p9 = pnand %p2380_p10, %p2648_p13  ;;  %p2389_p4 = por %p2388_p6, %p2387_p2 }
  0x31   : > { %p2383_p1 = pneg %p2382_p9 }
  0x33   : > { %p2390_p8 = pnand %p2389_p4, %p2383_p1 }
  0x35   : > { %2393 = shalt.err (!%p2390_p8)
}
  0x36   : > { %2229 = dma.hbm_to_vmem [thread:$0]  (!%p2634_p11), %s3554_s2, 128, %s209_s7, [#allocation10]  }
  0x37   : > { %s3556_s0 = sld [smem:[#allocation74_spill]] }
  0x3d   : > { %s2394_s11 = scalar_lea.hbm %s3556_s0, 16 }
  0x3e   : > { %p2395_p9 = scmp.ne.s32.totalorder %s3556_s0, %s2394_s11  ;;  %p2401_p1 = scmp.lt.u32.totalorder %s2394_s11, %s3556_s0 }
  0x40   : > { %p2397_p12 = pnand %p2395_p9, %p2648_p13 }
  0x42   : > { %p2398_p2 = pneg %p2397_p12 }
  0x44   : > { %p2403_p4 = pnand %p2401_p1, %p2398_p2 }
  0x46   : > { %2406 = shalt.err (!%p2403_p4)
}
  0x47   : > { %s2543_s17 = smov [#allocation4]   ;;  %s3557_s5 = sld [smem:[#allocation79_spill]] }
  0x48   : > { %2226 = dma.hbm_to_smem (!%p2634_p11), %s3556_s0, 16, %s2543_s17, [#allocation7]  }
  0x4d   : > { %s2407_s26 = scalar_lea.hbm %s3557_s5, 9216 }
  0x4e   : > { %p2408_p6 = scmp.ne.s32.totalorder %s3557_s5, %s2407_s26  ;;  %p2414_p3 = scmp.lt.u32.totalorder %s2407_s26, %s3557_s5 }
  0x50   : > { %p2410_p8 = pnand %p2408_p6, %p2648_p13 }
  0x52   : > { %p2411_p0 = pneg %p2410_p8 }
  0x54   : > { %p2416_p5 = pnand %p2414_p3, %p2411_p0 }
  0x56   : > { %2419 = shalt.err (!%p2416_p5)
}
  0x57   : > { %s2420_s13 = scalar_lea.vmem %s2638_s10, 9216  ;;  %p2428_p12 = scmp.lt.s32.totalorder %s2638_s10, %s2638_s10 }
  0x58   : > { %p2421_p7 = scmp.ne.s32.totalorder %s2638_s10, %s2420_s13  ;;  %p2429_p2 = scmp.lt.s32.totalorder %s2420_s13, %s2420_s13 }
  0x5a   : > { %p2423_p10 = pnand %p2421_p7, %p2648_p13  ;;  %p2430_p1 = por %p2429_p2, %p2428_p12 }
  0x5c   : > { %p2424_p9 = pneg %p2423_p10 }
  0x5e   : > { %p2431_p4 = pnand %p2430_p1, %p2424_p9 }
  0x60   : > { %2434 = shalt.err (!%p2431_p4)
}
  0x61   : > { %s2544_s14 = smov 64   ;;  %s2545_s16 = smov 4  }
  0x62   : > { %2232 = dma.hbm_to_vmem [thread:$0]  (!%p2634_p11), %s3557_s5, 9216, %s2638_s10, [#allocation10], %s2544_s14, %s2544_s14, %s2545_s16  }
  0x63   : > { %s2707_s7 = sadd.s32 1, %s2539_s24   ;;  %s52_s19 = sadd.s32 1, %s2535_s23 }
  0x64   : > { %3558 = sst [smem:[#allocation23_spill]] %s2707_s7  ;;  %s49_s18 = ssub.s32 %s2539_s24, %s2707_s7 }
  0x65   : > { %p50_p13 = scmp.eq.s32.totalorder %s49_s18, 0  ;;  %p59_p6 = scmp.ne.s32.totalorder %s2535_s23, %s2531_s22 }
  0x66   : > { %p60_p8 = scmp.eq.s32.totalorder %s2539_s24, 0  ;;  %p2244_p0 = scmp.lt.s32.totalorder %s2539_s24, 2 }
  0x67   : > { %s2717_s20 = scalar_select %p50_p13, %s2535_s23, %s52_s19  }
  0x68   : > { %p61_p3 = por %p60_p8, %p59_p6  ;;  %p3560_p5 = scmp.eq.s32.totalorder %s2606_s25, 1 }
  0x69   : > { %3559 = sst [smem:[#allocation24_spill]] %s2717_s20  ;;  %s238_s26 = sand.u32 1, %s2535_s23  }
  0x6a   : > { %p2721_p7 = por %p3560_p5, %p59_p6  ;;  %s2070_s30 = sshll.u32 %s2539_s24, 9 }
  0x6b   : > { %s1905_s10 = sshll.u32 %s238_s26, 5  ;;  %s3563_s1 = sld [smem:[#allocation75_spill]] }
  0x6c   : > { %s3561_s8 = scalar_select %p2721_p7, 1, 0 }
  0x6d   : > { %s242_s13 = scalar_lea.vmem [#allocation8], %s1905_s10  ;;  %p2732_p11 = pnand %p2244_p0, %p61_p3 }
  0x6e   : > { %3562 = sst [smem:[#allocation25_spill]] %s3561_s8  ;;  %s249_s15 = sshll.u32 %s242_s13, 4  ;;  %s2736_s15 = int_to_ptr.vmem [resolvable:$true] %s249_s15 }
  0x6f   : > { %s2738_s18 = scalar_lea.sflag [#allocation5], %s238_s26  ;;  %p2437_p9 = pneg %p2732_p11 }
  0x71   : > { %s2730_s12 = scalar_lea.hbm %s3563_s1, %s2070_s30  ;;  %s2440_s9 = scalar_lea.hbm %s3563_s1, 1024 }
  0x72   : > { %s2435_s19 = scalar_lea.hbm %s2730_s12, 512  ;;  %p2441_p1 = scmp.lt.u32.totalorder %s2730_s12, %s3563_s1 }
  0x73   : > { %p2436_p10 = scmp.ne.s32.totalorder %s2730_s12, %s2435_s19  ;;  %p2442_p4 = scmp.lt.u32.totalorder %s2440_s9, %s2435_s19 }
  0x74   : > { %p2444_p6 = scmp.lt.u32.totalorder %s2435_s19, %s2730_s12 }
  0x75   : > { %p2438_p12 = pnand %p2437_p9, %p2436_p10  ;;  %p2443_p13 = por %p2442_p4, %p2441_p1 }
  0x77   : > { %p2439_p2 = pneg %p2438_p12  ;;  %p2445_p8 = por %p2444_p6, %p2443_p13 }
  0x79   : > { %p2446_p0 = pnand %p2445_p8, %p2439_p2 }
  0x7b   : > { %2449 = shalt.err (!%p2446_p0)
}
  0x7c   : > { %s2450_s26 = scalar_lea.vmem %s2736_s15, 512  ;;  %s2546_s30 = smov [#allocation8]  }
  0x7d   : > { %p2451_p3 = scmp.ne.s32.totalorder %s2736_s15, %s2450_s26  ;;  %s2455_s10 = sshll.u32 %s2546_s30, 4  ;;  %s2456_s10 = int_to_ptr.vmem [resolvable:$false] %s2455_s10 }
  0x7e   : > { %s2457_s11 = scalar_lea.vmem %s2456_s10, 1024  ;;  %p2458_p12 = scmp.lt.s32.totalorder %s2736_s15, %s2456_s10 }
  0x7f   : > { %p2453_p5 = pnand %p2451_p3, %p2437_p9  ;;  %p2459_p1 = scmp.lt.s32.totalorder %s2457_s11, %s2450_s26 }
  0x81   : > { %p2454_p10 = pneg %p2453_p5  ;;  %p2460_p4 = por %p2459_p1, %p2458_p12 }
  0x83   : > { %p2461_p13 = pnand %p2460_p4, %p2454_p10 }
  0x85   : > { %2464 = shalt.err (!%p2461_p13)
}
  0x86   : > { %2236 = dma.hbm_to_vmem [thread:$0]  (!%p2732_p11), %s2730_s12, 512, %s2736_s15, %s2738_s18, %s2544_s14, %s2544_s14, %s2545_s16  }
  0x87   : > { %p3565_p9 = scmp.ne.s32.totalorder %s3552_s29, 0 }
  0x89   : > { %261 = sbr.rel (%p3565_p9) target bundleno = 734 (0x2de), region = 44 }
  0x90   : > { %p3566_p2 = scmp.eq.s32.totalorder %s2606_s25, 0 }
  0x92   : > { %2510 = dma.done.wait (%p3566_p2), [#allocation7], 16   ;;  %p3567_p6 = pmov %p3566_p2 }
  0x93   : > { %s2776_s19 = sand.u32 1, %s2531_s22   ;;  %p3569_p8 = scmp.ne.s32.totalorder %s3549_s27, 0 }
  0x94   : > { %2512 = vsyncadd (%p3567_p6), [#allocation7], 4294967280  ;;  %3568 = sst [smem:[#allocation26_spill]] %s2776_s19  ;;  %s1910_s17 = sshll.u32 %s2776_s19, 5 }
  0x95   : > { %s268_s9 = scalar_lea.sflag [#allocation5], %s2776_s19  ;;  %s271_s13 = scalar_lea.vmem [#allocation8], %s1910_s17 }
  0x96   : > { %2514 = dma.done.wait (%p3569_p8), %s268_s9, 512  }
  0x97   : > { %2516 = vsyncadd (%p3569_p8), %s268_s9, 4294966784  ;;  %p3570_p11 = pmov %p3566_p2 }
  0x98   : > { %p3571_p0 = pmov %p3566_p2 }
  0x99   : > { %2518 = dma.done.wait (%p3570_p11), [#allocation10], 9344  }
  0x9a   : > { %2520 = vsyncadd (%p3571_p0), [#allocation10], 4294957952 }
  0x9b   : > { %284 = sfence }
  0x9c   : > { %v2072_v0 = vld [vmem:[%s271_s13] sm:$0xff]   ;;  %v2087_v1 = vld [vmem:[%s271_s13 + $0x8] sm:$0xff]   ;;  %v2088_v2 = vld [vmem:[%s271_s13 + $0x10] sm:$0xff]   ;;  %vm328_vm0 = vcmask 261120   ;;  %vm457_vm1 = vcmask 1041409   ;;  %vm459_vm2 = vcmask 1042434  }
  0x9d   : > { %v2788_v3 = vunpack.c.l.bf16 %v2072_v0  ;;  %v2790_v4 = vunpack.c.h.bf16 %v2072_v0  ;;  %v2792_v5 = vunpack.c.l.bf16 %v2087_v1  ;;  %v2794_v6 = vunpack.c.h.bf16 %v2087_v1  ;;  %v2089_v7 = vld [vmem:[%s271_s13 + $0x18] sm:$0xff]   ;;  %s3572_s3 = sld [smem:[#allocation77_spill]]  ;;  %s2897_s14 = sld [smem:[#allocation4]] }
  0x9e   : > { %v2796_v8 = vunpack.c.l.bf16 %v2088_v2  ;;  %v2798_v9 = vunpack.c.h.bf16 %v2088_v2  ;;  %v2800_v10 = vunpack.c.l.bf16 %v2089_v7  ;;  %v2802_v11 = vunpack.c.h.bf16 %v2089_v7  ;;  %s2899_s16 = sld [smem:[#allocation4 + $0x1]]  ;;  %s2901_s12 = sld [smem:[#allocation4 + $0x2]] }
  0x9f   : > { %v329_v12 = vsel %vm328_vm0, %v2788_v3, 0.0  ;;  %v336_v13 = vsel %vm328_vm0, %v2790_v4, 0.0  ;;  %v343_v14 = vsel %vm328_vm0, %v2792_v5, 0.0  ;;  %v350_v15 = vsel %vm328_vm0, %v2794_v6, 0.0  ;;  %s2903_s15 = sld [smem:[#allocation4 + $0x3]]  ;;  %s2905_s18 = sld [smem:[#allocation4 + $0x4]] }
  0xa0   : > { %v330_v16 = vrot.slane %v329_v12, 4  ;;  %v337_v17 = vrot.slane %v336_v13, 4  ;;  %v344_v18 = vrot.slane %v343_v14, 4  ;;  %v351_v19 = vrot.slane %v350_v15, 4  ;;  %s2907_s26 = sld [smem:[#allocation4 + $0xc]]  ;;  %s2909_s30 = sld [smem:[#allocation4 + $0x16]] }
  0xa1   : > { %v357_v20 = vsel %vm328_vm0, %v2796_v8, 0.0  ;;  %v364_v21 = vsel %vm328_vm0, %v2798_v9, 0.0  ;;  %v371_v22 = vsel %vm328_vm0, %v2800_v10, 0.0  ;;  %v378_v23 = vsel %vm328_vm0, %v2802_v11, 0.0  ;;  %s2911_s10 = sld [smem:[#allocation4 + $0xd]]  ;;  %s2913_s11 = sld [smem:[#allocation4 + $0x17]] }
  0xa2   : > { %v331_v24 = vadd.f32 %v330_v16, %v329_v12  ;;  %v338_v25 = vadd.f32 %v337_v17, %v336_v13  ;;  %v345_v26 = vadd.f32 %v344_v18, %v343_v14  ;;  %v352_v27 = vadd.f32 %v351_v19, %v350_v15  ;;  %s2915_s17 = sld [smem:[#allocation4 + $0xe]]  ;;  %s2917_s9 = sld [smem:[#allocation4 + $0x18]] }
  0xa3   : > { %v358_v28 = vrot.slane %v357_v20, 4  ;;  %v365_v29 = vrot.slane %v364_v21, 4  ;;  %v372_v30 = vrot.slane %v371_v22, 4  ;;  %v379_v31 = vrot.slane %v378_v23, 4  ;;  %3573 = sst [smem:[#allocation27_spill]] %s2897_s14  ;;  %s2919_s13 = sld [smem:[#allocation4 + $0x20]] }
  0xa4   : > { %v332_v32 = vrot.slane %v331_v24, 2  ;;  %v339_v33 = vrot.slane %v338_v25, 2  ;;  %v346_v34 = vrot.slane %v345_v26, 2  ;;  %v353_v35 = vrot.slane %v352_v27, 2  ;;  %3574 = sst [smem:[#allocation28_spill]] %s2899_s16  ;;  %s2921_s27 = sld [smem:[#allocation4 + $0x29]] }
  0xa5   : > { %v359_v36 = vadd.f32 %v358_v28, %v357_v20  ;;  %v366_v37 = vadd.f32 %v365_v29, %v364_v21  ;;  %v373_v38 = vadd.f32 %v372_v30, %v371_v22  ;;  %v380_v39 = vadd.f32 %v379_v31, %v378_v23  ;;  %3575 = sst [smem:[#allocation29_spill]] %s2901_s12  ;;  %s2923_s29 = sld [smem:[#allocation4 + $0x21]] }
  0xa6   : > { %v333_v40 = vadd.f32 %v332_v32, %v331_v24  ;;  %v340_v41 = vadd.f32 %v339_v33, %v338_v25  ;;  %v347_v42 = vadd.f32 %v346_v34, %v345_v26  ;;  %v354_v43 = vadd.f32 %v353_v35, %v352_v27  ;;  %3576 = sst [smem:[#allocation30_spill]] %s2903_s15  ;;  %s2925_s0 = sld [smem:[#allocation4 + $0x2a]] }
  0xa7   : > { %v360_v44 = vrot.slane %v359_v36, 2  ;;  %v367_v45 = vrot.slane %v366_v37, 2  ;;  %v374_v46 = vrot.slane %v373_v38, 2  ;;  %v381_v47 = vrot.slane %v380_v39, 2  ;;  %3577 = sst [smem:[#allocation31_spill]] %s2905_s18  ;;  %s2927_s1 = sld [smem:[#allocation4 + $0x32]] }
  0xa8   : > { %v334_v48 = vrot.slane %v333_v40, 1  ;;  %v341_v49 = vrot.slane %v340_v41, 1  ;;  %v348_v50 = vrot.slane %v347_v42, 1  ;;  %v355_v51 = vrot.slane %v354_v43, 1  ;;  %3578 = sst [smem:[#allocation32_spill]] %s2907_s26  ;;  %s2929_s2 = sld [smem:[#allocation4 + $0x3a]] }
  0xa9   : > { %v361_v52 = vadd.f32 %v360_v44, %v359_v36  ;;  %v368_v53 = vadd.f32 %v367_v45, %v366_v37  ;;  %v375_v54 = vadd.f32 %v374_v46, %v373_v38  ;;  %v382_v55 = vadd.f32 %v381_v47, %v380_v39  ;;  %3579 = sst [smem:[#allocation33_spill]] %s2909_s30  ;;  %s2933_s5 = sld [smem:[#allocation4 + $0x6]] }
  0xaa   : > { %v335_v56 = vadd.f32 %v334_v48, %v333_v40  ;;  %v342_v57 = vadd.f32 %v341_v49, %v340_v41  ;;  %v349_v58 = vadd.f32 %v348_v50, %v347_v42  ;;  %v356_v59 = vadd.f32 %v355_v51, %v354_v43  ;;  %3580 = sst [smem:[#allocation34_spill]] %s2911_s10  ;;  %s2935_s20 = sld [smem:[#allocation4 + $0x7]] }
  0xab   : > { %v362_v60 = vrot.slane %v361_v52, 1  ;;  %v369_v61 = vrot.slane %v368_v53, 1  ;;  %v376_v62 = vrot.slane %v375_v54, 1  ;;  %v383_v63 = vrot.slane %v382_v55, 1  ;;  %3581 = sst [smem:[#allocation35_spill]] %s2913_s11  ;;  %s2937_s23 = sld [smem:[#allocation4 + $0xf]] }
  0xac   : > { %v458_v0 = vsel %vm457_vm1, %v342_v57, %v335_v56  ;;  %vm461_vm3 = vcmask 1043459   ;;  %vm463_vm4 = vcmask 1044484   ;;  %vm465_vm5 = vcmask 1045509   ;;  %3582 = sst [smem:[#allocation36_spill]] %s2915_s17  ;;  %s2939_s22 = sld [smem:[#allocation4 + $0x19]] }
  0xad   : > { %v363_v1 = vadd.f32 %v362_v60, %v361_v52  ;;  %v370_v2 = vadd.f32 %v369_v61, %v368_v53  ;;  %v377_v7 = vadd.f32 %v376_v62, %v375_v54  ;;  %v460_v12 = vsel %vm459_vm2, %v349_v58, %v458_v0  ;;  %3583 = sst [smem:[#allocation37_spill]] %s2917_s9  ;;  %s2941_s7 = sld [smem:[#allocation4 + $0x10]] }
  0xae   : > { %vm467_vm6 = vcmask 1046534   ;;  %vm469_vm7 = vcmask 1047559   ;;  %v384_v13 = vadd.f32 %v383_v63, %v382_v55  ;;  %v462_v14 = vsel %vm461_vm3, %v356_v59, %v460_v12  ;;  %3584 = sst [smem:[#allocation38_spill]] %s2919_s13  ;;  %s2943_s24 = sld [smem:[#allocation4 + $0x1a]] }
  0xaf   : > { %v464_v15 = vsel %vm463_vm4, %v363_v1, %v462_v14  ;;  %v385_v20 = vmul.f32 %v2788_v3, %v2788_v3  ;;  %v386_v21 = vmul.f32 %v2790_v4, %v2790_v4  ;;  %v387_v22 = vmul.f32 %v2792_v5, %v2792_v5  ;;  %3585 = sst [smem:[#allocation39_spill]] %s2921_s27  ;;  %s2945_s28 = sld [smem:[#allocation4 + $0x22]] }
  0xb0   : > { %v466_v16 = vsel %vm465_vm5, %v370_v2, %v464_v15  ;;  %v388_v23 = vmul.f32 %v2794_v6, %v2794_v6  ;;  %v389_v24 = vmul.f32 %v2796_v8, %v2796_v8  ;;  %v390_v25 = vmul.f32 %v2798_v9, %v2798_v9  ;;  %3586 = sst [smem:[#allocation40_spill]] %s2923_s29  ;;  %s2947_s21 = sld [smem:[#allocation4 + $0x2b]] }
  0xb1   : > { %v468_v17 = vsel %vm467_vm6, %v377_v7, %v466_v16  ;;  %v391_v26 = vmul.f32 %v2800_v10, %v2800_v10  ;;  %v393_v27 = vsel %vm328_vm0, %v385_v20, 0.0  ;;  %v392_v28 = vmul.f32 %v2802_v11, %v2802_v11  ;;  %3587 = sst [smem:[#allocation41_spill]] %s2925_s0  ;;  %s2949_s6 = sld [smem:[#allocation4 + $0x23]] }
  0xb2   : > { %v470_v18 = vsel %vm469_vm7, %v384_v13, %v468_v17  ;;  %v394_v29 = vrot.slane %v393_v27, 4  ;;  %v400_v30 = vsel %vm328_vm0, %v386_v21, 0.0  ;;  %v407_v31 = vsel %vm328_vm0, %v387_v22, 0.0  ;;  %3588 = sst [smem:[#allocation42_spill]] %s2927_s1  ;;  %s2951_s8 = sld [smem:[#allocation4 + $0x2c]] }
  0xb3   : > { %v472_v19 = vsel %vm328_vm0, %v470_v18, 0.0  ;;  %v401_v32 = vrot.slane %v400_v30, 4  ;;  %v408_v33 = vrot.slane %v407_v31, 4  ;;  %v414_v34 = vsel %vm328_vm0, %v388_v23, 0.0  ;;  %3589 = sst [smem:[#allocation43_spill]] %s2929_s2  ;;  %s2953_s25 = sld [smem:[#allocation4 + $0x34]] }
  0xb4   : > { %473 = vadd.xlane.f32.xlu0 %v472_v19  ;;  %v421_v35 = vsel %vm328_vm0, %v389_v24, 0.0  ;;  %v395_v36 = vadd.f32 %v394_v29, %v393_v27  ;;  %v415_v37 = vrot.slane %v414_v34, 4  ;;  %v428_v39 = vsel %vm328_vm0, %v390_v25, 0.0  ;;  %3591 = sst [smem:[#allocation45_spill]] %s2933_s5  ;;  %s3617_s4 = sld [smem:[#allocation78_spill]] }
  0xb5   : > { %v422_v38 = vrot.slane %v421_v35, 4  ;;  %v402_v40 = vadd.f32 %v401_v32, %v400_v30  ;;  %v409_v41 = vadd.f32 %v408_v33, %v407_v31  ;;  %v429_v42 = vrot.slane %v428_v39, 4  ;;  %3592 = sst [smem:[#allocation46_spill]] %s2935_s20  ;;  %s2955_s19 = sld [smem:[#allocation4 + $0x3c]] }
  0xb6   : > { %v435_v43 = vsel %vm328_vm0, %v391_v26, 0.0  ;;  %v396_v44 = vrot.slane %v395_v36, 2  ;;  %v416_v45 = vadd.f32 %v415_v37, %v414_v34  ;;  %v442_v51 = vsel %vm328_vm0, %v392_v28, 0.0  ;;  %v2289_v37 = vld [vmem:[#allocation11 + $0x80] sm:$0xff]   ;;  %3593 = sst [smem:[#allocation47_spill]] %s2937_s23  ;;  %s2957_s23 = sld [smem:[#allocation4 + $0x35]] }
  0xb7   : > { %v423_v46 = vadd.f32 %v422_v38, %v421_v35  ;;  %v436_v47 = vrot.slane %v435_v43, 4  ;;  %v403_v48 = vrot.slane %v402_v40, 2  ;;  %v410_v49 = vrot.slane %v409_v41, 2  ;;  %v2290_v38 = vld [vmem:[#allocation11 + $0xc8] sm:$0xff]   ;;  %3594 = sst [smem:[#allocation48_spill]] %s2939_s22 }
  0xb8   : > { %v430_v50 = vadd.f32 %v429_v42, %v428_v39  ;;  %v397_v52 = vadd.f32 %v396_v44, %v395_v36  ;;  %v417_v53 = vrot.slane %v416_v45, 2  ;;  %v443_v59 = vrot.slane %v442_v51, 4  ;;  %v2288_v36 = vld [vmem:[#allocation11 + $0xc0] sm:$0xff]   ;;  %v2291_v39 = vld [vmem:[#allocation11 + $0x88] sm:$0xff]   ;;  %v2296_v44 = vld [vmem:[#allocation11 + $0xd8] sm:$0xff]   ;;  %3595 = sst [smem:[#allocation49_spill]] %s2941_s7 }
  0xb9   : > { %v424_v54 = vrot.slane %v423_v46, 2  ;;  %v437_v55 = vadd.f32 %v436_v47, %v435_v43  ;;  %v404_v56 = vadd.f32 %v403_v48, %v402_v40  ;;  %v411_v57 = vadd.f32 %v410_v49, %v409_v41  ;;  %2112 = vmatprep.subr.bf16.mxu1 %v2288_v36  ;;  %v2292_v40 = vld [vmem:[#allocation11 + $0xd0] sm:$0xff]   ;;  %v2294_v42 = vld [vmem:[#allocation11 + $0x40] sm:$0xff]   ;;  %v2299_v47 = vld [vmem:[#allocation11 + $0x8] sm:$0xff]   ;;  %3596 = sst [smem:[#allocation50_spill]] %s2943_s24  ;;  %s2959_s7 = sld [smem:[#allocation4 + $0x33]] }
  0xba   : > { %v431_v58 = vrot.slane %v430_v50, 2  ;;  %v398_v60 = vrot.slane %v397_v52, 1  ;;  %v418_v61 = vadd.f32 %v417_v53, %v416_v45  ;;  %v444_v7 = vadd.f32 %v443_v59, %v442_v51  ;;  %2113 = vmatpush3.bf16.msra.mxu1 %v2289_v37  ;;  %v2293_v41 = vld [vmem:[#allocation11 + $0x90] sm:$0xff]   ;;  %v2295_v43 = vld [vmem:[#allocation11] sm:$0xff]   ;;  %2090 = vmatprep.subr.bf16.mxu0 %v2294_v42  ;;  %v2297_v48 = vld [vmem:[#allocation11 + $0x98] sm:$0xff]   ;;  %3597 = sst [smem:[#allocation51_spill]] %s2945_s28 }
  0xbb   : > { %v425_v62 = vadd.f32 %v424_v54, %v423_v46  ;;  %v438_v63 = vrot.slane %v437_v55, 2  ;;  %v405_v0 = vrot.slane %v404_v56, 1  ;;  %v412_v1 = vrot.slane %v411_v57, 1  ;;  %2114 = vmatprep.subr.bf16.mxu1 %v2290_v38  ;;  %v2298_v46 = vld [vmem:[#allocation11 + $0x48] sm:$0xff]   ;;  %2091 = vmatpush3.bf16.msra.mxu0 %v2295_v43  ;;  %v2302_v49 = vld [vmem:[#allocation11 + $0x50] sm:$0xff]   ;;  %v2306_v53 = vld [vmem:[#allocation11 + $0x58] sm:$0xff]  }
  0xbc   : > { %v432_v2 = vadd.f32 %v431_v58, %v430_v50  ;;  %v399_v12 = vadd.f32 %v398_v60, %v397_v52  ;;  %v419_v13 = vrot.slane %v418_v61, 1  ;;  %v445_v19 = vrot.slane %v444_v7, 2  ;;  %2092 = vmatprep.subr.bf16.mxu0 %v2298_v46  ;;  %v2300_v50 = vld [vmem:[#allocation11 + $0xe0] sm:$0xff]   ;;  %v2303_v51 = vld [vmem:[#allocation11 + $0x10] sm:$0xff]   ;;  %v2304_v54 = vld [vmem:[#allocation11 + $0xe8] sm:$0xff]   ;;  %3598 = sst [smem:[#allocation52_spill]] %s2947_s21 }
  0xbd   : > { %v426_v14 = vrot.slane %v425_v62, 1  ;;  %v439_v15 = vadd.f32 %v438_v63, %v437_v55  ;;  %v406_v16 = vadd.f32 %v405_v0, %v404_v56  ;;  %v413_v17 = vadd.f32 %v412_v1, %v411_v57  ;;  %v2301_v52 = vld [vmem:[#allocation11 + $0xa0] sm:$0xff]   ;;  %v2307_v55 = vld [vmem:[#allocation11 + $0x18] sm:$0xff]   ;;  %v2305_v56 = vld [vmem:[#allocation11 + $0xa8] sm:$0xff]   ;;  %3599 = sst [smem:[#allocation53_spill]] %s2949_s6  ;;  %s2961_s28 = sld [smem:[#allocation4 + $0x3b]] }
  0xbe   : > { %v433_v18 = vrot.slane %v432_v2, 1  ;;  %v420_v20 = vadd.f32 %v419_v13, %v418_v61  ;;  %v446_v24 = vadd.f32 %v445_v19, %v444_v7  ;;  %2115 = vmatpush3.bf16.msra.mxu1 %v2291_v39  ;;  %v2547_v45 = vmov 0.0   ;;  %v2310_v57 = vld [vmem:[#allocation11 + $0x60] sm:$0xff]   ;;  %v2308_v58 = vld [vmem:[#allocation11 + $0xf0] sm:$0xff]   ;;  %v2314_v61 = vld [vmem:[#allocation11 + $0x68] sm:$0xff]   ;;  %3600 = sst [smem:[#allocation54_spill]] %s2951_s8 }
  0xbf   : > { %v427_v21 = vadd.f32 %v426_v14, %v425_v62  ;;  %v440_v22 = vrot.slane %v439_v15, 1  ;;  %v483_v25 = vsel %vm457_vm1, %v406_v16, %v399_v12  ;;  %638 = vst [vmem:[#allocation3 + $0x8] sm:$0xff] %v2547_v45  ;;  %637 = vst [vmem:[#allocation3] sm:$0xff] %v2547_v45  ;;  %2116 = vmatprep.subr.bf16.mxu1 %v2292_v40  ;;  %2093 = vmatpush3.bf16.msra.mxu0 %v2299_v47  ;;  %v2311_v59 = vld [vmem:[#allocation11 + $0x20] sm:$0xff]   ;;  %v2309_v60 = vld [vmem:[#allocation11 + $0xb0] sm:$0xff]   ;;  %3601 = sst [smem:[#allocation55_spill]] %s2953_s25 }
  0xc0   : > { %v434_v23 = vadd.f32 %v433_v18, %v432_v2  ;;  %v484_v27 = vsel %vm459_vm2, %v413_v17, %v483_v25  ;;  %v447_v28 = vrot.slane %v446_v24, 1  ;;  %639 = vst [vmem:[#allocation3 + $0x10] sm:$0xff] %v2547_v45  ;;  %640 = vst [vmem:[#allocation3 + $0x18] sm:$0xff] %v2547_v45  ;;  %2094 = vmatprep.subr.bf16.mxu0 %v2302_v49  ;;  %v2312_v62 = vld [vmem:[#allocation11 + $0xf8] sm:$0xff]   ;;  %v2315_v63 = vld [vmem:[#allocation11 + $0x28] sm:$0xff]   ;;  %3602 = sst [smem:[#allocation56_spill]] %s2955_s19 }
  0xc1   : > { %v441_v26 = vadd.f32 %v440_v22, %v439_v15  ;;  %v485_v29 = vsel %vm461_vm3, %v420_v20, %v484_v27  ;;  %641 = vst [vmem:[#allocation3 + $0x20] sm:$0xff] %v2547_v45  ;;  %642 = vst [vmem:[#allocation3 + $0x28] sm:$0xff] %v2547_v45  ;;  %v2313_v0 = vld [vmem:[#allocation11 + $0xb8] sm:$0xff]   ;;  %v2316_v2 = vld [vmem:[#allocation11 + $0x1c0] sm:$0xff]   ;;  %3603 = sst [smem:[#allocation57_spill]] %s2957_s23  ;;  %s2965_s6 = sld [smem:[#allocation4 + $0x9]] }
  0xc2   : > { %v486_v30 = vsel %vm463_vm4, %v427_v21, %v485_v29  ;;  %v448_v31 = vadd.f32 %v447_v28, %v446_v24  ;;  %643 = vst [vmem:[#allocation3 + $0x30] sm:$0xff] %v2547_v45  ;;  %644 = vst [vmem:[#allocation3 + $0x38] sm:$0xff] %v2547_v45  ;;  %2117 = vmatpush3.bf16.msra.mxu1 %v2293_v41  ;;  %v327_v1 = vld [vmem:[#allocation9] sm:$0xff]  ;;  %v2326_v46 = vld [vmem:[#allocation11 + $0x140] sm:$0xff]   ;;  %3604 = sst [smem:[#allocation58_spill]] %s2959_s7  ;;  %s2963_s21 = sld [smem:[#allocation4 + $0x8]] }
  0xc3   : > { %v487_v32 = vsel %vm465_vm5, %v434_v23, %v486_v30  ;;  %645 = vst [vmem:[#allocation3 + $0x40] sm:$0xff] %v2547_v45  ;;  %2118 = vmatprep.subr.bf16.mxu1 %v2296_v44  ;;  %2095 = vmatpush3.bf16.msra.mxu0 %v2303_v51  ;;  %v501_v7 = vmul.f32 %v2790_v4, %v327_v1  ;;  %v2323_v41 = vld [vmem:[#allocation11 + $0x38] sm:$0xff]   ;;  %3605 = sst [smem:[#allocation59_spill]] %s2961_s28  ;;  %s2969_s25 = sld [smem:[#allocation4 + $0xb]] }
  0xc4   : > { %v488_v33 = vsel %vm467_vm6, %v441_v26, %v487_v32  ;;  %2096 = vmatprep.subr.bf16.mxu0 %v2306_v53  ;;  %v502_v12 = vmul.f32 %v2792_v5, %v327_v1  ;;  %v503_v13 = vmul.f32 %v2794_v6, %v327_v1  ;;  %v500_v14 = vmul.f32 %v2788_v3, %v327_v1  ;;  %s2967_s24 = sld [smem:[#allocation4 + $0xa]]  ;;  %s2973_s23 = sld [smem:[#allocation4 + $0x1c]] }
  0xc5   : > { %v489_v34 = vsel %vm469_vm7, %v448_v31, %v488_v33  ;;  %v504_v15 = vmul.f32 %v2796_v8, %v327_v1  ;;  %v505_v16 = vmul.f32 %v2798_v9, %v327_v1  ;;  %v506_v17 = vmul.f32 %v2800_v10, %v327_v1  ;;  %v2318_v33 = vld [vmem:[#allocation11 + $0x70] sm:$0xff]   ;;  %s2971_s19 = sld [smem:[#allocation4 + $0x12]]  ;;  %s2975_s7 = sld [smem:[#allocation4 + $0x13]] }
  0xc6   : > { %v491_v35 = vsel %vm328_vm0, %v489_v34, 0.0  ;;  %2119 = vmatpush3.bf16.msra.mxu1 %v2297_v48  ;;  %v507_v18 = vmul.f32 %v2802_v11, %v327_v1  ;;  %v515_v19 = vsel %vm328_vm0, %v501_v7, 0.0  ;;  %v522_v20 = vsel %vm328_vm0, %v502_v12, 0.0  ;;  %v2319_v34 = vld [vmem:[#allocation11 + $0x30] sm:$0xff]   ;;  %v1914_v12 = vld [vmem:[%s3572_s3] ss:$0 sm:$0xff] }
  0xc7   : > { %492 = vadd.xlane.f32.xlu0 %v491_v35  ;;  %2120 = vmatprep.subr.bf16.mxu1 %v2300_v50  ;;  %v529_v4 = vsel %vm328_vm0, %v503_v13, 0.0  ;;  %v508_v5 = vsel %vm328_vm0, %v500_v14, 0.0  ;;  %v536_v6 = vsel %vm328_vm0, %v504_v15, 0.0  ;;  %v543_v3 = vsel %vm328_vm0, %v505_v16, 0.0  ;;  %v2322_v35 = vld [vmem:[#allocation11 + $0x78] sm:$0xff]   ;;  %s2931_s3 = sld [smem:[#allocation4 + $0x5]] }
  0xc8   : > { %2097 = vmatpush3.bf16.msra.mxu0 %v2307_v55  ;;  %v516_v21 = vrot.slane %v515_v19, 4  ;;  %v523_v8 = vrot.slane %v522_v20, 4  ;;  %v530_v22 = vrot.slane %v529_v4, 4  ;;  %v550_v9 = vsel %vm328_vm0, %v506_v17, 0.0  ;;  %3606 = sst [smem:[#allocation60_spill]] %s2965_s6  ;;  %s2977_s8 = sld [smem:[#allocation4 + $0x1d]] }
  0xc9   : > { %2098 = vmatprep.subr.bf16.mxu0 %v2310_v57  ;;  %v557_v10 = vsel %vm328_vm0, %v507_v18, 0.0  ;;  %v509_v11 = vrot.slane %v508_v5, 4  ;;  %v537_v23 = vrot.slane %v536_v6, 4  ;;  %v544_v24 = vrot.slane %v543_v3, 4  ;;  %3608 = sst [smem:[#allocation62_spill]] %s2969_s25  ;;  %s2979_s28 = sld [smem:[#allocation4 + $0x14]] }
  0xca   : > { %2121 = vmatpush3.bf16.msra.mxu1 %v2301_v52  ;;  %v551_v25 = vrot.slane %v550_v9, 4  ;;  %v558_v26 = vrot.slane %v557_v10, 4  ;;  %v517_v27 = vadd.f32 %v516_v21, %v515_v19  ;;  %v524_v28 = vadd.f32 %v523_v8, %v522_v20  ;;  %3607 = sst [smem:[#allocation61_spill]] %s2967_s24  ;;  %s2981_s6 = sld [smem:[#allocation4 + $0x1e]] }
  0xcb   : > { %2122 = vmatprep.subr.bf16.mxu1 %v2304_v54  ;;  %v531_v29 = vadd.f32 %v530_v22, %v529_v4  ;;  %v510_v30 = vadd.f32 %v509_v11, %v508_v5  ;;  %v538_v31 = vadd.f32 %v537_v23, %v536_v6  ;;  %v545_v32 = vadd.f32 %v544_v24, %v543_v3  ;;  %3609 = sst [smem:[#allocation63_spill]] %s2971_s19  ;;  %s2985_s25 = sld [smem:[#allocation4 + $0x2f]] }
  0xcc   : > { %2099 = vmatpush3.bf16.msra.mxu0 %v2311_v59  ;;  %v552_v36 = vadd.f32 %v551_v25, %v550_v9  ;;  %v559_v37 = vadd.f32 %v558_v26, %v557_v10  ;;  %v518_v38 = vrot.slane %v517_v27, 2  ;;  %v525_v39 = vrot.slane %v524_v28, 2  ;;  %3610 = sst [smem:[#allocation64_spill]] %s2973_s23  ;;  %s2983_s24 = sld [smem:[#allocation4 + $0x26]] }
  0xcd   : > { %2100 = vmatprep.subr.bf16.mxu0 %v2314_v61  ;;  %v532_v40 = vrot.slane %v531_v29, 2  ;;  %v511_v42 = vrot.slane %v510_v30, 2  ;;  %v539_v43 = vrot.slane %v538_v31, 2  ;;  %v546_v44 = vrot.slane %v545_v32, 2  ;;  %3590 = sst [smem:[#allocation44_spill]] %s2931_s3  ;;  %s2990_s23 = sld [smem:[#allocation4 + $0x27]] }
  0xce   : > { %2123 = vmatpush3.bf16.msra.mxu1 %v2305_v56  ;;  %v553_v47 = vrot.slane %v552_v36, 2  ;;  %v560_v48 = vrot.slane %v559_v37, 2  ;;  %v526_v49 = vadd.f32 %v525_v39, %v524_v28  ;;  %v519_v50 = vadd.f32 %v518_v38, %v517_v27  ;;  %3611 = sst [smem:[#allocation65_spill]] %s2975_s7 }
  0xcf   : > { %2124 = vmatprep.subr.bf16.mxu1 %v2308_v58  ;;  %v533_v51 = vadd.f32 %v532_v40, %v531_v29  ;;  %v540_v52 = vadd.f32 %v539_v43, %v538_v31  ;;  %v512_v53 = vadd.f32 %v511_v42, %v510_v30  ;;  %v547_v54 = vadd.f32 %v546_v44, %v545_v32  ;;  %3612 = sst [smem:[#allocation66_spill]] %s2977_s8  ;;  %s2992_s7 = sld [smem:[#allocation4 + $0x30]] }
  0xd0   : > { %2101 = vmatpush3.bf16.msra.mxu0 %v2315_v63  ;;  %v554_v55 = vadd.f32 %v553_v47, %v552_v36  ;;  %v561_v56 = vadd.f32 %v560_v48, %v559_v37  ;;  %v520_v57 = vrot.slane %v519_v50, 1  ;;  %v527_v58 = vrot.slane %v526_v49, 1  ;;  %3613 = sst [smem:[#allocation67_spill]] %s2979_s28  ;;  %s3009_s28 = sld [smem:[#allocation4 + $0x11]] }
  0xd1   : > { %2102 = vmatprep.subr.bf16.mxu0 %v2318_v33  ;;  %v534_v59 = vrot.slane %v533_v51, 1  ;;  %v541_v61 = vrot.slane %v540_v52, 1  ;;  %3614 = sst [smem:[#allocation68_spill]] %s2985_s25  ;;  %s3001_s25 = sld [smem:[#allocation4 + $0x38]] }
  0xd2   : > { %2125 = vmatpush3.bf16.msra.mxu1 %v2309_v60  ;;  %v513_v60 = vrot.slane %v512_v53, 1  ;;  %v555_v63 = vrot.slane %v554_v55, 1  ;;  %v521_v1 = vadd.f32 %v520_v57, %v519_v50  ;;  %v661_v57 = vstv %s2899_s16  ;;  %s3011_s8 = sld [smem:[#allocation4 + $0x1b]]  ;;  %s3033_s16 = sld [smem:[#allocation4 + $0x36]] }
  0xd3   : > { %2126 = vmatprep.subr.bf16.mxu1 %v2312_v62  ;;  %v548_v62 = vrot.slane %v547_v54, 1  ;;  %v535_v7 = vadd.f32 %v534_v59, %v533_v51  ;;  %v542_v15 = vadd.f32 %v541_v61, %v540_v52  ;;  %3615 = sst [smem:[#allocation69_spill]] %s2990_s23  ;;  %v1915_v59 = vld [vmem:[%s3617_s4] ss:$0 sm:$0xff]  ;;  %v676_v61 = vstv %s2905_s18  ;;  %s3618_s4 = sld [smem:[#allocation47_spill]] }
  0xd4   : > { %2103 = vmatpush3.bf16.msra.mxu0 %v2319_v34  ;;  %v514_v14 = vadd.f32 %v513_v60, %v512_v53  ;;  %v556_v18 = vadd.f32 %v555_v63, %v554_v55  ;;  %v565_v4 = vmul.f32 0.125, %v521_v1  ;;  %v671_v60 = vstv %s2903_s15  ;;  %s3624_s18 = sld [smem:[#allocation53_spill]]  ;;  %s3025_s15 = sld [smem:[#allocation4 + $0x25]] }
  0xd5   : > { %2104 = vmatprep.subr.bf16.mxu0 %v2322_v35  ;;  %v549_v16 = vadd.f32 %v548_v62, %v547_v54  ;;  %v567_v6 = vmul.f32 0.125, %v535_v7  ;;  %v568_v21 = vmul.f32 0.125, %v542_v15  ;;  %3616 = sst [smem:[#allocation70_spill]] %s2992_s7  ;;  %v739_v62 = vstv %s2907_s26  ;;  %s3017_s26 = sld [smem:[#allocation4 + $0x24]] }
  0xd6   : > { %2127 = vmatpush3.bf16.msra.mxu1 %v2313_v0  ;;  %v562_v0 = vrot.slane %v561_v56, 1  ;;  %v564_v3 = vmul.f32 0.125, %v514_v14  ;;  %v570_v23 = vmul.f32 0.125, %v556_v18  ;;  %v743_v63 = vstv %s2909_s30  ;;  %s3619_s30 = sld [smem:[#allocation49_spill]] }
  0xd7   : > { %2156 = vmatprep.subr.bf16.mxu1 %v2316_v2  ;;  %v528_v2 = vadd.f32 %v527_v58, %v526_v49  ;;  %v569_v8 = vmul.f32 0.125, %v549_v16  ;;  %v666_v58 = vstv %s2901_s12  ;;  %s3003_s12 = sld [smem:[#allocation4 + $0x40]]  ;;  %v752_v1 = vstv %s2913_s11  ;;  %s3019_s11 = sld [smem:[#allocation4 + $0x2d]] }
  0xd8   : > { %2105 = vmatpush3.bf16.msra.mxu0 %v2323_v41  ;;  %v563_v19 = vadd.f32 %v562_v0, %v561_v56  ;;  %v656_v56 = vstv %s2897_s14  ;;  %v748_v0 = vstv %s2911_s10  ;;  %v761_v7 = vstv %s2917_s9  ;;  %s3620_s10 = sld [smem:[#allocation50_spill]]  ;;  %s3622_s9 = sld [smem:[#allocation51_spill]] }
  0xd9   : > { %2134 = vmatprep.subr.bf16.mxu0 %v2326_v46  ;;  %v566_v5 = vmul.f32 0.125, %v528_v2  ;;  %v757_v2 = vstv %s2915_s17  ;;  %v833_v14 = vstv %s2921_s27  ;;  %v838_v15 = vstv %s2923_s29  ;;  %s3623_s17 = sld [smem:[#allocation52_spill]]  ;;  %s3027_s27 = sld [smem:[#allocation4 + $0x2e]] }
  0xda   : > { %v571_v24 = vmul.f32 0.125, %v563_v19  ;;  %v842_v16 = vstv %s2925_s0  ;;  %v910_v18 = vstv %s2927_s1  ;;  %v914_v19 = vstv %s2929_s2  ;;  %3625 = sst [smem:[#allocation52_spill]] %s3025_s15  ;;  %s3628_s0 = sld [smem:[#allocation55_spill]] }
  0xdb   : > { %s3629_s29 = sld [smem:[#allocation56_spill]]  ;;  %s3631_s14 = sld [smem:[#allocation57_spill]] }
  0xdc   : > { %3630 = sst [smem:[#allocation72_spill]] %s3033_s16  ;;  %s3633_s2 = sld [smem:[#allocation58_spill]] }
  0xdd   : > { %3621 = sst [smem:[#allocation71_spill]] %s3019_s11  ;;  %s3634_s1 = sld [smem:[#allocation59_spill]] }
  0xde   : > { %s3035_s11 = sld [smem:[#allocation4 + $0x3e]]  ;;  %s3040_s15 = sld [smem:[#allocation4 + $0x37]] }
  0xdf   : > { %3627 = sst [smem:[#allocation53_spill]] %s3027_s27  ;;  %s3643_s16 = sld [smem:[#allocation67_spill]] }
  0xe0   : > { %s3636_s27 = sld [smem:[#allocation61_spill]]  ;;  %s3083_s7 = sld [smem:[#allocation4 + $0x28]] }
  0xe4   : > { %3632 = sst [smem:[#allocation73_spill]] %s3035_s11  ;;  %s3642_s11 = sld [smem:[#allocation66_spill]] }
  0xe5   : > { %3637 = sst [smem:[#allocation59_spill]] %s3040_s15  ;;  %s2549_s15 = smov [#allocation12]  }
 0x141   : > { %v474_v13 = vpop.xlane.xlu0 %473 }
 0x142   : > { %v494_v17 = vmul.f32 0.00390625, %v474_v13  ;;  %v829_v13 = vstv %s2919_s13  ;;  %s3626_s13 = sld [smem:[#allocation54_spill]] }
 0x144   : > { %v579_v20 = vmul.f32 %v1914_v12, %v494_v17  ;;  %v496_v52 = vmul.f32 %v494_v17, %v494_v17 }
 0x146   : > { %v581_v22 = vrot.slane %v579_v20, 1  ;;  %v582_v9 = vrot.slane %v579_v20, 2  ;;  %v583_v10 = vrot.slane %v579_v20, 3  ;;  %v584_v11 = vrot.slane %v579_v20, 4 }
 0x147   : > { %v585_v25 = vrot.slane %v579_v20, 5  ;;  %v586_v26 = vrot.slane %v579_v20, 6  ;;  %v587_v27 = vrot.slane %v579_v20, 7  ;;  %v596_v32 = vsub.f32 %v564_v3, %v579_v20 }
 0x148   : > { %v597_v28 = vsub.f32 %v565_v4, %v581_v22  ;;  %v598_v29 = vsub.f32 %v566_v5, %v582_v9  ;;  %v599_v30 = vsub.f32 %v567_v6, %v583_v10  ;;  %v600_v31 = vsub.f32 %v568_v21, %v584_v11 }
 0x149   : > { %v601_v33 = vsub.f32 %v569_v8, %v585_v25  ;;  %v602_v36 = vsub.f32 %v570_v23, %v586_v26  ;;  %v603_v37 = vsub.f32 %v571_v24, %v587_v27  ;;  %v681_v20 = vstv %s2931_s3  ;;  %s3635_s3 = sld [smem:[#allocation60_spill]] }
 0x14a   : > { %v612_v34 = vrot.slane %v597_v28, 7  ;;  %v614_v35 = vrot.slane %v598_v29, 6  ;;  %v616_v39 = vrot.slane %v599_v30, 5  ;;  %v618_v41 = vrot.slane %v600_v31, 4 }
 0x14b   : > { %v620_v43 = vrot.slane %v601_v33, 3  ;;  %v622_v46 = vrot.slane %v602_v36, 2  ;;  %v624_v48 = vrot.slane %v603_v37, 1  ;;  %v686_v4 = vstv %s2933_s5  ;;  %s3641_s5 = sld [smem:[#allocation65_spill]] }
 0x14c   : > { %v613_v38 = vsel %vm457_vm1, %v612_v34, %v596_v32  ;;  %v691_v5 = vstv %s2935_s20  ;;  %v766_v6 = vstv %s3618_s4  ;;  %v770_v3 = vstv %s2939_s22  ;;  %s3638_s20 = sld [smem:[#allocation62_spill]]  ;;  %s3042_s4 = sld [smem:[#allocation4 + $0x3f]] }
 0x14d   : > { %v615_v40 = vsel %vm459_vm2, %v614_v35, %v613_v38  ;;  %v775_v8 = vstv %s3619_s30  ;;  %v779_v22 = vstv %s3620_s10  ;;  %v847_v9 = vstv %s3622_s9  ;;  %s3640_s22 = sld [smem:[#allocation64_spill]]  ;;  %s3048_s30 = sld [smem:[#allocation4 + $0x3d]] }
 0x14e   : > { %v617_v42 = vsel %vm461_vm3, %v616_v39, %v615_v40  ;;  %v851_v10 = vstv %s3623_s17  ;;  %v856_v11 = vstv %s3624_s18  ;;  %v860_v23 = vstv %s3626_s13  ;;  %s3050_s10 = sld [smem:[#allocation4 + $0x15]]  ;;  %s3646_s9 = sld [smem:[#allocation68_spill]] }
 0x14f   : > { %v619_v44 = vsel %vm463_vm4, %v618_v41, %v617_v42  ;;  %v928_v24 = vstv %s3628_s0  ;;  %v932_v25 = vstv %s3629_s29  ;;  %v937_v26 = vstv %s3631_s14  ;;  %s3647_s0 = sld [smem:[#allocation71_spill]]  ;;  %s3648_s13 = sld [smem:[#allocation52_spill]] }
 0x150   : > { %v621_v47 = vsel %vm465_vm5, %v620_v43, %v619_v44  ;;  %v919_v27 = vstv %s3633_s2  ;;  %v923_v28 = vstv %s3634_s1  ;;  %v696_v29 = vstv %s2963_s21  ;;  %s3332_s21 = sld [smem:[#allocation4 + $0x31]]  ;;  %s2469_s18 = sshll.u32 %s2549_s15, 4  ;;  %s2470_s18 = int_to_ptr.vmem [resolvable:$false] %s2469_s18 }
 0x151   : > { %v623_v49 = vsel %vm467_vm6, %v622_v46, %v621_v47  ;;  %v701_v30 = vstv %s3635_s3  ;;  %v706_v31 = vstv %s3636_s27  ;;  %v793_v33 = vstv %s2971_s19  ;;  %s3688_s3 = sld [smem:[#allocation70_spill]]  ;;  %s2471_s17 = scalar_lea.vmem %s2470_s18, 256 }
 0x152   : > { %v2895_v50 = vsel %vm469_vm7, %v624_v48, %v623_v49  ;;  %3639 = sst [smem:[#allocation60_spill]] %s3042_s4  ;;  %v711_v32 = vstv %s3638_s20  ;;  %v802_v35 = vstv %s3641_s5  ;;  %v806_v36 = vstv %s3642_s11  ;;  %s3716_s11 = sld [smem:[#allocation80_spill]] }
 0x153   : > { %3644 = sst [smem:[#allocation61_spill]] %s3048_s30  ;;  %v797_v34 = vstv %s3640_s22  ;;  %v811_v37 = vstv %s3643_s16  ;;  %v815_v38 = vstv %s2981_s6  ;;  %v883_v39 = vstv %s2983_s24  ;;  %s3073_s22 = sld [smem:[#allocation4 + $0x1f]] }
 0x154   : > { %v493_v51 = vpop.xlane.xlu0 %492  ;;  %3645 = sst [smem:[#allocation62_spill]] %s3050_s10  ;;  %v887_v40 = vstv %s3646_s9  ;;  %v892_v41 = vstv %s2990_s23  ;;  %s3694_s6 = sld [smem:[#allocation53_spill]] }
 0x155   : > { %v495_v53 = vmul.f32 0.00390625, %v493_v51  ;;  %s3697_s24 = sld [smem:[#allocation72_spill]]  ;;  %s3703_s9 = sld [smem:[#allocation61_spill]] }
 0x156   : > { %s3704_s27 = sld [smem:[#allocation62_spill]] }
 0x157   : > { %v497_v54 = vsub.f32 %v495_v53, %v496_v52 }
 0x159   : > { %v498_v55 = vadd.f32 1e-05, %v497_v54 }
 0x15b   : > { %2360 = vrsqrt.f32 %v498_v55 }
 0x165   : > { %v2361_v12 = vpop.eup %2360 }
 0x166   : > { %v627_v17 = vmul.f32 %v2361_v12, %v2895_v50 }
 0x168   : > { %v635_v21 = vadd.f32 %v1915_v59, %v627_v17 }
 0x16a   : > { %636 = vst.msk [vmem:[#allocation2] sm:$0xff] %vm328_vm0, %v635_v21 }
 0x171   : > { %v3085_v54 = vld [vmem:[#allocation2] sm:$0xff] }
 0x172   : > { %vm657_vm8 = vcmp.ge.f32.partialorder %v3085_v54, %v656_v56  ;;  %vm662_vm9 = vcmp.ge.f32.partialorder %v3085_v54, %v661_v57  ;;  %vm667_vm10 = vcmp.ge.f32.partialorder %v3085_v54, %v666_v58  ;;  %vm672_vm11 = vcmp.ge.f32.partialorder %v3085_v54, %v671_v60 }
 0x173   : > { %v1917_v21 = vsel %vm657_vm8, 1.0, %v2547_v45  ;;  %v1919_v17 = vsel %vm662_vm9, 1.0, %v2547_v45  ;;  %v1921_v12 = vsel %vm667_vm10, 1.0, %v2547_v45  ;;  %v1923_v55 = vsel %vm672_vm11, 1.0, %v2547_v45 }
 0x174   : > { %vm677_vm12 = vcmp.ge.f32.partialorder %v3085_v54, %v676_v61  ;;  %v715_v59 = vsub.f32 %v1917_v21, %v1919_v17  ;;  %v716_v53 = vsub.f32 %v1919_v17, %v1921_v12  ;;  %v717_v52 = vsub.f32 %v1921_v12, %v1923_v55 }
 0x175   : > { %v1925_v51 = vsel %vm677_vm12, 1.0, %v2547_v45  ;;  %v726_v50 = vsub.f32 %v3085_v54, %v656_v56  ;;  %v3117_v49 = vsub.f32 %v3085_v54, %v661_v57  ;;  %v3122_v44 = vsub.f32 %v3085_v54, %v666_v58 }
 0x176   : > { %v718_v48 = vsub.f32 %v1923_v55, %v1925_v51  ;;  %v3127_v17 = vsub.f32 %v3085_v54, %v671_v60  ;;  %v3132_v12 = vsub.f32 %v3085_v54, %v676_v61  ;;  %vm682_vm13 = vcmp.ge.f32.partialorder %v3085_v54, %v681_v20 }
 0x177   : > { %v740_v56 = vmul.f32 %v739_v62, %v726_v50  ;;  %v744_v57 = vmul.f32 %v743_v63, %v3122_v44  ;;  %v749_v58 = vmul.f32 %v748_v0, %v3117_v49  ;;  %v758_v60 = vmul.f32 %v757_v2, %v3122_v44 }
 0x178   : > { %v753_v61 = vmul.f32 %v752_v1, %v3127_v17  ;;  %v762_v55 = vmul.f32 %v761_v7, %v3132_v12  ;;  %v830_v2 = vmul.f32 %v829_v13, %v726_v50  ;;  %v834_v1 = vmul.f32 %v833_v14, %v3127_v17 }
 0x179   : > { %v741_v63 = vmul.f32 %v740_v56, %v715_v59  ;;  %v745_v21 = vmul.f32 %v744_v57, %v716_v53  ;;  %v750_v0 = vmul.f32 %v749_v58, %v716_v53  ;;  %v759_v47 = vmul.f32 %v758_v60, %v717_v52 }
 0x17a   : > { %v754_v43 = vmul.f32 %v753_v61, %v717_v52  ;;  %v763_v46 = vmul.f32 %v762_v55, %v718_v48  ;;  %v839_v7 = vmul.f32 %v838_v15, %v3117_v49  ;;  %v843_v62 = vmul.f32 %v842_v16, %v3132_v12 }
 0x17b   : > { %v746_v42 = vsub.f32 %v741_v63, %v745_v21  ;;  %v1927_v59 = vsel %vm682_vm13, 1.0, %v2547_v45  ;;  %vm687_vm14 = vcmp.ge.f32.partialorder %v3085_v54, %v686_v4  ;;  %vm692_vm15 = vcmp.ge.f32.partialorder %v3085_v54, %v691_v5 }
 0x17c   : > { %v755_v53 = vsub.f32 %v750_v0, %v754_v43  ;;  %v764_v52 = vsub.f32 %v759_v47, %v763_v46  ;;  %v911_v14 = vmul.f32 %v910_v18, %v726_v50  ;;  %v1929_v15 = vsel %vm687_vm14, 1.0, %v2547_v45 }
 0x17d   : > { %v831_v13 = vmul.f32 %v830_v2, %v746_v42  ;;  %v1931_v16 = vsel %vm692_vm15, 1.0, %v2547_v45  ;;  %v719_v21 = vsub.f32 %v1925_v51, %v1927_v59  ;;  %v915_v56 = vmul.f32 %v914_v19, %v3132_v12 }
 0x17e   : > { %v835_v43 = vmul.f32 %v834_v1, %v755_v53  ;;  %v840_v46 = vmul.f32 %v839_v7, %v755_v53  ;;  %v844_v47 = vmul.f32 %v843_v62, %v764_v52  ;;  %v3181_v57 = vsub.f32 %v1927_v59, %v1929_v15 }
 0x17f   : > { %v3186_v18 = vsub.f32 %v3085_v54, %v681_v20  ;;  %v3191_v42 = vsub.f32 %v3085_v54, %v686_v4  ;;  %v767_v51 = vmul.f32 %v766_v6, %v3127_v17  ;;  %v776_v19 = vmul.f32 %v775_v8, %v3132_v12 }
 0x180   : > { %v836_v50 = vsub.f32 %v831_v13, %v835_v43  ;;  %v845_v58 = vsub.f32 %v840_v46, %v844_v47  ;;  %v3199_v60 = vsub.f32 %v1929_v15, %v1931_v16  ;;  %v848_v61 = vmul.f32 %v847_v9, %v3122_v44 }
 0x181   : > { %v771_v20 = vmul.f32 %v770_v3, %v3186_v18  ;;  %v780_v4 = vmul.f32 %v779_v22, %v3191_v42  ;;  %v768_v62 = vmul.f32 %v767_v51, %v718_v48  ;;  %v777_v8 = vmul.f32 %v776_v19, %v719_v21 }
 0x182   : > { %v912_v55 = vmul.f32 %v911_v14, %v836_v50  ;;  %v916_v6 = vmul.f32 %v915_v56, %v845_v58  ;;  %v3213_v63 = vsub.f32 %v3085_v54, %v691_v5  ;;  %v852_v0 = vmul.f32 %v851_v10, %v3186_v18 }
 0x183   : > { %v772_v3 = vmul.f32 %v771_v20, %v719_v21  ;;  %v781_v22 = vmul.f32 %v780_v4, %v3181_v57  ;;  %v849_v2 = vmul.f32 %v848_v61, %v764_v52  ;;  %v857_v48 = vmul.f32 %v856_v11, %v3127_v17 }
 0x184   : > { %v917_v9 = vsub.f32 %v912_v55, %v916_v6  ;;  %v861_v1 = vmul.f32 %v860_v23, %v3191_v42  ;;  %v929_v59 = vmul.f32 %v928_v24, %v3122_v44  ;;  %v933_v53 = vmul.f32 %v932_v25, %v3191_v42 }
 0x185   : > { %v773_v7 = vsub.f32 %v768_v62, %v772_v3  ;;  %v3225_v5 = vsub.f32 %v777_v8, %v781_v22  ;;  %v938_v10 = vmul.f32 %v937_v26, %v3127_v17  ;;  %vm697_vm1 = vcmp.ge.f32.partialorder %v3085_v54, %v696_v29 }
 0x186   : > { %981 = vst.msk [vmem:[#allocation3 + $0x8] sm:$0xff] %vm328_vm0, %v917_v9  ;;  %vm702_vm2 = vcmp.ge.f32.partialorder %v3085_v54, %v701_v30  ;;  %vm707_vm3 = vcmp.ge.f32.partialorder %v3085_v54, %v706_v31  ;;  %v920_v25 = vmul.f32 %v919_v27, %v3117_v49  ;;  %v1933_v44 = vsel %vm697_vm1, 1.0, %v2547_v45 }
 0x187   : > { %v853_v11 = vmul.f32 %v852_v0, %v773_v7  ;;  %v858_v23 = vmul.f32 %v857_v48, %v773_v7  ;;  %v862_v24 = vmul.f32 %v861_v1, %v3225_v5  ;;  %v1935_v26 = vsel %vm702_vm2, 1.0, %v2547_v45 }
 0x188   : > { %v3253_v17 = vsel %vm707_vm3, 1.0, %v2547_v45  ;;  %vm712_vm4 = vcmp.ge.f32.partialorder %v3085_v54, %v711_v32  ;;  %v921_v14 = vmul.f32 %v920_v25, %v845_v58  ;;  %v924_v27 = vmul.f32 %v923_v28, %v3186_v18 }
 0x189   : > { %v854_v52 = vsub.f32 %v849_v2, %v853_v11  ;;  %v863_v13 = vsub.f32 %v858_v23, %v862_v24  ;;  %v3262_v49 = vsel %vm712_vm4, 1.0, %v2547_v45  ;;  %v722_v15 = vsub.f32 %v1931_v16, %v1933_v44 }
 0x18a   : > { %v723_v43 = vsub.f32 %v1933_v44, %v1935_v26  ;;  %v3267_v46 = vsub.f32 %v3085_v54, %v696_v29  ;;  %v3270_v50 = vsub.f32 %v1935_v26, %v3253_v17  ;;  %v3275_v28 = vsub.f32 %v3085_v54, %v701_v30 }
 0x18b   : > { %v930_v47 = vmul.f32 %v929_v59, %v854_v52  ;;  %v934_v21 = vmul.f32 %v933_v53, %v863_v13  ;;  %v925_v56 = vmul.f32 %v924_v27, %v854_v52  ;;  %v736_v58 = vsub.f32 %v3085_v54, %v706_v31 }
 0x18c   : > { %v794_v16 = vmul.f32 %v793_v33, %v3191_v42  ;;  %v798_v29 = vmul.f32 %v797_v34, %v3267_v46  ;;  %v803_v4 = vmul.f32 %v802_v35, %v3213_v63  ;;  %v812_v30 = vmul.f32 %v811_v37, %v3267_v46 }
 0x18d   : > { %v990_v51 = vld [vmem:[#allocation3 + $0x8] sm:$0xff]  ;;  %v935_v19 = vsub.f32 %v930_v47, %v934_v21  ;;  %v926_v20 = vsub.f32 %v921_v14, %v925_v56  ;;  %v807_v34 = vmul.f32 %v806_v36, %v3275_v28  ;;  %v725_v35 = vsub.f32 %v3253_v17, %v3262_v49 }
 0x18e   : > { %v999_v61 = vpack.c.bf16 %v990_v51, %v990_v51  ;;  %v795_v31 = vmul.f32 %v794_v16, %v3199_v60  ;;  %v799_v33 = vmul.f32 %v798_v29, %v722_v15  ;;  %v804_v55 = vmul.f32 %v803_v4, %v722_v15 }
 0x18f   : > { %983 = vst.msk [vmem:[#allocation3 + $0x18] sm:$0xff] %vm328_vm0, %v935_v19  ;;  %982 = vst.msk [vmem:[#allocation3 + $0x10] sm:$0xff] %vm328_vm0, %v926_v20  ;;  %v813_v37 = vmul.f32 %v812_v30, %v723_v43  ;;  %v816_v6 = vmul.f32 %v815_v38, %v736_v58  ;;  %v3302_v62 = vmul.f32 %v938_v10, %v863_v13  ;;  %v3689_v2 = vstv %s3688_s3  ;;  %v2317_v19 = vld [vmem:[#allocation11 + $0x180] sm:$0xff]  }
 0x190   : > { %1615 = vmatprep.mubr.bf16.mxu0 %v999_v61  ;;  %v800_v8 = vsub.f32 %v795_v31, %v799_v33  ;;  %v808_v36 = vmul.f32 %v807_v34, %v723_v43  ;;  %v884_v3 = vmul.f32 %v883_v39, %v3191_v42  ;;  %v888_v0 = vmul.f32 %v887_v40, %v3275_v28 }
 0x191   : > { %v817_v22 = vmul.f32 %v816_v6, %v3270_v50  ;;  %v893_v9 = vmul.f32 %v892_v41, %v3213_v63  ;;  %v897_v38 = vmul.f32 %v3689_v2, %v736_v58  ;;  %v1916_v7 = vmul.f32 -1.442695, %v3085_v54 }
 0x192   : > { %v809_v48 = vsub.f32 %v804_v55, %v808_v36  ;;  %v885_v1 = vmul.f32 %v884_v3, %v800_v8  ;;  %v3690_v59 = vstv %s3009_s28  ;;  %v3691_v10 = vstv %s3001_s25  ;;  %s3698_s25 = sld [smem:[#allocation73_spill]] }
 0x193   : > { %v785_v53 = vmul.f32 %v3690_v59, %v3186_v18  ;;  %v3320_v39 = vsub.f32 %v813_v37, %v817_v22  ;;  %v965_v11 = vmul.f32 %v3691_v10, %v3191_v42  ;;  %v3692_v40 = vstv %s3011_s8 }
 0x194   : > { %v789_v41 = vmul.f32 %v3692_v40, %v3213_v63  ;;  %v3693_v23 = vstv %s3017_s26  ;;  %v889_v25 = vmul.f32 %v888_v0, %v809_v48  ;;  %v894_v44 = vmul.f32 %v893_v9, %v809_v48  ;;  %s3348_s26 = sld [smem:[#allocation4 + $0x39]] }
 0x195   : > { %v866_v24 = vmul.f32 %v3693_v23, %v3132_v12  ;;  %2362 = vpow2.f32 %v1916_v7  ;;  %v786_v26 = vmul.f32 %v785_v53, %v3181_v57  ;;  %v898_v52 = vmul.f32 %v897_v38, %v3320_v39  ;;  %v2321_v7 = vld [vmem:[#allocation11 + $0x188] sm:$0xff]  }
 0x196   : > { %v3695_v13 = vstv %s3003_s12  ;;  %v790_v42 = vmul.f32 %v789_v41, %v3199_v60  ;;  %v3696_v27 = vstv %s3647_s0  ;;  %v992_v43 = vld [vmem:[#allocation3 + $0x18] sm:$0xff]  ;;  %v991_v47 = vld [vmem:[#allocation3 + $0x10] sm:$0xff]  ;;  %v890_v21 = vsub.f32 %v885_v1, %v889_v25  ;;  %s3701_s12 = sld [smem:[#allocation60_spill]]  ;;  %s3702_s0 = sld [smem:[#allocation59_spill]] }
 0x197   : > { %v969_v14 = vmul.f32 %v3695_v13, %v736_v58  ;;  %v870_v15 = vmul.f32 %v3696_v27, %v3213_v63  ;;  %v867_v56 = vmul.f32 %v866_v24, %v3225_v5  ;;  %v3699_v57 = vstv %s3648_s13  ;;  %v2320_v5 = vld [vmem:[#allocation11 + $0x1c8] sm:$0xff]   ;;  %s3359_s13 = sld [smem:[#allocation4 + $0x41]] }
 0x198   : > { %v875_v16 = vmul.f32 %v3699_v57, %v3186_v18  ;;  %v3700_v29 = vstv %s3694_s6  ;;  %v1001_v60 = vpack.c.bf16 %v992_v43, %v992_v43  ;;  %v1000_v58 = vpack.c.bf16 %v991_v47, %v991_v47  ;;  %v2328_v47 = vld [vmem:[#allocation11 + $0x1d8] sm:$0xff]  }
 0x199   : > { %v879_v51 = vmul.f32 %v3700_v29, %v3267_v46  ;;  %v899_v20 = vsub.f32 %v894_v44, %v898_v52  ;;  %v791_v4 = vsub.f32 %v786_v26, %v790_v42  ;;  %v966_v30 = vmul.f32 %v965_v11, %v890_v21  ;;  %v2324_v11 = vld [vmem:[#allocation11 + $0x1d0] sm:$0xff]  }
 0x19a   : > { %v3705_v31 = vstv %s3697_s24  ;;  %v3706_v34 = vstv %s3698_s25  ;;  %1655 = vmatprep.mubr.bf16.mxu1 %v1001_v60  ;;  %v737_v2 = vsub.f32 %v3085_v54, %v711_v32  ;;  %v3710_v38 = vstv %s3704_s27 }
 0x19b   : > { %v880_v61 = vmul.f32 %v879_v51, %v800_v8  ;;  %v947_v33 = vmul.f32 %v3705_v31, %v3132_v12  ;;  %v951_v55 = vmul.f32 %v3706_v34, %v3267_v46  ;;  %v970_v37 = vmul.f32 %v969_v14, %v899_v20  ;;  %1656 = vmatmul.mubr.bf16.vlgmr.msra.gmra.mrb[0].mxu1 %v1000_v58  ;;  %v2340_v31 = vld [vmem:[#allocation11 + $0x1f0] sm:$0xff]   ;;  %v2345_v34 = vld [vmem:[#allocation11 + $0x1b8] sm:$0xff]  }
 0x19c   : > { %v871_v6 = vmul.f32 %v870_v15, %v791_v4  ;;  %v876_v36 = vmul.f32 %v875_v16, %v791_v4  ;;  %v3707_v3 = vstv %s3701_s12  ;;  %v3708_v8 = vstv %s3702_s0  ;;  %2157 = vmatpush3.bf16.msra.mxu1 %v2317_v19  ;;  %v2332_v16 = vld [vmem:[#allocation11 + $0x1e0] sm:$0xff]   ;;  %v2336_v4 = vld [vmem:[#allocation11 + $0x1e8] sm:$0xff]  }
 0x19d   : > { %v960_v22 = vmul.f32 %v3707_v3, %v3275_v28  ;;  %v956_v0 = vmul.f32 %v3708_v8, %v3186_v18  ;;  %v3709_v12 = vstv %s3703_s9  ;;  %v821_v48 = vmul.f32 %v3710_v38, %v3275_v28  ;;  %2158 = vmatprep.subr.bf16.mxu1 %v2320_v5  ;;  %v2333_v19 = vld [vmem:[#allocation11 + $0x1a0] sm:$0xff]   ;;  %v2339_v38 = vld [vmem:[#allocation11 + $0x118] sm:$0xff]  }
 0x19e   : > { %v942_v9 = vmul.f32 %v3709_v12, %v3213_v63  ;;  %v971_v1 = vsub.f32 %v966_v30, %v970_v37  ;;  %v872_v59 = vsub.f32 %v867_v56, %v871_v6  ;;  %v881_v53 = vsub.f32 %v876_v36, %v880_v61  ;;  %v2327_v6 = vld [vmem:[#allocation11 + $0x100] sm:$0xff]   ;;  %v2334_v12 = vld [vmem:[#allocation11 + $0x150] sm:$0xff]  }
 0x19f   : > { %v961_v10 = vmul.f32 %v960_v22, %v890_v21  ;;  %v822_v18 = vmul.f32 %v821_v48, %v3270_v50  ;;  %v3711_v40 = vstv %s3073_s22  ;;  %v905_v23 = vstv %s3332_s21  ;;  %v2363_v44 = vpop.eup %2362  ;;  %v2325_v50 = vld [vmem:[#allocation11 + $0x190] sm:$0xff]   ;;  %v2330_v22 = vld [vmem:[#allocation11 + $0x148] sm:$0xff]   ;;  %v2342_v48 = vld [vmem:[#allocation11 + $0x160] sm:$0xff]   ;;  %s3713_s22 = sld [smem:[#allocation26_spill]] }
 0x1a0   : > { %v825_v41 = vmul.f32 %v3711_v40, %v737_v2  ;;  %987 = vst.msk [vmem:[#allocation3 + $0x38] sm:$0xff] %vm328_vm0, %v971_v1  ;;  %v948_v32 = vmul.f32 %v947_v33, %v872_v59  ;;  %v952_v24 = vmul.f32 %v951_v55, %v881_v53  ;;  %v957_v28 = vmul.f32 %v956_v0, %v881_v53  ;;  %v2344_v33 = vld [vmem:[#allocation11 + $0x1f8] sm:$0xff]   ;;  %v2331_v0 = vld [vmem:[#allocation11 + $0x108] sm:$0xff]   ;;  %v2343_v1 = vld [vmem:[#allocation11 + $0x120] sm:$0xff]  }
 0x1a1   : > { %v943_v25 = vmul.f32 %v942_v9, %v872_v59  ;;  %v3712_v52 = vstv %s3083_s7  ;;  %v973_v14 = vstv %s3348_s26  ;;  %2159 = vmatpush3.bf16.msra.mxu1 %v2321_v7  ;;  %v650_v42 = vadd.f32 1.0, %v2363_v44  ;;  %v2335_v9 = vld [vmem:[#allocation11 + $0x110] sm:$0xff]   ;;  %v2346_v7 = vld [vmem:[#allocation11 + $0x168] sm:$0xff]   ;;  %s3714_s7 = sld [smem:[#allocation21_spill]] }
 0x1a2   : > { %v826_v26 = vmul.f32 %v825_v41, %v725_v35  ;;  %v902_v13 = vmul.f32 %v3712_v52, %v3267_v46  ;;  %v953_v27 = vsub.f32 %v948_v32, %v952_v24  ;;  %v962_v15 = vsub.f32 %v957_v28, %v961_v10  ;;  %2160 = vmatprep.subr.bf16.mxu1 %v2324_v11  ;;  %v2329_v35 = vld [vmem:[#allocation11 + $0x198] sm:$0xff]   ;;  %v2347_v59 = vld [vmem:[#allocation11 + $0x128] sm:$0xff]   ;;  %v2348_v53 = vld [vmem:[#allocation11 + $0x170] sm:$0xff]  }
 0x1a3   : > { %v944_v43 = vsub.f32 %v3302_v62, %v943_v25  ;;  %v906_v57 = vmul.f32 %v905_v23, %v737_v2  ;;  %2364 = vrcp.f32 %v650_v42  ;;  %v977_v17 = vstv %s3359_s13  ;;  %v2349_v10 = vld [vmem:[#allocation11 + $0x130] sm:$0xff]   ;;  %v2350_v11 = vld [vmem:[#allocation11 + $0x178] sm:$0xff]   ;;  %v2352_v41 = vld [vmem:[#allocation11 + $0x200] sm:$0xff]  }
 0x1a4   : > { %v827_v21 = vsub.f32 %v822_v18, %v826_v26  ;;  %v903_v56 = vmul.f32 %v902_v13, %v3320_v39  ;;  %985 = vst.msk [vmem:[#allocation3 + $0x28] sm:$0xff] %vm328_vm0, %v953_v27  ;;  %986 = vst.msk [vmem:[#allocation3 + $0x30] sm:$0xff] %vm328_vm0, %v962_v15  ;;  %v974_v46 = vmul.f32 %v973_v14, %v3213_v63  ;;  %v2337_v63 = vld [vmem:[#allocation11 + $0x1a8] sm:$0xff]   ;;  %v2351_v18 = vld [vmem:[#allocation11 + $0x138] sm:$0xff]  }
 0x1a5   : > { %984 = vst.msk [vmem:[#allocation3 + $0x20] sm:$0xff] %vm328_vm0, %v944_v43  ;;  %2161 = vmatpush3.bf16.msra.mxu1 %v2325_v50  ;;  %v978_v39 = vmul.f32 %v977_v17, %v737_v2  ;;  %v2338_v2 = vld [vmem:[#allocation11 + $0x158] sm:$0xff]   ;;  %v2353_v32 = vld [vmem:[#allocation11 + $0x208] sm:$0xff]   ;;  %v2354_v24 = vld [vmem:[#allocation11 + $0x210] sm:$0xff]   ;;  %s1913_s28 = sshll.u32 %s3713_s22, 3  ;;  %s1785_s16 = scalar_lea.sflag [#allocation6], %s3713_s22 }
 0x1a6   : > { %v907_v49 = vmul.f32 %v906_v57, %v827_v21  ;;  %2162 = vmatprep.subr.bf16.mxu1 %v2328_v47  ;;  %v975_v51 = vmul.f32 %v974_v46, %v899_v20  ;;  %v2341_v20 = vld [vmem:[#allocation11 + $0x1b0] sm:$0xff]   ;;  %v2355_v28 = vld [vmem:[#allocation11 + $0x218] sm:$0xff]   ;;  %v2356_v25 = vld [vmem:[#allocation11 + $0x220] sm:$0xff]   ;;  %s308_s14 = scalar_lea.vmem [#allocation12], %s1913_s28 }
 0x1a7   : > { %v996_v62 = vld [vmem:[#allocation3 + $0x38] sm:$0xff]  ;;  %v2358_v26 = vld [vmem:[#allocation11 + $0x230] sm:$0xff]   ;;  %v2359_v52 = vld [vmem:[#allocation11 + $0x238] sm:$0xff]   ;;  %s2067_s8 = sshll.u32 %s3714_s7, 7  ;;  %s1798_s10 = sshll.u32 %s308_s14, 4  ;;  %s3411_s10 = int_to_ptr.vmem [resolvable:$true] %s1798_s10 }
 0x1a8   : > { %v908_v29 = vsub.f32 %v903_v56, %v907_v49  ;;  %v1005_v60 = vpack.c.bf16 %v996_v62, %v996_v62  ;;  %v2357_v44 = vld [vmem:[#allocation11 + $0x228] sm:$0xff]   ;;  %s3409_s29 = scalar_lea.hbm %s3716_s11, %s2067_s8  ;;  %s2465_s23 = scalar_lea.vmem %s3411_s10, 128 }
 0x1a9   : > { %2163 = vmatpush3.bf16.msra.mxu1 %v2329_v35  ;;  %p2466_p3 = scmp.ne.s32.totalorder %s3411_s10, %s2465_s23  ;;  %p2472_p12 = scmp.lt.s32.totalorder %s3411_s10, %s2470_s18 }
 0x1aa   : > { %v979_v58 = vmul.f32 %v978_v39, %v908_v29  ;;  %1735 = vmatprep.mubr.bf16.mxu1 %v1005_v60  ;;  %2164 = vmatprep.subr.bf16.mxu1 %v2332_v16  ;;  %p2473_p1 = scmp.lt.s32.totalorder %s2471_s17, %s2465_s23 }
 0x1ab   : > { %v994_v55 = vld [vmem:[#allocation3 + $0x28] sm:$0xff]  ;;  %v995_v36 = vld [vmem:[#allocation3 + $0x30] sm:$0xff]  ;;  %p2467_p5 = pnand %p2466_p3, %p2721_p7 }
 0x1ac   : > { %v980_v30 = vsub.f32 %v975_v51, %v979_v58  ;;  %v1003_v8 = vpack.c.bf16 %v994_v55, %v994_v55  ;;  %v993_v40 = vld [vmem:[#allocation3 + $0x20] sm:$0xff]  ;;  %p2474_p4 = por %p2473_p1, %p2472_p12 }
 0x1ad   : > { %v2365_v5 = vpop.eup %2364  ;;  %2165 = vmatpush3.bf16.msra.mxu1 %v2333_v19  ;;  %v1002_v23 = vpack.c.bf16 %v993_v40, %v993_v40  ;;  %p2468_p10 = pneg %p2467_p5 }
 0x1ae   : > { %988 = vst.msk [vmem:[#allocation3 + $0x40] sm:$0xff] %vm328_vm0, %v980_v30  ;;  %v653_v61 = vmul.f32 %v2365_v5, %v3085_v54  ;;  %2166 = vmatprep.subr.bf16.mxu1 %v2336_v4  ;;  %v1004_v54 = vpack.c.bf16 %v995_v36, %v995_v36 }
 0x1af   : > { %p2475_p13 = pnand %p2474_p4, %p2468_p10 }
 0x1b0   : > { %654 = vst.msk [vmem:[#allocation3] sm:$0xff] %vm328_vm0, %v653_v61  ;;  %vm2548_vm0 = vmmov 0  }
 0x1b1   : > { %2167 = vmatpush3.bf16.msra.mxu1 %v2337_v63 }
 0x1b2   : > { %2168 = vmatprep.subr.bf16.mxu1 %v2340_v31 }
 0x1b5   : > { %2169 = vmatpush3.bf16.msra.mxu1 %v2341_v20  ;;  %v997_v13 = vld [vmem:[#allocation3 + $0x40] sm:$0xff] }
 0x1b6   : > { %2170 = vmatprep.subr.bf16.mxu1 %v2344_v33  ;;  %v1006_v14 = vpack.c.bf16 %v997_v13, %v997_v13 }
 0x1b7   : > { %v989_v37 = vld [vmem:[#allocation3] sm:$0xff] }
 0x1b8   : > { %v998_v3 = vpack.c.bf16 %v989_v37, %v989_v37 }
 0x1b9   : > { %2171 = vmatpush3.bf16.msra.mxu1 %v2345_v34 }
 0x1ba   : > { %1616 = vmatmul.mubr.bf16.vlgmr.msra.gmra.mrb[0].mxu0 %v998_v3 }
 0x1bb   : > { %2135 = vmatpush3.bf16.msra.mxu0 %v2327_v6  ;;  %1695 = vmatprep.mubr.bf16.mxu0 %v1003_v8 }
 0x1bc   : > { %2136 = vmatprep.subr.bf16.mxu0 %v2330_v22  ;;  %1736 = vmatmul.mubr.bf16.vlgmr.msra.gmra.mrb[4].mxu1 %v1004_v54 }
 0x1bf   : > { %2137 = vmatpush3.bf16.msra.mxu0 %v2331_v0 }
 0x1c0   : > { %2138 = vmatprep.subr.bf16.mxu0 %v2334_v12 }
 0x1c3   : > { %2139 = vmatpush3.bf16.msra.mxu0 %v2335_v9 }
 0x1c4   : > { %2140 = vmatprep.subr.bf16.mxu0 %v2338_v2 }
 0x1c7   : > { %2141 = vmatpush3.bf16.msra.mxu0 %v2339_v38 }
 0x1c8   : > { %2142 = vmatprep.subr.bf16.mxu0 %v2342_v48 }
 0x1cb   : > { %2143 = vmatpush3.bf16.msra.mxu0 %v2343_v1 }
 0x1cc   : > { %2144 = vmatprep.subr.bf16.mxu0 %v2346_v7 }
 0x1cf   : > { %2145 = vmatpush3.bf16.msra.mxu0 %v2347_v59 }
 0x1d0   : > { %2146 = vmatprep.subr.bf16.mxu0 %v2348_v53 }
 0x1d3   : > { %2147 = vmatpush3.bf16.msra.mxu0 %v2349_v10 }
 0x1d4   : > { %2148 = vmatprep.subr.bf16.mxu0 %v2350_v11 }
 0x1d7   : > { %2149 = vmatpush3.bf16.msra.mxu0 %v2351_v18 }
 0x1d8   : > { %2187 = vmatprep.subr.bf16.mxu0 %v2547_v45 }
 0x1da   : > { %1696 = vmatmul.mubr.bf16.vlgmr.msra.gmra.mrb[4].mxu0 %v1002_v23 }
 0x1db   : > { %2188 = vmatpush3.bf16.msra.mxu0 %v2352_v41  ;;  %2203 = vmatprep.mubr.msk.bf16.mxu0 %vm2548_vm0, %v2547_v45 }
 0x1dc   : > { %2189 = vmatprep.subr.bf16.mxu0 %v2547_v45 }
 0x1df   : > { %2190 = vmatpush3.bf16.msra.mxu0 %v2353_v32 }
 0x1e0   : > { %2191 = vmatprep.subr.bf16.mxu0 %v2547_v45 }
 0x1e3   : > { %2192 = vmatpush3.bf16.msra.mxu0 %v2354_v24 }
 0x1e4   : > { %2193 = vmatprep.subr.bf16.mxu0 %v2547_v45 }
 0x1e7   : > { %2194 = vmatpush3.bf16.msra.mxu0 %v2355_v28 }
 0x1e8   : > { %2195 = vmatprep.subr.bf16.mxu0 %v2547_v45 }
 0x1eb   : > { %2196 = vmatpush3.bf16.msra.mxu0 %v2356_v25 }
 0x1ec   : > { %2197 = vmatprep.subr.bf16.mxu0 %v2547_v45 }
 0x1ef   : > { %2198 = vmatpush3.bf16.msra.mxu0 %v2357_v44 }
 0x1f0   : > { %2199 = vmatprep.subr.bf16.mxu0 %v2547_v45 }
 0x1f3   : > { %2200 = vmatpush3.bf16.msra.mxu0 %v2358_v26 }
 0x1f4   : > { %2201 = vmatprep.subr.bf16.mxu0 %v2547_v45 }
 0x1f7   : > { %2202 = vmatpush3.bf16.msra.mxu0 %v2359_v52 }
 0x1fa   : > { %2204 = vmatmul.mubr.bf16.vlgmr.msra.gmra.mrb[8].mxu0 %v1006_v14 }
 0x26e   : > { %v2128_v50 = vpop.f32.mrb[0].mxu1 }
 0x26f   : > { %v2129_v42 = vpop.f32.mrb[1].mxu1 }
 0x270   : > { %v2130_v27 = vadd.f32 %v2129_v42, %v2128_v50  ;;  %v2131_v15 = vpop.f32.mrb[2].mxu1 }
 0x271   : > { %v2132_v43 = vpop.f32.mrb[3].mxu1 }
 0x28d   : > { %v2106_v47 = vpop.f32.mrb[0].mxu0 }
 0x28e   : > { %v2107_v21 = vpop.f32.mrb[1].mxu0 }
 0x28f   : > { %v2108_v56 = vadd.f32 %v2107_v21, %v2106_v47  ;;  %v2109_v57 = vpop.f32.mrb[2].mxu0  ;;  %v2172_v17 = vpop.f32.mrb[4].mxu1 }
 0x290   : > { %v2110_v49 = vpop.f32.mrb[3].mxu0  ;;  %v2173_v46 = vpop.f32.mrb[5].mxu1 }
 0x291   : > { %v1658_v35 = vadd.f32 %v2130_v27, %v2108_v56  ;;  %v2174_v45 = vadd.f32 %v2173_v46, %v2172_v17  ;;  %v2175_v62 = vpop.f32.mrb[6].mxu1 }
 0x292   : > { %v2176_v16 = vpop.f32.mrb[7].mxu1 }
 0x2ad   : > { %v2150_v29 = vpop.f32.mrb[4].mxu0 }
 0x2ae   : > { %v2151_v51 = vpop.f32.mrb[5].mxu0 }
 0x2af   : > { %v2152_v39 = vadd.f32 %v2151_v51, %v2150_v29  ;;  %v2153_v60 = vpop.f32.mrb[6].mxu0 }
 0x2b0   : > { %v2154_v58 = vpop.f32.mrb[7].mxu0 }
 0x2b1   : > { %v1698_v19 = vadd.f32 %v2152_v39, %v1658_v35 }
 0x2b3   : > { %v1738_v4 = vadd.f32 %v2174_v45, %v1698_v19 }
 0x2cd   : > { %v1777_v30 = vpop.f32.mrb[8].mxu0 }
 0x2ce   : > { %v1778_v5 = vadd.f32 %v1777_v30, %v1738_v4  ;;  %v2205_v63 = vpop.f32.mrb[9].mxu0 }
 0x2cf   : > { %v1780_v61 = vpop.f32.mrb[10].mxu0 }
 0x2d0   : > { %1783 = vst [vmem:[%s308_s14] sm:$0xff] %v1778_v5  ;;  %v2206_v31 = vpop.f32.mrb[11].mxu0 }
 0x2d1   : > { %2478 = shalt.err (!%p2475_p13)
}
 0x2d2   : > { %s2479_s30 = scalar_lea.hbm %s3409_s29, 128  ;;  %s2483_s1 = scalar_lea.hbm %s3716_s11, 256 }
 0x2d3   : > { %p2480_p9 = scmp.ne.s32.totalorder %s3409_s29, %s2479_s30  ;;  %p2484_p8 = scmp.lt.u32.totalorder %s3409_s29, %s3716_s11 }
 0x2d4   : > { %p2485_p11 = scmp.lt.u32.totalorder %s2483_s1, %s2479_s30  ;;  %p2487_p3 = scmp.lt.u32.totalorder %s2479_s30, %s3409_s29 }
 0x2d5   : > { %p2481_p2 = pnand %p2480_p9, %p2721_p7 }
 0x2d6   : > { %p2486_p0 = por %p2485_p11, %p2484_p8 }
 0x2d7   : > { %p2482_p6 = pneg %p2481_p2 }
 0x2d8   : > { %p2488_p5 = por %p2487_p3, %p2486_p0 }
 0x2da   : > { %p2489_p10 = pnand %p2488_p5, %p2482_p6 }
 0x2dc   : > { %2492 = shalt.err (!%p2489_p10)
}
 0x2dd   : > { %2221 = dma.vmem_to_hbm [thread:$0]  (%p2721_p7), %s3411_s10, 128, %s3409_s29, %s1785_s16  }
 0x2de PF: > { %s3717_s21 = sld [smem:[#allocation17_spill]]  ;;  %s3718_s24 = sld [smem:[#allocation22_spill]] }
 0x2df   : > { %s3719_s25 = sld [smem:[#allocation20_spill]] }
 0x2e4   : > { %s1810_s12 = sand.u32 1, %s3717_s21   ;;  %p3720_p12 = scmp.ne.s32.totalorder %s3718_s24, 0 }
 0x2e5   : > { %p3721_p1 = scmp.ge.s32.totalorder %s3719_s25, 2  ;;  %s1811_s26 = scalar_lea.sflag [#allocation6], %s1810_s12 }
 0x2e7   : > { %p2238_p4 = pnand %p3721_p1, %p3720_p12 }
 0x2e9   : > { %2522 = dma.done.wait (!%p2238_p4), %s1811_s26, 128  }
 0x2ea   : > { %2524 = vsyncadd (!%p2238_p4), %s1811_s26, 4294967168  ;;  %s3722_s24 = sld [smem:[#allocation23_spill]]  ;;  %s3723_s21 = sld [smem:[#allocation18_spill]] }
 0x2eb   : > { %s3724_s22 = sld [smem:[#allocation19_spill]]  ;;  %s3725_s23 = sld [smem:[#allocation24_spill]] }
 0x2f0   : > { %p21_p13 = scmp.ge.s32.totalorder %s3722_s24, 4  }
 0x2f2   :  { %23 = sbr.rel (!%p21_p13) target bundleno = 15 (0xf), region = 102 }
 0x2f9   :  { %1816 = vsyncpa [#allocation5], 1 }
 0x2fa   :  { %1818 = vsyncpa [#allocation5 + $0x1], 1 }
 0x2fb   :  { %1819 = vsyncpa [#allocation10], 1 }
 0x2fc   :  { %1820 = vsyncpa [#allocation6], 1 }
 0x2fd   :  { %1822 = vsyncpa [#allocation6 + $0x1], 1 }
 0x2fe   :  { %1823 = vsyncpa [#allocation7], 1 }
 0x2ff   :  { %1825 = vsyncpa [#allocation7 + $0x1], 1 }

// kernel: tpu_custom_call.1
= control target key start
LH: loop header
LB: loop body
LE: loop exit
PB: predicated region body
PF: predicated region fallthrough
CT: control target
= control target key end

     0   :  { %s3453_s0 = inlined_call_operand.hbm [shape: f32[66], index: 0, kind: input, shape index: {}]   ;;  %s3454_s1 = inlined_call_operand.hbm [shape: bf16[16,8,32], index: 1, kind: input, shape index: {}]   ;;  %s3455_s2 = inlined_call_operand.hbm [shape: f32[8,32], index: 2, kind: input, shape index: {}]   ;;  %s3456_s3 = inlined_call_operand.vmem [shape: f32[1,32], index: 3, kind: input, shape index: {}]   ;;  %s3457_s4 = inlined_call_operand.vmem [shape: f32[1,32], index: 4, kind: input, shape index: {}]   ;;  %s3458_s5 = inlined_call_operand.hbm [shape: bf16[1152,128], index: 5, kind: input, shape index: {}]   ;;  %s3459_s6 = inlined_call_operand.hbm [shape: f32[16,128], index: 6, kind: output, shape index: {}]  }
   0x1   :  { %3537 = sst [smem:[#allocation74_spill]] %s3453_s0 }
   0x2   :  { %3538 = sst [smem:[#allocation75_spill]] %s3454_s1 }
   0x3   :  { %3539 = sst [smem:[#allocation76_spill]] %s3455_s2 }
   0x4   :  { %3540 = sst [smem:[#allocation77_spill]] %s3456_s3 }
   0x5   :  { %3541 = sst [smem:[#allocation78_spill]] %s3457_s4 }
   0x6   :  { %3542 = sst [smem:[#allocation79_spill]] %s3458_s5 }
   0x7   :  { %3543 = sst [smem:[#allocation80_spill]] %s3459_s6 }
   0x8   :  { %11 = vsyncpa [#allocation7], 0 }
   0x9   :  { %12 = vsyncpa [#allocation5], 0 }
   0xa   :  { %14 = vsyncpa [#allocation5 + $0x1], 0 }
   0xb   :  { %15 = vsyncpa [#allocation10], 0 }
   0xc   :  { %16 = vsyncpa [#allocation6], 0 }
   0xd   :  { %18 = vsyncpa [#allocation6 + $0x1], 0  ;;  %s2585_s21 = smov 0   ;;  %s2587_s22 = smov 0  }
   0xe   :  { %s2589_s23 = smov 0   ;;  %s2591_s24 = smov 0  }
   0xf LB: > { %3544 = sst [smem:[#allocation17_spill]] %s2527_s21  ;;  %s2606_s25 = sadd.s32 4294967295, %s2539_s24   ;;  %s2539_s24 = sphi %s2591_s24, %s3722_s24   ;;  %s2535_s23 = sphi %s2589_s23, %s3725_s23   ;;  %s2531_s22 = sphi %s2587_s22, %s3724_s22   ;;  %s2527_s21 = sphi %s2585_s21, %s3723_s21  }
  0x10   : > { %3545 = sst [smem:[#allocation18_spill]] %s2531_s22  ;;  %s1899_s26 = sadd.s32 4294967294, %s2539_s24  }
  0x11   : > { %3546 = sst [smem:[#allocation19_spill]] %s2535_s23  ;;  %p65_p0 = scmp.ne.s32.totalorder %s2531_s22, %s2527_s21 }
  0x12   : > { %3547 = sst [smem:[#allocation20_spill]] %s2539_s24  ;;  %p3460_p1 = scmp.eq.s32.totalorder %s2606_s25, 0 }
  0x13   : > { %3548 = sst [smem:[#allocation21_spill]] %s2606_s25  ;;  %p179_p3 = scmp.eq.s32.totalorder %s1899_s26, 1 }
  0x14   : > { %p2615_p4 = por %p3460_p1, %p65_p0  ;;  %p1900_p5 = scmp.ge.s32.totalorder %s2539_s24, 1 }
  0x15   : > { %p2620_p6 = por %p179_p3, %p65_p0  ;;  %p186_p7 = scmp.lt.s32.totalorder %s2539_s24, 3 }
  0x16   : > { %s3549_s27 = scalar_select %p2615_p4, 1, 0 }
  0x17   : > { %s3550_s28 = scalar_select %p2620_p6, 1, 0 }
  0x18   : > { %p2625_p8 = pnand %p1900_p5, %p186_p7  ;;  %s2541_s30 = smov [#allocation9]  }
  0x19   : > { %3551 = sst [smem:[#allocation22_spill]] %s3550_s28  ;;  %s208_s7 = sshll.u32 %s2541_s30, 4  ;;  %s209_s7 = int_to_ptr.vmem [resolvable:$true] %s208_s7 }
  0x1a   : > { %s3552_s29 = scalar_select %p2625_p8, 1, 0 }
  0x1b   : > { %p2223_p10 = pneg %p2625_p8  ;;  %s2542_s9 = smov [#allocation11]  }
  0x1c   : > { %s224_s10 = sshll.u32 %s2542_s9, 4  ;;  %s3554_s2 = sld [smem:[#allocation76_spill]]  ;;  %s2638_s10 = int_to_ptr.vmem [resolvable:$true] %s224_s10 }
  0x1d   : > { %p2634_p11 = pnand %p2223_p10, %p3460_p1 }
  0x1f   : > { %p2648_p13 = pneg %p2634_p11 }
  0x22   : > { %s2366_s13 = scalar_lea.hbm %s3554_s2, 128 }
  0x23   : > { %p2367_p12 = scmp.ne.s32.totalorder %s3554_s2, %s2366_s13  ;;  %p2373_p5 = scmp.lt.u32.totalorder %s2366_s13, %s3554_s2 }
  0x25   : > { %p2369_p0 = pnand %p2648_p13, %p2367_p12 }
  0x27   : > { %p2370_p3 = pneg %p2369_p0 }
  0x29   : > { %p2375_p7 = pnand %p2373_p5, %p2370_p3 }
  0x2b   : > { %2378 = shalt.err (!%p2375_p7)
}
  0x2c   : > { %s2379_s19 = scalar_lea.vmem %s209_s7, 128  ;;  %p2387_p2 = scmp.lt.s32.totalorder %s209_s7, %s209_s7 }
  0x2d   : > { %p2380_p10 = scmp.ne.s32.totalorder %s209_s7, %s2379_s19  ;;  %p2388_p6 = scmp.lt.s32.totalorder %s2379_s19, %s2379_s19 }
  0x2f   : > { %p2382_p9 = pnand %p2380_p10, %p2648_p13  ;;  %p2389_p4 = por %p2388_p6, %p2387_p2 }
  0x31   : > { %p2383_p1 = pneg %p2382_p9 }
  0x33   : > { %p2390_p8 = pnand %p2389_p4, %p2383_p1 }
  0x35   : > { %2393 = shalt.err (!%p2390_p8)
}
  0x36   : > { %2229 = dma.hbm_to_vmem [thread:$0]  (!%p2634_p11), %s3554_s2, 128, %s209_s7, [#allocation10]  }
  0x37   : > { %s3556_s0 = sld [smem:[#allocation74_spill]] }
  0x3d   : > { %s2394_s11 = scalar_lea.hbm %s3556_s0, 16 }
  0x3e   : > { %p2395_p9 = scmp.ne.s32.totalorder %s3556_s0, %s2394_s11  ;;  %p2401_p1 = scmp.lt.u32.totalorder %s2394_s11, %s3556_s0 }
  0x40   : > { %p2397_p12 = pnand %p2395_p9, %p2648_p13 }
  0x42   : > { %p2398_p2 = pneg %p2397_p12 }
  0x44   : > { %p2403_p4 = pnand %p2401_p1, %p2398_p2 }
  0x46   : > { %2406 = shalt.err (!%p2403_p4)
}
  0x47   : > { %s2543_s17 = smov [#allocation4]   ;;  %s3557_s5 = sld [smem:[#allocation79_spill]] }
  0x48   : > { %2226 = dma.hbm_to_smem (!%p2634_p11), %s3556_s0, 16, %s2543_s17, [#allocation7]  }
  0x4d   : > { %s2407_s26 = scalar_lea.hbm %s3557_s5, 9216 }
  0x4e   : > { %p2408_p6 = scmp.ne.s32.totalorder %s3557_s5, %s2407_s26  ;;  %p2414_p3 = scmp.lt.u32.totalorder %s2407_s26, %s3557_s5 }
  0x50   : > { %p2410_p8 = pnand %p2408_p6, %p2648_p13 }
  0x52   : > { %p2411_p0 = pneg %p2410_p8 }
  0x54   : > { %p2416_p5 = pnand %p2414_p3, %p2411_p0 }
  0x56   : > { %2419 = shalt.err (!%p2416_p5)
}
  0x57   : > { %s2420_s13 = scalar_lea.vmem %s2638_s10, 9216  ;;  %p2428_p12 = scmp.lt.s32.totalorder %s2638_s10, %s2638_s10 }
  0x58   : > { %p2421_p7 = scmp.ne.s32.totalorder %s2638_s10, %s2420_s13  ;;  %p2429_p2 = scmp.lt.s32.totalorder %s2420_s13, %s2420_s13 }
  0x5a   : > { %p2423_p10 = pnand %p2421_p7, %p2648_p13  ;;  %p2430_p1 = por %p2429_p2, %p2428_p12 }
  0x5c   : > { %p2424_p9 = pneg %p2423_p10 }
  0x5e   : > { %p2431_p4 = pnand %p2430_p1, %p2424_p9 }
  0x60   : > { %2434 = shalt.err (!%p2431_p4)
}
  0x61   : > { %s2544_s14 = smov 64   ;;  %s2545_s16 = smov 4  }
  0x62   : > { %2232 = dma.hbm_to_vmem [thread:$0]  (!%p2634_p11), %s3557_s5, 9216, %s2638_s10, [#allocation10], %s2544_s14, %s2544_s14, %s2545_s16  }
  0x63   : > { %s2707_s7 = sadd.s32 1, %s2539_s24   ;;  %s52_s19 = sadd.s32 1, %s2535_s23 }
  0x64   : > { %3558 = sst [smem:[#allocation23_spill]] %s2707_s7  ;;  %s49_s18 = ssub.s32 %s2539_s24, %s2707_s7 }
  0x65   : > { %p50_p13 = scmp.eq.s32.totalorder %s49_s18, 0  ;;  %p59_p6 = scmp.ne.s32.totalorder %s2535_s23, %s2531_s22 }
  0x66   : > { %p60_p8 = scmp.eq.s32.totalorder %s2539_s24, 0  ;;  %p2244_p0 = scmp.lt.s32.totalorder %s2539_s24, 2 }
  0x67   : > { %s2717_s20 = scalar_select %p50_p13, %s2535_s23, %s52_s19  }
  0x68   : > { %p61_p3 = por %p60_p8, %p59_p6  ;;  %p3560_p5 = scmp.eq.s32.totalorder %s2606_s25, 1 }
  0x69   : > { %3559 = sst [smem:[#allocation24_spill]] %s2717_s20  ;;  %s238_s26 = sand.u32 1, %s2535_s23  }
  0x6a   : > { %p2721_p7 = por %p3560_p5, %p59_p6  ;;  %s2070_s30 = sshll.u32 %s2539_s24, 9 }
  0x6b   : > { %s1905_s10 = sshll.u32 %s238_s26, 5  ;;  %s3563_s1 = sld [smem:[#allocation75_spill]] }
  0x6c   : > { %s3561_s8 = scalar_select %p2721_p7, 1, 0 }
  0x6d   : > { %s242_s13 = scalar_lea.vmem [#allocation8], %s1905_s10  ;;  %p2732_p11 = pnand %p2244_p0, %p61_p3 }
  0x6e   : > { %3562 = sst [smem:[#allocation25_spill]] %s3561_s8  ;;  %s249_s15 = sshll.u32 %s242_s13, 4  ;;  %s2736_s15 = int_to_ptr.vmem [resolvable:$true] %s249_s15 }
  0x6f   : > { %s2738_s18 = scalar_lea.sflag [#allocation5], %s238_s26  ;;  %p2437_p9 = pneg %p2732_p11 }
  0x71   : > { %s2730_s12 = scalar_lea.hbm %s3563_s1, %s2070_s30  ;;  %s2440_s9 = scalar_lea.hbm %s3563_s1, 1024 }
  0x72   : > { %s2435_s19 = scalar_lea.hbm %s2730_s12, 512  ;;  %p2441_p1 = scmp.lt.u32.totalorder %s2730_s12, %s3563_s1 }
  0x73   : > { %p2436_p10 = scmp.ne.s32.totalorder %s2730_s12, %s2435_s19  ;;  %p2442_p4 = scmp.lt.u32.totalorder %s2440_s9, %s2435_s19 }
  0x74   : > { %p2444_p6 = scmp.lt.u32.totalorder %s2435_s19, %s2730_s12 }
  0x75   : > { %p2438_p12 = pnand %p2437_p9, %p2436_p10  ;;  %p2443_p13 = por %p2442_p4, %p2441_p1 }
  0x77   : > { %p2439_p2 = pneg %p2438_p12  ;;  %p2445_p8 = por %p2444_p6, %p2443_p13 }
  0x79   : > { %p2446_p0 = pnand %p2445_p8, %p2439_p2 }
  0x7b   : > { %2449 = shalt.err (!%p2446_p0)
}
  0x7c   : > { %s2450_s26 = scalar_lea.vmem %s2736_s15, 512  ;;  %s2546_s30 = smov [#allocation8]  }
  0x7d   : > { %p2451_p3 = scmp.ne.s32.totalorder %s2736_s15, %s2450_s26  ;;  %s2455_s10 = sshll.u32 %s2546_s30, 4  ;;  %s2456_s10 = int_to_ptr.vmem [resolvable:$false] %s2455_s10 }
  0x7e   : > { %s2457_s11 = scalar_lea.vmem %s2456_s10, 1024  ;;  %p2458_p12 = scmp.lt.s32.totalorder %s2736_s15, %s2456_s10 }
  0x7f   : > { %p2453_p5 = pnand %p2451_p3, %p2437_p9  ;;  %p2459_p1 = scmp.lt.s32.totalorder %s2457_s11, %s2450_s26 }
  0x81   : > { %p2454_p10 = pneg %p2453_p5  ;;  %p2460_p4 = por %p2459_p1, %p2458_p12 }
  0x83   : > { %p2461_p13 = pnand %p2460_p4, %p2454_p10 }
  0x85   : > { %2464 = shalt.err (!%p2461_p13)
}
  0x86   : > { %2236 = dma.hbm_to_vmem [thread:$0]  (!%p2732_p11), %s2730_s12, 512, %s2736_s15, %s2738_s18, %s2544_s14, %s2544_s14, %s2545_s16  }
  0x87   : > { %p3565_p9 = scmp.ne.s32.totalorder %s3552_s29, 0 }
  0x89   : > { %261 = sbr.rel (%p3565_p9) target bundleno = 734 (0x2de), region = 44 }
  0x90   : > { %p3566_p2 = scmp.eq.s32.totalorder %s2606_s25, 0 }
  0x92   : > { %2510 = dma.done.wait (%p3566_p2), [#allocation7], 16   ;;  %p3567_p6 = pmov %p3566_p2 }
  0x93   : > { %s2776_s19 = sand.u32 1, %s2531_s22   ;;  %p3569_p8 = scmp.ne.s32.totalorder %s3549_s27, 0 }
  0x94   : > { %2512 = vsyncadd (%p3567_p6), [#allocation7], 4294967280  ;;  %3568 = sst [smem:[#allocation26_spill]] %s2776_s19  ;;  %s1910_s17 = sshll.u32 %s2776_s19, 5 }
  0x95   : > { %s268_s9 = scalar_lea.sflag [#allocation5], %s2776_s19  ;;  %s271_s13 = scalar_lea.vmem [#allocation8], %s1910_s17 }
  0x96   : > { %2514 = dma.done.wait (%p3569_p8), %s268_s9, 512  }
  0x97   : > { %2516 = vsyncadd (%p3569_p8), %s268_s9, 4294966784  ;;  %p3570_p11 = pmov %p3566_p2 }
  0x98   : > { %p3571_p0 = pmov %p3566_p2 }
  0x99   : > { %2518 = dma.done.wait (%p3570_p11), [#allocation10], 9344  }
  0x9a   : > { %2520 = vsyncadd (%p3571_p0), [#allocation10], 4294957952 }
  0x9b   : > { %284 = sfence }
  0x9c   : > { %v2072_v0 = vld [vmem:[%s271_s13] sm:$0xff]   ;;  %v2087_v1 = vld [vmem:[%s271_s13 + $0x8] sm:$0xff]   ;;  %v2088_v2 = vld [vmem:[%s271_s13 + $0x10] sm:$0xff]   ;;  %vm328_vm0 = vcmask 261120   ;;  %vm457_vm1 = vcmask 1041409   ;;  %vm459_vm2 = vcmask 1042434  }
  0x9d   : > { %v2788_v3 = vunpack.c.l.bf16 %v2072_v0  ;;  %v2790_v4 = vunpack.c.h.bf16 %v2072_v0  ;;  %v2792_v5 = vunpack.c.l.bf16 %v2087_v1  ;;  %v2794_v6 = vunpack.c.h.bf16 %v2087_v1  ;;  %v2089_v7 = vld [vmem:[%s271_s13 + $0x18] sm:$0xff]   ;;  %s3572_s3 = sld [smem:[#allocation77_spill]]  ;;  %s2897_s14 = sld [smem:[#allocation4]] }
  0x9e   : > { %v2796_v8 = vunpack.c.l.bf16 %v2088_v2  ;;  %v2798_v9 = vunpack.c.h.bf16 %v2088_v2  ;;  %v2800_v10 = vunpack.c.l.bf16 %v2089_v7  ;;  %v2802_v11 = vunpack.c.h.bf16 %v2089_v7  ;;  %s2899_s16 = sld [smem:[#allocation4 + $0x1]]  ;;  %s2901_s12 = sld [smem:[#allocation4 + $0x2]] }
  0x9f   : > { %v329_v12 = vsel %vm328_vm0, %v2788_v3, 0.0  ;;  %v336_v13 = vsel %vm328_vm0, %v2790_v4, 0.0  ;;  %v343_v14 = vsel %vm328_vm0, %v2792_v5, 0.0  ;;  %v350_v15 = vsel %vm328_vm0, %v2794_v6, 0.0  ;;  %s2903_s15 = sld [smem:[#allocation4 + $0x3]]  ;;  %s2905_s18 = sld [smem:[#allocation4 + $0x4]] }
  0xa0   : > { %v330_v16 = vrot.slane %v329_v12, 4  ;;  %v337_v17 = vrot.slane %v336_v13, 4  ;;  %v344_v18 = vrot.slane %v343_v14, 4  ;;  %v351_v19 = vrot.slane %v350_v15, 4  ;;  %s2907_s26 = sld [smem:[#allocation4 + $0xc]]  ;;  %s2909_s30 = sld [smem:[#allocation4 + $0x16]] }
  0xa1   : > { %v357_v20 = vsel %vm328_vm0, %v2796_v8, 0.0  ;;  %v364_v21 = vsel %vm328_vm0, %v2798_v9, 0.0  ;;  %v371_v22 = vsel %vm328_vm0, %v2800_v10, 0.0  ;;  %v378_v23 = vsel %vm328_vm0, %v2802_v11, 0.0  ;;  %s2911_s10 = sld [smem:[#allocation4 + $0xd]]  ;;  %s2913_s11 = sld [smem:[#allocation4 + $0x17]] }
  0xa2   : > { %v331_v24 = vadd.f32 %v330_v16, %v329_v12  ;;  %v338_v25 = vadd.f32 %v337_v17, %v336_v13  ;;  %v345_v26 = vadd.f32 %v344_v18, %v343_v14  ;;  %v352_v27 = vadd.f32 %v351_v19, %v350_v15  ;;  %s2915_s17 = sld [smem:[#allocation4 + $0xe]]  ;;  %s2917_s9 = sld [smem:[#allocation4 + $0x18]] }
  0xa3   : > { %v358_v28 = vrot.slane %v357_v20, 4  ;;  %v365_v29 = vrot.slane %v364_v21, 4  ;;  %v372_v30 = vrot.slane %v371_v22, 4  ;;  %v379_v31 = vrot.slane %v378_v23, 4  ;;  %3573 = sst [smem:[#allocation27_spill]] %s2897_s14  ;;  %s2919_s13 = sld [smem:[#allocation4 + $0x20]] }
  0xa4   : > { %v332_v32 = vrot.slane %v331_v24, 2  ;;  %v339_v33 = vrot.slane %v338_v25, 2  ;;  %v346_v34 = vrot.slane %v345_v26, 2  ;;  %v353_v35 = vrot.slane %v352_v27, 2  ;;  %3574 = sst [smem:[#allocation28_spill]] %s2899_s16  ;;  %s2921_s27 = sld [smem:[#allocation4 + $0x29]] }
  0xa5   : > { %v359_v36 = vadd.f32 %v358_v28, %v357_v20  ;;  %v366_v37 = vadd.f32 %v365_v29, %v364_v21  ;;  %v373_v38 = vadd.f32 %v372_v30, %v371_v22  ;;  %v380_v39 = vadd.f32 %v379_v31, %v378_v23  ;;  %3575 = sst [smem:[#allocation29_spill]] %s2901_s12  ;;  %s2923_s29 = sld [smem:[#allocation4 + $0x21]] }
  0xa6   : > { %v333_v40 = vadd.f32 %v332_v32, %v331_v24  ;;  %v340_v41 = vadd.f32 %v339_v33, %v338_v25  ;;  %v347_v42 = vadd.f32 %v346_v34, %v345_v26  ;;  %v354_v43 = vadd.f32 %v353_v35, %v352_v27  ;;  %3576 = sst [smem:[#allocation30_spill]] %s2903_s15  ;;  %s2925_s0 = sld [smem:[#allocation4 + $0x2a]] }
  0xa7   : > { %v360_v44 = vrot.slane %v359_v36, 2  ;;  %v367_v45 = vrot.slane %v366_v37, 2  ;;  %v374_v46 = vrot.slane %v373_v38, 2  ;;  %v381_v47 = vrot.slane %v380_v39, 2  ;;  %3577 = sst [smem:[#allocation31_spill]] %s2905_s18  ;;  %s2927_s1 = sld [smem:[#allocation4 + $0x32]] }
  0xa8   : > { %v334_v48 = vrot.slane %v333_v40, 1  ;;  %v341_v49 = vrot.slane %v340_v41, 1  ;;  %v348_v50 = vrot.slane %v347_v42, 1  ;;  %v355_v51 = vrot.slane %v354_v43, 1  ;;  %3578 = sst [smem:[#allocation32_spill]] %s2907_s26  ;;  %s2929_s2 = sld [smem:[#allocation4 + $0x3a]] }
  0xa9   : > { %v361_v52 = vadd.f32 %v360_v44, %v359_v36  ;;  %v368_v53 = vadd.f32 %v367_v45, %v366_v37  ;;  %v375_v54 = vadd.f32 %v374_v46, %v373_v38  ;;  %v382_v55 = vadd.f32 %v381_v47, %v380_v39  ;;  %3579 = sst [smem:[#allocation33_spill]] %s2909_s30  ;;  %s2933_s5 = sld [smem:[#allocation4 + $0x6]] }
  0xaa   : > { %v335_v56 = vadd.f32 %v334_v48, %v333_v40  ;;  %v342_v57 = vadd.f32 %v341_v49, %v340_v41  ;;  %v349_v58 = vadd.f32 %v348_v50, %v347_v42  ;;  %v356_v59 = vadd.f32 %v355_v51, %v354_v43  ;;  %3580 = sst [smem:[#allocation34_spill]] %s2911_s10  ;;  %s2935_s20 = sld [smem:[#allocation4 + $0x7]] }
  0xab   : > { %v362_v60 = vrot.slane %v361_v52, 1  ;;  %v369_v61 = vrot.slane %v368_v53, 1  ;;  %v376_v62 = vrot.slane %v375_v54, 1  ;;  %v383_v63 = vrot.slane %v382_v55, 1  ;;  %3581 = sst [smem:[#allocation35_spill]] %s2913_s11  ;;  %s2937_s23 = sld [smem:[#allocation4 + $0xf]] }
  0xac   : > { %v458_v0 = vsel %vm457_vm1, %v342_v57, %v335_v56  ;;  %vm461_vm3 = vcmask 1043459   ;;  %vm463_vm4 = vcmask 1044484   ;;  %vm465_vm5 = vcmask 1045509   ;;  %3582 = sst [smem:[#allocation36_spill]] %s2915_s17  ;;  %s2939_s22 = sld [smem:[#allocation4 + $0x19]] }
  0xad   : > { %v363_v1 = vadd.f32 %v362_v60, %v361_v52  ;;  %v370_v2 = vadd.f32 %v369_v61, %v368_v53  ;;  %v377_v7 = vadd.f32 %v376_v62, %v375_v54  ;;  %v460_v12 = vsel %vm459_vm2, %v349_v58, %v458_v0  ;;  %3583 = sst [smem:[#allocation37_spill]] %s2917_s9  ;;  %s2941_s7 = sld [smem:[#allocation4 + $0x10]] }
  0xae   : > { %vm467_vm6 = vcmask 1046534   ;;  %vm469_vm7 = vcmask 1047559   ;;  %v384_v13 = vadd.f32 %v383_v63, %v382_v55  ;;  %v462_v14 = vsel %vm461_vm3, %v356_v59, %v460_v12  ;;  %3584 = sst [smem:[#allocation38_spill]] %s2919_s13  ;;  %s2943_s24 = sld [smem:[#allocation4 + $0x1a]] }
  0xaf   : > { %v464_v15 = vsel %vm463_vm4, %v363_v1, %v462_v14  ;;  %v385_v20 = vmul.f32 %v2788_v3, %v2788_v3  ;;  %v386_v21 = vmul.f32 %v2790_v4, %v2790_v4  ;;  %v387_v22 = vmul.f32 %v2792_v5, %v2792_v5  ;;  %3585 = sst [smem:[#allocation39_spill]] %s2921_s27  ;;  %s2945_s28 = sld [smem:[#allocation4 + $0x22]] }
  0xb0   : > { %v466_v16 = vsel %vm465_vm5, %v370_v2, %v464_v15  ;;  %v388_v23 = vmul.f32 %v2794_v6, %v2794_v6  ;;  %v389_v24 = vmul.f32 %v2796_v8, %v2796_v8  ;;  %v390_v25 = vmul.f32 %v2798_v9, %v2798_v9  ;;  %3586 = sst [smem:[#allocation40_spill]] %s2923_s29  ;;  %s2947_s21 = sld [smem:[#allocation4 + $0x2b]] }
  0xb1   : > { %v468_v17 = vsel %vm467_vm6, %v377_v7, %v466_v16  ;;  %v391_v26 = vmul.f32 %v2800_v10, %v2800_v10  ;;  %v393_v27 = vsel %vm328_vm0, %v385_v20, 0.0  ;;  %v392_v28 = vmul.f32 %v2802_v11, %v2802_v11  ;;  %3587 = sst [smem:[#allocation41_spill]] %s2925_s0  ;;  %s2949_s6 = sld [smem:[#allocation4 + $0x23]] }
  0xb2   : > { %v470_v18 = vsel %vm469_vm7, %v384_v13, %v468_v17  ;;  %v394_v29 = vrot.slane %v393_v27, 4  ;;  %v400_v30 = vsel %vm328_vm0, %v386_v21, 0.0  ;;  %v407_v31 = vsel %vm328_vm0, %v387_v22, 0.0  ;;  %3588 = sst [smem:[#allocation42_spill]] %s2927_s1  ;;  %s2951_s8 = sld [smem:[#allocation4 + $0x2c]] }
  0xb3   : > { %v472_v19 = vsel %vm328_vm0, %v470_v18, 0.0  ;;  %v401_v32 = vrot.slane %v400_v30, 4  ;;  %v408_v33 = vrot.slane %v407_v31, 4  ;;  %v414_v34 = vsel %vm328_vm0, %v388_v23, 0.0  ;;  %3589 = sst [smem:[#allocation43_spill]] %s2929_s2  ;;  %s2953_s25 = sld [smem:[#allocation4 + $0x34]] }
  0xb4   : > { %473 = vadd.xlane.f32.xlu0 %v472_v19  ;;  %v421_v35 = vsel %vm328_vm0, %v389_v24, 0.0  ;;  %v395_v36 = vadd.f32 %v394_v29, %v393_v27  ;;  %v415_v37 = vrot.slane %v414_v34, 4  ;;  %v428_v39 = vsel %vm328_vm0, %v390_v25, 0.0  ;;  %3591 = sst [smem:[#allocation45_spill]] %s2933_s5  ;;  %s3617_s4 = sld [smem:[#allocation78_spill]] }
  0xb5   : > { %v422_v38 = vrot.slane %v421_v35, 4  ;;  %v402_v40 = vadd.f32 %v401_v32, %v400_v30  ;;  %v409_v41 = vadd.f32 %v408_v33, %v407_v31  ;;  %v429_v42 = vrot.slane %v428_v39, 4  ;;  %3592 = sst [smem:[#allocation46_spill]] %s2935_s20  ;;  %s2955_s19 = sld [smem:[#allocation4 + $0x3c]] }
  0xb6   : > { %v435_v43 = vsel %vm328_vm0, %v391_v26, 0.0  ;;  %v396_v44 = vrot.slane %v395_v36, 2  ;;  %v416_v45 = vadd.f32 %v415_v37, %v414_v34  ;;  %v442_v51 = vsel %vm328_vm0, %v392_v28, 0.0  ;;  %v2289_v37 = vld [vmem:[#allocation11 + $0x80] sm:$0xff]   ;;  %3593 = sst [smem:[#allocation47_spill]] %s2937_s23  ;;  %s2957_s23 = sld [smem:[#allocation4 + $0x35]] }
  0xb7   : > { %v423_v46 = vadd.f32 %v422_v38, %v421_v35  ;;  %v436_v47 = vrot.slane %v435_v43, 4  ;;  %v403_v48 = vrot.slane %v402_v40, 2  ;;  %v410_v49 = vrot.slane %v409_v41, 2  ;;  %v2290_v38 = vld [vmem:[#allocation11 + $0xc8] sm:$0xff]   ;;  %3594 = sst [smem:[#allocation48_spill]] %s2939_s22 }
  0xb8   : > { %v430_v50 = vadd.f32 %v429_v42, %v428_v39  ;;  %v397_v52 = vadd.f32 %v396_v44, %v395_v36  ;;  %v417_v53 = vrot.slane %v416_v45, 2  ;;  %v443_v59 = vrot.slane %v442_v51, 4  ;;  %v2288_v36 = vld [vmem:[#allocation11 + $0xc0] sm:$0xff]   ;;  %v2291_v39 = vld [vmem:[#allocation11 + $0x88] sm:$0xff]   ;;  %v2296_v44 = vld [vmem:[#allocation11 + $0xd8] sm:$0xff]   ;;  %3595 = sst [smem:[#allocation49_spill]] %s2941_s7 }
  0xb9   : > { %v424_v54 = vrot.slane %v423_v46, 2  ;;  %v437_v55 = vadd.f32 %v436_v47, %v435_v43  ;;  %v404_v56 = vadd.f32 %v403_v48, %v402_v40  ;;  %v411_v57 = vadd.f32 %v410_v49, %v409_v41  ;;  %2112 = vmatprep.subr.bf16.mxu1 %v2288_v36  ;;  %v2292_v40 = vld [vmem:[#allocation11 + $0xd0] sm:$0xff]   ;;  %v2294_v42 = vld [vmem:[#allocation11 + $0x40] sm:$0xff]   ;;  %v2299_v47 = vld [vmem:[#allocation11 + $0x8] sm:$0xff]   ;;  %3596 = sst [smem:[#allocation50_spill]] %s2943_s24  ;;  %s2959_s7 = sld [smem:[#allocation4 + $0x33]] }
  0xba   : > { %v431_v58 = vrot.slane %v430_v50, 2  ;;  %v398_v60 = vrot.slane %v397_v52, 1  ;;  %v418_v61 = vadd.f32 %v417_v53, %v416_v45  ;;  %v444_v7 = vadd.f32 %v443_v59, %v442_v51  ;;  %2113 = vmatpush3.bf16.msra.mxu1 %v2289_v37  ;;  %v2293_v41 = vld [vmem:[#allocation11 + $0x90] sm:$0xff]   ;;  %v2295_v43 = vld [vmem:[#allocation11] sm:$0xff]   ;;  %2090 = vmatprep.subr.bf16.mxu0 %v2294_v42  ;;  %v2297_v48 = vld [vmem:[#allocation11 + $0x98] sm:$0xff]   ;;  %3597 = sst [smem:[#allocation51_spill]] %s2945_s28 }
  0xbb   : > { %v425_v62 = vadd.f32 %v424_v54, %v423_v46  ;;  %v438_v63 = vrot.slane %v437_v55, 2  ;;  %v405_v0 = vrot.slane %v404_v56, 1  ;;  %v412_v1 = vrot.slane %v411_v57, 1  ;;  %2114 = vmatprep.subr.bf16.mxu1 %v2290_v38  ;;  %v2298_v46 = vld [vmem:[#allocation11 + $0x48] sm:$0xff]   ;;  %2091 = vmatpush3.bf16.msra.mxu0 %v2295_v43  ;;  %v2302_v49 = vld [vmem:[#allocation11 + $0x50] sm:$0xff]   ;;  %v2306_v53 = vld [vmem:[#allocation11 + $0x58] sm:$0xff]  }
  0xbc   : > { %v432_v2 = vadd.f32 %v431_v58, %v430_v50  ;;  %v399_v12 = vadd.f32 %v398_v60, %v397_v52  ;;  %v419_v13 = vrot.slane %v418_v61, 1  ;;  %v445_v19 = vrot.slane %v444_v7, 2  ;;  %2092 = vmatprep.subr.bf16.mxu0 %v2298_v46  ;;  %v2300_v50 = vld [vmem:[#allocation11 + $0xe0] sm:$0xff]   ;;  %v2303_v51 = vld [vmem:[#allocation11 + $0x10] sm:$0xff]   ;;  %v2304_v54 = vld [vmem:[#allocation11 + $0xe8] sm:$0xff]   ;;  %3598 = sst [smem:[#allocation52_spill]] %s2947_s21 }
  0xbd   : > { %v426_v14 = vrot.slane %v425_v62, 1  ;;  %v439_v15 = vadd.f32 %v438_v63, %v437_v55  ;;  %v406_v16 = vadd.f32 %v405_v0, %v404_v56  ;;  %v413_v17 = vadd.f32 %v412_v1, %v411_v57  ;;  %v2301_v52 = vld [vmem:[#allocation11 + $0xa0] sm:$0xff]   ;;  %v2307_v55 = vld [vmem:[#allocation11 + $0x18] sm:$0xff]   ;;  %v2305_v56 = vld [vmem:[#allocation11 + $0xa8] sm:$0xff]   ;;  %3599 = sst [smem:[#allocation53_spill]] %s2949_s6  ;;  %s2961_s28 = sld [smem:[#allocation4 + $0x3b]] }
  0xbe   : > { %v433_v18 = vrot.slane %v432_v2, 1  ;;  %v420_v20 = vadd.f32 %v419_v13, %v418_v61  ;;  %v446_v24 = vadd.f32 %v445_v19, %v444_v7  ;;  %2115 = vmatpush3.bf16.msra.mxu1 %v2291_v39  ;;  %v2547_v45 = vmov 0.0   ;;  %v2310_v57 = vld [vmem:[#allocation11 + $0x60] sm:$0xff]   ;;  %v2308_v58 = vld [vmem:[#allocation11 + $0xf0] sm:$0xff]   ;;  %v2314_v61 = vld [vmem:[#allocation11 + $0x68] sm:$0xff]   ;;  %3600 = sst [smem:[#allocation54_spill]] %s2951_s8 }
  0xbf   : > { %v427_v21 = vadd.f32 %v426_v14, %v425_v62  ;;  %v440_v22 = vrot.slane %v439_v15, 1  ;;  %v483_v25 = vsel %vm457_vm1, %v406_v16, %v399_v12  ;;  %638 = vst [vmem:[#allocation3 + $0x8] sm:$0xff] %v2547_v45  ;;  %637 = vst [vmem:[#allocation3] sm:$0xff] %v2547_v45  ;;  %2116 = vmatprep.subr.bf16.mxu1 %v2292_v40  ;;  %2093 = vmatpush3.bf16.msra.mxu0 %v2299_v47  ;;  %v2311_v59 = vld [vmem:[#allocation11 + $0x20] sm:$0xff]   ;;  %v2309_v60 = vld [vmem:[#allocation11 + $0xb0] sm:$0xff]   ;;  %3601 = sst [smem:[#allocation55_spill]] %s2953_s25 }
  0xc0   : > { %v434_v23 = vadd.f32 %v433_v18, %v432_v2  ;;  %v484_v27 = vsel %vm459_vm2, %v413_v17, %v483_v25  ;;  %v447_v28 = vrot.slane %v446_v24, 1  ;;  %639 = vst [vmem:[#allocation3 + $0x10] sm:$0xff] %v2547_v45  ;;  %640 = vst [vmem:[#allocation3 + $0x18] sm:$0xff] %v2547_v45  ;;  %2094 = vmatprep.subr.bf16.mxu0 %v2302_v49  ;;  %v2312_v62 = vld [vmem:[#allocation11 + $0xf8] sm:$0xff]   ;;  %v2315_v63 = vld [vmem:[#allocation11 + $0x28] sm:$0xff]   ;;  %3602 = sst [smem:[#allocation56_spill]] %s2955_s19 }
  0xc1   : > { %v441_v26 = vadd.f32 %v440_v22, %v439_v15  ;;  %v485_v29 = vsel %vm461_vm3, %v420_v20, %v484_v27  ;;  %641 = vst [vmem:[#allocation3 + $0x20] sm:$0xff] %v2547_v45  ;;  %642 = vst [vmem:[#allocation3 + $0x28] sm:$0xff] %v2547_v45  ;;  %v2313_v0 = vld [vmem:[#allocation11 + $0xb8] sm:$0xff]   ;;  %v2316_v2 = vld [vmem:[#allocation11 + $0x1c0] sm:$0xff]   ;;  %3603 = sst [smem:[#allocation57_spill]] %s2957_s23  ;;  %s2965_s6 = sld [smem:[#allocation4 + $0x9]] }
  0xc2   : > { %v486_v30 = vsel %vm463_vm4, %v427_v21, %v485_v29  ;;  %v448_v31 = vadd.f32 %v447_v28, %v446_v24  ;;  %643 = vst [vmem:[#allocation3 + $0x30] sm:$0xff] %v2547_v45  ;;  %644 = vst [vmem:[#allocation3 + $0x38] sm:$0xff] %v2547_v45  ;;  %2117 = vmatpush3.bf16.msra.mxu1 %v2293_v41  ;;  %v327_v1 = vld [vmem:[#allocation9] sm:$0xff]  ;;  %v2326_v46 = vld [vmem:[#allocation11 + $0x140] sm:$0xff]   ;;  %3604 = sst [smem:[#allocation58_spill]] %s2959_s7  ;;  %s2963_s21 = sld [smem:[#allocation4 + $0x8]] }
  0xc3   : > { %v487_v32 = vsel %vm465_vm5, %v434_v23, %v486_v30  ;;  %645 = vst [vmem:[#allocation3 + $0x40] sm:$0xff] %v2547_v45  ;;  %2118 = vmatprep.subr.bf16.mxu1 %v2296_v44  ;;  %2095 = vmatpush3.bf16.msra.mxu0 %v2303_v51  ;;  %v501_v7 = vmul.f32 %v2790_v4, %v327_v1  ;;  %v2323_v41 = vld [vmem:[#allocation11 + $0x38] sm:$0xff]   ;;  %3605 = sst [smem:[#allocation59_spill]] %s2961_s28  ;;  %s2969_s25 = sld [smem:[#allocation4 + $0xb]] }
  0xc4   : > { %v488_v33 = vsel %vm467_vm6, %v441_v26, %v487_v32  ;;  %2096 = vmatprep.subr.bf16.mxu0 %v2306_v53  ;;  %v502_v12 = vmul.f32 %v2792_v5, %v327_v1  ;;  %v503_v13 = vmul.f32 %v2794_v6, %v327_v1  ;;  %v500_v14 = vmul.f32 %v2788_v3, %v327_v1  ;;  %s2967_s24 = sld [smem:[#allocation4 + $0xa]]  ;;  %s2973_s23 = sld [smem:[#allocation4 + $0x1c]] }
  0xc5   : > { %v489_v34 = vsel %vm469_vm7, %v448_v31, %v488_v33  ;;  %v504_v15 = vmul.f32 %v2796_v8, %v327_v1  ;;  %v505_v16 = vmul.f32 %v2798_v9, %v327_v1  ;;  %v506_v17 = vmul.f32 %v2800_v10, %v327_v1  ;;  %v2318_v33 = vld [vmem:[#allocation11 + $0x70] sm:$0xff]   ;;  %s2971_s19 = sld [smem:[#allocation4 + $0x12]]  ;;  %s2975_s7 = sld [smem:[#allocation4 + $0x13]] }
  0xc6   : > { %v491_v35 = vsel %vm328_vm0, %v489_v34, 0.0  ;;  %2119 = vmatpush3.bf16.msra.mxu1 %v2297_v48  ;;  %v507_v18 = vmul.f32 %v2802_v11, %v327_v1  ;;  %v515_v19 = vsel %vm328_vm0, %v501_v7, 0.0  ;;  %v522_v20 = vsel %vm328_vm0, %v502_v12, 0.0  ;;  %v2319_v34 = vld [vmem:[#allocation11 + $0x30] sm:$0xff]   ;;  %v1914_v12 = vld [vmem:[%s3572_s3] ss:$0 sm:$0xff] }
  0xc7   : > { %492 = vadd.xlane.f32.xlu0 %v491_v35  ;;  %2120 = vmatprep.subr.bf16.mxu1 %v2300_v50  ;;  %v529_v4 = vsel %vm328_vm0, %v503_v13, 0.0  ;;  %v508_v5 = vsel %vm328_vm0, %v500_v14, 0.0  ;;  %v536_v6 = vsel %vm328_vm0, %v504_v15, 0.0  ;;  %v543_v3 = vsel %vm328_vm0, %v505_v16, 0.0  ;;  %v2322_v35 = vld [vmem:[#allocation11 + $0x78] sm:$0xff]   ;;  %s2931_s3 = sld [smem:[#allocation4 + $0x5]] }
  0xc8   : > { %2097 = vmatpush3.bf16.msra.mxu0 %v2307_v55  ;;  %v516_v21 = vrot.slane %v515_v19, 4  ;;  %v523_v8 = vrot.slane %v522_v20, 4  ;;  %v530_v22 = vrot.slane %v529_v4, 4  ;;  %v550_v9 = vsel %vm328_vm0, %v506_v17, 0.0  ;;  %3606 = sst [smem:[#allocation60_spill]] %s2965_s6  ;;  %s2977_s8 = sld [smem:[#allocation4 + $0x1d]] }
  0xc9   : > { %2098 = vmatprep.subr.bf16.mxu0 %v2310_v57  ;;  %v557_v10 = vsel %vm328_vm0, %v507_v18, 0.0  ;;  %v509_v11 = vrot.slane %v508_v5, 4  ;;  %v537_v23 = vrot.slane %v536_v6, 4  ;;  %v544_v24 = vrot.slane %v543_v3, 4  ;;  %3608 = sst [smem:[#allocation62_spill]] %s2969_s25  ;;  %s2979_s28 = sld [smem:[#allocation4 + $0x14]] }
  0xca   : > { %2121 = vmatpush3.bf16.msra.mxu1 %v2301_v52  ;;  %v551_v25 = vrot.slane %v550_v9, 4  ;;  %v558_v26 = vrot.slane %v557_v10, 4  ;;  %v517_v27 = vadd.f32 %v516_v21, %v515_v19  ;;  %v524_v28 = vadd.f32 %v523_v8, %v522_v20  ;;  %3607 = sst [smem:[#allocation61_spill]] %s2967_s24  ;;  %s2981_s6 = sld [smem:[#allocation4 + $0x1e]] }
  0xcb   : > { %2122 = vmatprep.subr.bf16.mxu1 %v2304_v54  ;;  %v531_v29 = vadd.f32 %v530_v22, %v529_v4  ;;  %v510_v30 = vadd.f32 %v509_v11, %v508_v5  ;;  %v538_v31 = vadd.f32 %v537_v23, %v536_v6  ;;  %v545_v32 = vadd.f32 %v544_v24, %v543_v3  ;;  %3609 = sst [smem:[#allocation63_spill]] %s2971_s19  ;;  %s2985_s25 = sld [smem:[#allocation4 + $0x2f]] }
  0xcc   : > { %2099 = vmatpush3.bf16.msra.mxu0 %v2311_v59  ;;  %v552_v36 = vadd.f32 %v551_v25, %v550_v9  ;;  %v559_v37 = vadd.f32 %v558_v26, %v557_v10  ;;  %v518_v38 = vrot.slane %v517_v27, 2  ;;  %v525_v39 = vrot.slane %v524_v28, 2  ;;  %3610 = sst [smem:[#allocation64_spill]] %s2973_s23  ;;  %s2983_s24 = sld [smem:[#allocation4 + $0x26]] }
  0xcd   : > { %2100 = vmatprep.subr.bf16.mxu0 %v2314_v61  ;;  %v532_v40 = vrot.slane %v531_v29, 2  ;;  %v511_v42 = vrot.slane %v510_v30, 2  ;;  %v539_v43 = vrot.slane %v538_v31, 2  ;;  %v546_v44 = vrot.slane %v545_v32, 2  ;;  %3590 = sst [smem:[#allocation44_spill]] %s2931_s3  ;;  %s2990_s23 = sld [smem:[#allocation4 + $0x27]] }
  0xce   : > { %2123 = vmatpush3.bf16.msra.mxu1 %v2305_v56  ;;  %v553_v47 = vrot.slane %v552_v36, 2  ;;  %v560_v48 = vrot.slane %v559_v37, 2  ;;  %v526_v49 = vadd.f32 %v525_v39, %v524_v28  ;;  %v519_v50 = vadd.f32 %v518_v38, %v517_v27  ;;  %3611 = sst [smem:[#allocation65_spill]] %s2975_s7 }
  0xcf   : > { %2124 = vmatprep.subr.bf16.mxu1 %v2308_v58  ;;  %v533_v51 = vadd.f32 %v532_v40, %v531_v29  ;;  %v540_v52 = vadd.f32 %v539_v43, %v538_v31  ;;  %v512_v53 = vadd.f32 %v511_v42, %v510_v30  ;;  %v547_v54 = vadd.f32 %v546_v44, %v545_v32  ;;  %3612 = sst [smem:[#allocation66_spill]] %s2977_s8  ;;  %s2992_s7 = sld [smem:[#allocation4 + $0x30]] }
  0xd0   : > { %2101 = vmatpush3.bf16.msra.mxu0 %v2315_v63  ;;  %v554_v55 = vadd.f32 %v553_v47, %v552_v36  ;;  %v561_v56 = vadd.f32 %v560_v48, %v559_v37  ;;  %v520_v57 = vrot.slane %v519_v50, 1  ;;  %v527_v58 = vrot.slane %v526_v49, 1  ;;  %3613 = sst [smem:[#allocation67_spill]] %s2979_s28  ;;  %s3009_s28 = sld [smem:[#allocation4 + $0x11]] }
  0xd1   : > { %2102 = vmatprep.subr.bf16.mxu0 %v2318_v33  ;;  %v534_v59 = vrot.slane %v533_v51, 1  ;;  %v541_v61 = vrot.slane %v540_v52, 1  ;;  %3614 = sst [smem:[#allocation68_spill]] %s2985_s25  ;;  %s3001_s25 = sld [smem:[#allocation4 + $0x38]] }
  0xd2   : > { %2125 = vmatpush3.bf16.msra.mxu1 %v2309_v60  ;;  %v513_v60 = vrot.slane %v512_v53, 1  ;;  %v555_v63 = vrot.slane %v554_v55, 1  ;;  %v521_v1 = vadd.f32 %v520_v57, %v519_v50  ;;  %v661_v57 = vstv %s2899_s16  ;;  %s3011_s8 = sld [smem:[#allocation4 + $0x1b]]  ;;  %s3033_s16 = sld [smem:[#allocation4 + $0x36]] }
  0xd3   : > { %2126 = vmatprep.subr.bf16.mxu1 %v2312_v62  ;;  %v548_v62 = vrot.slane %v547_v54, 1  ;;  %v535_v7 = vadd.f32 %v534_v59, %v533_v51  ;;  %v542_v15 = vadd.f32 %v541_v61, %v540_v52  ;;  %3615 = sst [smem:[#allocation69_spill]] %s2990_s23  ;;  %v1915_v59 = vld [vmem:[%s3617_s4] ss:$0 sm:$0xff]  ;;  %v676_v61 = vstv %s2905_s18  ;;  %s3618_s4 = sld [smem:[#allocation47_spill]] }
  0xd4   : > { %2103 = vmatpush3.bf16.msra.mxu0 %v2319_v34  ;;  %v514_v14 = vadd.f32 %v513_v60, %v512_v53  ;;  %v556_v18 = vadd.f32 %v555_v63, %v554_v55  ;;  %v565_v4 = vmul.f32 0.125, %v521_v1  ;;  %v671_v60 = vstv %s2903_s15  ;;  %s3624_s18 = sld [smem:[#allocation53_spill]]  ;;  %s3025_s15 = sld [smem:[#allocation4 + $0x25]] }
  0xd5   : > { %2104 = vmatprep.subr.bf16.mxu0 %v2322_v35  ;;  %v549_v16 = vadd.f32 %v548_v62, %v547_v54  ;;  %v567_v6 = vmul.f32 0.125, %v535_v7  ;;  %v568_v21 = vmul.f32 0.125, %v542_v15  ;;  %3616 = sst [smem:[#allocation70_spill]] %s2992_s7  ;;  %v739_v62 = vstv %s2907_s26  ;;  %s3017_s26 = sld [smem:[#allocation4 + $0x24]] }
  0xd6   : > { %2127 = vmatpush3.bf16.msra.mxu1 %v2313_v0  ;;  %v562_v0 = vrot.slane %v561_v56, 1  ;;  %v564_v3 = vmul.f32 0.125, %v514_v14  ;;  %v570_v23 = vmul.f32 0.125, %v556_v18  ;;  %v743_v63 = vstv %s2909_s30  ;;  %s3619_s30 = sld [smem:[#allocation49_spill]] }
  0xd7   : > { %2156 = vmatprep.subr.bf16.mxu1 %v2316_v2  ;;  %v528_v2 = vadd.f32 %v527_v58, %v526_v49  ;;  %v569_v8 = vmul.f32 0.125, %v549_v16  ;;  %v666_v58 = vstv %s2901_s12  ;;  %s3003_s12 = sld [smem:[#allocation4 + $0x40]]  ;;  %v752_v1 = vstv %s2913_s11  ;;  %s3019_s11 = sld [smem:[#allocation4 + $0x2d]] }
  0xd8   : > { %2105 = vmatpush3.bf16.msra.mxu0 %v2323_v41  ;;  %v563_v19 = vadd.f32 %v562_v0, %v561_v56  ;;  %v656_v56 = vstv %s2897_s14  ;;  %v748_v0 = vstv %s2911_s10  ;;  %v761_v7 = vstv %s2917_s9  ;;  %s3620_s10 = sld [smem:[#allocation50_spill]]  ;;  %s3622_s9 = sld [smem:[#allocation51_spill]] }
  0xd9   : > { %2134 = vmatprep.subr.bf16.mxu0 %v2326_v46  ;;  %v566_v5 = vmul.f32 0.125, %v528_v2  ;;  %v757_v2 = vstv %s2915_s17  ;;  %v833_v14 = vstv %s2921_s27  ;;  %v838_v15 = vstv %s2923_s29  ;;  %s3623_s17 = sld [smem:[#allocation52_spill]]  ;;  %s3027_s27 = sld [smem:[#allocation4 + $0x2e]] }
  0xda   : > { %v571_v24 = vmul.f32 0.125, %v563_v19  ;;  %v842_v16 = vstv %s2925_s0  ;;  %v910_v18 = vstv %s2927_s1  ;;  %v914_v19 = vstv %s2929_s2  ;;  %3625 = sst [smem:[#allocation52_spill]] %s3025_s15  ;;  %s3628_s0 = sld [smem:[#allocation55_spill]] }
  0xdb   : > { %s3629_s29 = sld [smem:[#allocation56_spill]]  ;;  %s3631_s14 = sld [smem:[#allocation57_spill]] }
  0xdc   : > { %3630 = sst [smem:[#allocation72_spill]] %s3033_s16  ;;  %s3633_s2 = sld [smem:[#allocation58_spill]] }
  0xdd   : > { %3621 = sst [smem:[#allocation71_spill]] %s3019_s11  ;;  %s3634_s1 = sld [smem:[#allocation59_spill]] }
  0xde   : > { %s3035_s11 = sld [smem:[#allocation4 + $0x3e]]  ;;  %s3040_s15 = sld [smem:[#allocation4 + $0x37]] }
  0xdf   : > { %3627 = sst [smem:[#allocation53_spill]] %s3027_s27  ;;  %s3643_s16 = sld [smem:[#allocation67_spill]] }
  0xe0   : > { %s3636_s27 = sld [smem:[#allocation61_spill]]  ;;  %s3083_s7 = sld [smem:[#allocation4 + $0x28]] }
  0xe4   : > { %3632 = sst [smem:[#allocation73_spill]] %s3035_s11  ;;  %s3642_s11 = sld [smem:[#allocation66_spill]] }
  0xe5   : > { %3637 = sst [smem:[#allocation59_spill]] %s3040_s15  ;;  %s2549_s15 = smov [#allocation12]  }
 0x141   : > { %v474_v13 = vpop.xlane.xlu0 %473 }
 0x142   : > { %v494_v17 = vmul.f32 0.00390625, %v474_v13  ;;  %v829_v13 = vstv %s2919_s13  ;;  %s3626_s13 = sld [smem:[#allocation54_spill]] }
 0x144   : > { %v579_v20 = vmul.f32 %v1914_v12, %v494_v17  ;;  %v496_v52 = vmul.f32 %v494_v17, %v494_v17 }
 0x146   : > { %v581_v22 = vrot.slane %v579_v20, 1  ;;  %v582_v9 = vrot.slane %v579_v20, 2  ;;  %v583_v10 = vrot.slane %v579_v20, 3  ;;  %v584_v11 = vrot.slane %v579_v20, 4 }
 0x147   : > { %v585_v25 = vrot.slane %v579_v20, 5  ;;  %v586_v26 = vrot.slane %v579_v20, 6  ;;  %v587_v27 = vrot.slane %v579_v20, 7  ;;  %v596_v32 = vsub.f32 %v564_v3, %v579_v20 }
 0x148   : > { %v597_v28 = vsub.f32 %v565_v4, %v581_v22  ;;  %v598_v29 = vsub.f32 %v566_v5, %v582_v9  ;;  %v599_v30 = vsub.f32 %v567_v6, %v583_v10  ;;  %v600_v31 = vsub.f32 %v568_v21, %v584_v11 }
 0x149   : > { %v601_v33 = vsub.f32 %v569_v8, %v585_v25  ;;  %v602_v36 = vsub.f32 %v570_v23, %v586_v26  ;;  %v603_v37 = vsub.f32 %v571_v24, %v587_v27  ;;  %v681_v20 = vstv %s2931_s3  ;;  %s3635_s3 = sld [smem:[#allocation60_spill]] }
 0x14a   : > { %v612_v34 = vrot.slane %v597_v28, 7  ;;  %v614_v35 = vrot.slane %v598_v29, 6  ;;  %v616_v39 = vrot.slane %v599_v30, 5  ;;  %v618_v41 = vrot.slane %v600_v31, 4 }
 0x14b   : > { %v620_v43 = vrot.slane %v601_v33, 3  ;;  %v622_v46 = vrot.slane %v602_v36, 2  ;;  %v624_v48 = vrot.slane %v603_v37, 1  ;;  %v686_v4 = vstv %s2933_s5  ;;  %s3641_s5 = sld [smem:[#allocation65_spill]] }
 0x14c   : > { %v613_v38 = vsel %vm457_vm1, %v612_v34, %v596_v32  ;;  %v691_v5 = vstv %s2935_s20  ;;  %v766_v6 = vstv %s3618_s4  ;;  %v770_v3 = vstv %s2939_s22  ;;  %s3638_s20 = sld [smem:[#allocation62_spill]]  ;;  %s3042_s4 = sld [smem:[#allocation4 + $0x3f]] }
 0x14d   : > { %v615_v40 = vsel %vm459_vm2, %v614_v35, %v613_v38  ;;  %v775_v8 = vstv %s3619_s30  ;;  %v779_v22 = vstv %s3620_s10  ;;  %v847_v9 = vstv %s3622_s9  ;;  %s3640_s22 = sld [smem:[#allocation64_spill]]  ;;  %s3048_s30 = sld [smem:[#allocation4 + $0x3d]] }
 0x14e   : > { %v617_v42 = vsel %vm461_vm3, %v616_v39, %v615_v40  ;;  %v851_v10 = vstv %s3623_s17  ;;  %v856_v11 = vstv %s3624_s18  ;;  %v860_v23 = vstv %s3626_s13  ;;  %s3050_s10 = sld [smem:[#allocation4 + $0x15]]  ;;  %s3646_s9 = sld [smem:[#allocation68_spill]] }
 0x14f   : > { %v619_v44 = vsel %vm463_vm4, %v618_v41, %v617_v42  ;;  %v928_v24 = vstv %s3628_s0  ;;  %v932_v25 = vstv %s3629_s29  ;;  %v937_v26 = vstv %s3631_s14  ;;  %s3647_s0 = sld [smem:[#allocation71_spill]]  ;;  %s3648_s13 = sld [smem:[#allocation52_spill]] }
 0x150   : > { %v621_v47 = vsel %vm465_vm5, %v620_v43, %v619_v44  ;;  %v919_v27 = vstv %s3633_s2  ;;  %v923_v28 = vstv %s3634_s1  ;;  %v696_v29 = vstv %s2963_s21  ;;  %s3332_s21 = sld [smem:[#allocation4 + $0x31]]  ;;  %s2469_s18 = sshll.u32 %s2549_s15, 4  ;;  %s2470_s18 = int_to_ptr.vmem [resolvable:$false] %s2469_s18 }
 0x151   : > { %v623_v49 = vsel %vm467_vm6, %v622_v46, %v621_v47  ;;  %v701_v30 = vstv %s3635_s3  ;;  %v706_v31 = vstv %s3636_s27  ;;  %v793_v33 = vstv %s2971_s19  ;;  %s3688_s3 = sld [smem:[#allocation70_spill]]  ;;  %s2471_s17 = scalar_lea.vmem %s2470_s18, 256 }
 0x152   : > { %v2895_v50 = vsel %vm469_vm7, %v624_v48, %v623_v49  ;;  %3639 = sst [smem:[#allocation60_spill]] %s3042_s4  ;;  %v711_v32 = vstv %s3638_s20  ;;  %v802_v35 = vstv %s3641_s5  ;;  %v806_v36 = vstv %s3642_s11  ;;  %s3716_s11 = sld [smem:[#allocation80_spill]] }
 0x153   : > { %3644 = sst [smem:[#allocation61_spill]] %s3048_s30  ;;  %v797_v34 = vstv %s3640_s22  ;;  %v811_v37 = vstv %s3643_s16  ;;  %v815_v38 = vstv %s2981_s6  ;;  %v883_v39 = vstv %s2983_s24  ;;  %s3073_s22 = sld [smem:[#allocation4 + $0x1f]] }
 0x154   : > { %v493_v51 = vpop.xlane.xlu0 %492  ;;  %3645 = sst [smem:[#allocation62_spill]] %s3050_s10  ;;  %v887_v40 = vstv %s3646_s9  ;;  %v892_v41 = vstv %s2990_s23  ;;  %s3694_s6 = sld [smem:[#allocation53_spill]] }
 0x155   : > { %v495_v53 = vmul.f32 0.00390625, %v493_v51  ;;  %s3697_s24 = sld [smem:[#allocation72_spill]]  ;;  %s3703_s9 = sld [smem:[#allocation61_spill]] }
 0x156   : > { %s3704_s27 = sld [smem:[#allocation62_spill]] }
 0x157   : > { %v497_v54 = vsub.f32 %v495_v53, %v496_v52 }
 0x159   : > { %v498_v55 = vadd.f32 1e-05, %v497_v54 }
 0x15b   : > { %2360 = vrsqrt.f32 %v498_v55 }
 0x165   : > { %v2361_v12 = vpop.eup %2360 }
 0x166   : > { %v627_v17 = vmul.f32 %v2361_v12, %v2895_v50 }
 0x168   : > { %v635_v21 = vadd.f32 %v1915_v59, %v627_v17 }
 0x16a   : > { %636 = vst.msk [vmem:[#allocation2] sm:$0xff] %vm328_vm0, %v635_v21 }
 0x171   : > { %v3085_v54 = vld [vmem:[#allocation2] sm:$0xff] }
 0x172   : > { %vm657_vm8 = vcmp.ge.f32.partialorder %v3085_v54, %v656_v56  ;;  %vm662_vm9 = vcmp.ge.f32.partialorder %v3085_v54, %v661_v57  ;;  %vm667_vm10 = vcmp.ge.f32.partialorder %v3085_v54, %v666_v58  ;;  %vm672_vm11 = vcmp.ge.f32.partialorder %v3085_v54, %v671_v60 }
 0x173   : > { %v1917_v21 = vsel %vm657_vm8, 1.0, %v2547_v45  ;;  %v1919_v17 = vsel %vm662_vm9, 1.0, %v2547_v45  ;;  %v1921_v12 = vsel %vm667_vm10, 1.0, %v2547_v45  ;;  %v1923_v55 = vsel %vm672_vm11, 1.0, %v2547_v45 }
 0x174   : > { %vm677_vm12 = vcmp.ge.f32.partialorder %v3085_v54, %v676_v61  ;;  %v715_v59 = vsub.f32 %v1917_v21, %v1919_v17  ;;  %v716_v53 = vsub.f32 %v1919_v17, %v1921_v12  ;;  %v717_v52 = vsub.f32 %v1921_v12, %v1923_v55 }
 0x175   : > { %v1925_v51 = vsel %vm677_vm12, 1.0, %v2547_v45  ;;  %v726_v50 = vsub.f32 %v3085_v54, %v656_v56  ;;  %v3117_v49 = vsub.f32 %v3085_v54, %v661_v57  ;;  %v3122_v44 = vsub.f32 %v3085_v54, %v666_v58 }
 0x176   : > { %v718_v48 = vsub.f32 %v1923_v55, %v1925_v51  ;;  %v3127_v17 = vsub.f32 %v3085_v54, %v671_v60  ;;  %v3132_v12 = vsub.f32 %v3085_v54, %v676_v61  ;;  %vm682_vm13 = vcmp.ge.f32.partialorder %v3085_v54, %v681_v20 }
 0x177   : > { %v740_v56 = vmul.f32 %v739_v62, %v726_v50  ;;  %v744_v57 = vmul.f32 %v743_v63, %v3122_v44  ;;  %v749_v58 = vmul.f32 %v748_v0, %v3117_v49  ;;  %v758_v60 = vmul.f32 %v757_v2, %v3122_v44 }
 0x178   : > { %v753_v61 = vmul.f32 %v752_v1, %v3127_v17  ;;  %v762_v55 = vmul.f32 %v761_v7, %v3132_v12  ;;  %v830_v2 = vmul.f32 %v829_v13, %v726_v50  ;;  %v834_v1 = vmul.f32 %v833_v14, %v3127_v17 }
 0x179   : > { %v741_v63 = vmul.f32 %v740_v56, %v715_v59  ;;  %v745_v21 = vmul.f32 %v744_v57, %v716_v53  ;;  %v750_v0 = vmul.f32 %v749_v58, %v716_v53  ;;  %v759_v47 = vmul.f32 %v758_v60, %v717_v52 }
 0x17a   : > { %v754_v43 = vmul.f32 %v753_v61, %v717_v52  ;;  %v763_v46 = vmul.f32 %v762_v55, %v718_v48  ;;  %v839_v7 = vmul.f32 %v838_v15, %v3117_v49  ;;  %v843_v62 = vmul.f32 %v842_v16, %v3132_v12 }
 0x17b   : > { %v746_v42 = vsub.f32 %v741_v63, %v745_v21  ;;  %v1927_v59 = vsel %vm682_vm13, 1.0, %v2547_v45  ;;  %vm687_vm14 = vcmp.ge.f32.partialorder %v3085_v54, %v686_v4  ;;  %vm692_vm15 = vcmp.ge.f32.partialorder %v3085_v54, %v691_v5 }
 0x17c   : > { %v755_v53 = vsub.f32 %v750_v0, %v754_v43  ;;  %v764_v52 = vsub.f32 %v759_v47, %v763_v46  ;;  %v911_v14 = vmul.f32 %v910_v18, %v726_v50  ;;  %v1929_v15 = vsel %vm687_vm14, 1.0, %v2547_v45 }
 0x17d   : > { %v831_v13 = vmul.f32 %v830_v2, %v746_v42  ;;  %v1931_v16 = vsel %vm692_vm15, 1.0, %v2547_v45  ;;  %v719_v21 = vsub.f32 %v1925_v51, %v1927_v59  ;;  %v915_v56 = vmul.f32 %v914_v19, %v3132_v12 }
 0x17e   : > { %v835_v43 = vmul.f32 %v834_v1, %v755_v53  ;;  %v840_v46 = vmul.f32 %v839_v7, %v755_v53  ;;  %v844_v47 = vmul.f32 %v843_v62, %v764_v52  ;;  %v3181_v57 = vsub.f32 %v1927_v59, %v1929_v15 }
 0x17f   : > { %v3186_v18 = vsub.f32 %v3085_v54, %v681_v20  ;;  %v3191_v42 = vsub.f32 %v3085_v54, %v686_v4  ;;  %v767_v51 = vmul.f32 %v766_v6, %v3127_v17  ;;  %v776_v19 = vmul.f32 %v775_v8, %v3132_v12 }
 0x180   : > { %v836_v50 = vsub.f32 %v831_v13, %v835_v43  ;;  %v845_v58 = vsub.f32 %v840_v46, %v844_v47  ;;  %v3199_v60 = vsub.f32 %v1929_v15, %v1931_v16  ;;  %v848_v61 = vmul.f32 %v847_v9, %v3122_v44 }
 0x181   : > { %v771_v20 = vmul.f32 %v770_v3, %v3186_v18  ;;  %v780_v4 = vmul.f32 %v779_v22, %v3191_v42  ;;  %v768_v62 = vmul.f32 %v767_v51, %v718_v48  ;;  %v777_v8 = vmul.f32 %v776_v19, %v719_v21 }
 0x182   : > { %v912_v55 = vmul.f32 %v911_v14, %v836_v50  ;;  %v916_v6 = vmul.f32 %v915_v56, %v845_v58  ;;  %v3213_v63 = vsub.f32 %v3085_v54, %v691_v5  ;;  %v852_v0 = vmul.f32 %v851_v10, %v3186_v18 }
 0x183   : > { %v772_v3 = vmul.f32 %v771_v20, %v719_v21  ;;  %v781_v22 = vmul.f32 %v780_v4, %v3181_v57  ;;  %v849_v2 = vmul.f32 %v848_v61, %v764_v52  ;;  %v857_v48 = vmul.f32 %v856_v11, %v3127_v17 }
 0x184   : > { %v917_v9 = vsub.f32 %v912_v55, %v916_v6  ;;  %v861_v1 = vmul.f32 %v860_v23, %v3191_v42  ;;  %v929_v59 = vmul.f32 %v928_v24, %v3122_v44  ;;  %v933_v53 = vmul.f32 %v932_v25, %v3191_v42 }
 0x185   : > { %v773_v7 = vsub.f32 %v768_v62, %v772_v3  ;;  %v3225_v5 = vsub.f32 %v777_v8, %v781_v22  ;;  %v938_v10 = vmul.f32 %v937_v26, %v3127_v17  ;;  %vm697_vm1 = vcmp.ge.f32.partialorder %v3085_v54, %v696_v29 }
 0x186   : > { %981 = vst.msk [vmem:[#allocation3 + $0x8] sm:$0xff] %vm328_vm0, %v917_v9  ;;  %vm702_vm2 = vcmp.ge.f32.partialorder %v3085_v54, %v701_v30  ;;  %vm707_vm3 = vcmp.ge.f32.partialorder %v3085_v54, %v706_v31  ;;  %v920_v25 = vmul.f32 %v919_v27, %v3117_v49  ;;  %v1933_v44 = vsel %vm697_vm1, 1.0, %v2547_v45 }
 0x187   : > { %v853_v11 = vmul.f32 %v852_v0, %v773_v7  ;;  %v858_v23 = vmul.f32 %v857_v48, %v773_v7  ;;  %v862_v24 = vmul.f32 %v861_v1, %v3225_v5  ;;  %v1935_v26 = vsel %vm702_vm2, 1.0, %v2547_v45 }
 0x188   : > { %v3253_v17 = vsel %vm707_vm3, 1.0, %v2547_v45  ;;  %vm712_vm4 = vcmp.ge.f32.partialorder %v3085_v54, %v711_v32  ;;  %v921_v14 = vmul.f32 %v920_v25, %v845_v58  ;;  %v924_v27 = vmul.f32 %v923_v28, %v3186_v18 }
 0x189   : > { %v854_v52 = vsub.f32 %v849_v2, %v853_v11  ;;  %v863_v13 = vsub.f32 %v858_v23, %v862_v24  ;;  %v3262_v49 = vsel %vm712_vm4, 1.0, %v2547_v45  ;;  %v722_v15 = vsub.f32 %v1931_v16, %v1933_v44 }
 0x18a   : > { %v723_v43 = vsub.f32 %v1933_v44, %v1935_v26  ;;  %v3267_v46 = vsub.f32 %v3085_v54, %v696_v29  ;;  %v3270_v50 = vsub.f32 %v1935_v26, %v3253_v17  ;;  %v3275_v28 = vsub.f32 %v3085_v54, %v701_v30 }
 0x18b   : > { %v930_v47 = vmul.f32 %v929_v59, %v854_v52  ;;  %v934_v21 = vmul.f32 %v933_v53, %v863_v13  ;;  %v925_v56 = vmul.f32 %v924_v27, %v854_v52  ;;  %v736_v58 = vsub.f32 %v3085_v54, %v706_v31 }
 0x18c   : > { %v794_v16 = vmul.f32 %v793_v33, %v3191_v42  ;;  %v798_v29 = vmul.f32 %v797_v34, %v3267_v46  ;;  %v803_v4 = vmul.f32 %v802_v35, %v3213_v63  ;;  %v812_v30 = vmul.f32 %v811_v37, %v3267_v46 }
 0x18d   : > { %v990_v51 = vld [vmem:[#allocation3 + $0x8] sm:$0xff]  ;;  %v935_v19 = vsub.f32 %v930_v47, %v934_v21  ;;  %v926_v20 = vsub.f32 %v921_v14, %v925_v56  ;;  %v807_v34 = vmul.f32 %v806_v36, %v3275_v28  ;;  %v725_v35 = vsub.f32 %v3253_v17, %v3262_v49 }
 0x18e   : > { %v999_v61 = vpack.c.bf16 %v990_v51, %v990_v51  ;;  %v795_v31 = vmul.f32 %v794_v16, %v3199_v60  ;;  %v799_v33 = vmul.f32 %v798_v29, %v722_v15  ;;  %v804_v55 = vmul.f32 %v803_v4, %v722_v15 }
 0x18f   : > { %983 = vst.msk [vmem:[#allocation3 + $0x18] sm:$0xff] %vm328_vm0, %v935_v19  ;;  %982 = vst.msk [vmem:[#allocation3 + $0x10] sm:$0xff] %vm328_vm0, %v926_v20  ;;  %v813_v37 = vmul.f32 %v812_v30, %v723_v43  ;;  %v816_v6 = vmul.f32 %v815_v38, %v736_v58  ;;  %v3302_v62 = vmul.f32 %v938_v10, %v863_v13  ;;  %v3689_v2 = vstv %s3688_s3  ;;  %v2317_v19 = vld [vmem:[#allocation11 + $0x180] sm:$0xff]  }
 0x190   : > { %1615 = vmatprep.mubr.bf16.mxu0 %v999_v61  ;;  %v800_v8 = vsub.f32 %v795_v31, %v799_v33  ;;  %v808_v36 = vmul.f32 %v807_v34, %v723_v43  ;;  %v884_v3 = vmul.f32 %v883_v39, %v3191_v42  ;;  %v888_v0 = vmul.f32 %v887_v40, %v3275_v28 }
 0x191   : > { %v817_v22 = vmul.f32 %v816_v6, %v3270_v50  ;;  %v893_v9 = vmul.f32 %v892_v41, %v3213_v63  ;;  %v897_v38 = vmul.f32 %v3689_v2, %v736_v58  ;;  %v1916_v7 = vmul.f32 -1.442695, %v3085_v54 }
 0x192   : > { %v809_v48 = vsub.f32 %v804_v55, %v808_v36  ;;  %v885_v1 = vmul.f32 %v884_v3, %v800_v8  ;;  %v3690_v59 = vstv %s3009_s28  ;;  %v3691_v10 = vstv %s3001_s25  ;;  %s3698_s25 = sld [smem:[#allocation73_spill]] }
 0x193   : > { %v785_v53 = vmul.f32 %v3690_v59, %v3186_v18  ;;  %v3320_v39 = vsub.f32 %v813_v37, %v817_v22  ;;  %v965_v11 = vmul.f32 %v3691_v10, %v3191_v42  ;;  %v3692_v40 = vstv %s3011_s8 }
 0x194   : > { %v789_v41 = vmul.f32 %v3692_v40, %v3213_v63  ;;  %v3693_v23 = vstv %s3017_s26  ;;  %v889_v25 = vmul.f32 %v888_v0, %v809_v48  ;;  %v894_v44 = vmul.f32 %v893_v9, %v809_v48  ;;  %s3348_s26 = sld [smem:[#allocation4 + $0x39]] }
 0x195   : > { %v866_v24 = vmul.f32 %v3693_v23, %v3132_v12  ;;  %2362 = vpow2.f32 %v1916_v7  ;;  %v786_v26 = vmul.f32 %v785_v53, %v3181_v57  ;;  %v898_v52 = vmul.f32 %v897_v38, %v3320_v39  ;;  %v2321_v7 = vld [vmem:[#allocation11 + $0x188] sm:$0xff]  }
 0x196   : > { %v3695_v13 = vstv %s3003_s12  ;;  %v790_v42 = vmul.f32 %v789_v41, %v3199_v60  ;;  %v3696_v27 = vstv %s3647_s0  ;;  %v992_v43 = vld [vmem:[#allocation3 + $0x18] sm:$0xff]  ;;  %v991_v47 = vld [vmem:[#allocation3 + $0x10] sm:$0xff]  ;;  %v890_v21 = vsub.f32 %v885_v1, %v889_v25  ;;  %s3701_s12 = sld [smem:[#allocation60_spill]]  ;;  %s3702_s0 = sld [smem:[#allocation59_spill]] }
 0x197   : > { %v969_v14 = vmul.f32 %v3695_v13, %v736_v58  ;;  %v870_v15 = vmul.f32 %v3696_v27, %v3213_v63  ;;  %v867_v56 = vmul.f32 %v866_v24, %v3225_v5  ;;  %v3699_v57 = vstv %s3648_s13  ;;  %v2320_v5 = vld [vmem:[#allocation11 + $0x1c8] sm:$0xff]   ;;  %s3359_s13 = sld [smem:[#allocation4 + $0x41]] }
 0x198   : > { %v875_v16 = vmul.f32 %v3699_v57, %v3186_v18  ;;  %v3700_v29 = vstv %s3694_s6  ;;  %v1001_v60 = vpack.c.bf16 %v992_v43, %v992_v43  ;;  %v1000_v58 = vpack.c.bf16 %v991_v47, %v991_v47  ;;  %v2328_v47 = vld [vmem:[#allocation11 + $0x1d8] sm:$0xff]  }
 0x199   : > { %v879_v51 = vmul.f32 %v3700_v29, %v3267_v46  ;;  %v899_v20 = vsub.f32 %v894_v44, %v898_v52  ;;  %v791_v4 = vsub.f32 %v786_v26, %v790_v42  ;;  %v966_v30 = vmul.f32 %v965_v11, %v890_v21  ;;  %v2324_v11 = vld [vmem:[#allocation11 + $0x1d0] sm:$0xff]  }
 0x19a   : > { %v3705_v31 = vstv %s3697_s24  ;;  %v3706_v34 = vstv %s3698_s25  ;;  %1655 = vmatprep.mubr.bf16.mxu1 %v1001_v60  ;;  %v737_v2 = vsub.f32 %v3085_v54, %v711_v32  ;;  %v3710_v38 = vstv %s3704_s27 }
 0x19b   : > { %v880_v61 = vmul.f32 %v879_v51, %v800_v8  ;;  %v947_v33 = vmul.f32 %v3705_v31, %v3132_v12  ;;  %v951_v55 = vmul.f32 %v3706_v34, %v3267_v46  ;;  %v970_v37 = vmul.f32 %v969_v14, %v899_v20  ;;  %1656 = vmatmul.mubr.bf16.vlgmr.msra.gmra.mrb[0].mxu1 %v1000_v58  ;;  %v2340_v31 = vld [vmem:[#allocation11 + $0x1f0] sm:$0xff]   ;;  %v2345_v34 = vld [vmem:[#allocation11 + $0x1b8] sm:$0xff]  }
 0x19c   : > { %v871_v6 = vmul.f32 %v870_v15, %v791_v4  ;;  %v876_v36 = vmul.f32 %v875_v16, %v791_v4  ;;  %v3707_v3 = vstv %s3701_s12  ;;  %v3708_v8 = vstv %s3702_s0  ;;  %2157 = vmatpush3.bf16.msra.mxu1 %v2317_v19  ;;  %v2332_v16 = vld [vmem:[#allocation11 + $0x1e0] sm:$0xff]   ;;  %v2336_v4 = vld [vmem:[#allocation11 + $0x1e8] sm:$0xff]  }
 0x19d   : > { %v960_v22 = vmul.f32 %v3707_v3, %v3275_v28  ;;  %v956_v0 = vmul.f32 %v3708_v8, %v3186_v18  ;;  %v3709_v12 = vstv %s3703_s9  ;;  %v821_v48 = vmul.f32 %v3710_v38, %v3275_v28  ;;  %2158 = vmatprep.subr.bf16.mxu1 %v2320_v5  ;;  %v2333_v19 = vld [vmem:[#allocation11 + $0x1a0] sm:$0xff]   ;;  %v2339_v38 = vld [vmem:[#allocation11 + $0x118] sm:$0xff]  }
 0x19e   : > { %v942_v9 = vmul.f32 %v3709_v12, %v3213_v63  ;;  %v971_v1 = vsub.f32 %v966_v30, %v970_v37  ;;  %v872_v59 = vsub.f32 %v867_v56, %v871_v6  ;;  %v881_v53 = vsub.f32 %v876_v36, %v880_v61  ;;  %v2327_v6 = vld [vmem:[#allocation11 + $0x100] sm:$0xff]   ;;  %v2334_v12 = vld [vmem:[#allocation11 + $0x150] sm:$0xff]  }
 0x19f   : > { %v961_v10 = vmul.f32 %v960_v22, %v890_v21  ;;  %v822_v18 = vmul.f32 %v821_v48, %v3270_v50  ;;  %v3711_v40 = vstv %s3073_s22  ;;  %v905_v23 = vstv %s3332_s21  ;;  %v2363_v44 = vpop.eup %2362  ;;  %v2325_v50 = vld [vmem:[#allocation11 + $0x190] sm:$0xff]   ;;  %v2330_v22 = vld [vmem:[#allocation11 + $0x148] sm:$0xff]   ;;  %v2342_v48 = vld [vmem:[#allocation11 + $0x160] sm:$0xff]   ;;  %s3713_s22 = sld [smem:[#allocation26_spill]] }
 0x1a0   : > { %v825_v41 = vmul.f32 %v3711_v40, %v737_v2  ;;  %987 = vst.msk [vmem:[#allocation3 + $0x38] sm:$0xff] %vm328_vm0, %v971_v1  ;;  %v948_v32 = vmul.f32 %v947_v33, %v872_v59  ;;  %v952_v24 = vmul.f32 %v951_v55, %v881_v53  ;;  %v957_v28 = vmul.f32 %v956_v0, %v881_v53  ;;  %v2344_v33 = vld [vmem:[#allocation11 + $0x1f8] sm:$0xff]   ;;  %v2331_v0 = vld [vmem:[#allocation11 + $0x108] sm:$0xff]   ;;  %v2343_v1 = vld [vmem:[#allocation11 + $0x120] sm:$0xff]  }
 0x1a1   : > { %v943_v25 = vmul.f32 %v942_v9, %v872_v59  ;;  %v3712_v52 = vstv %s3083_s7  ;;  %v973_v14 = vstv %s3348_s26  ;;  %2159 = vmatpush3.bf16.msra.mxu1 %v2321_v7  ;;  %v650_v42 = vadd.f32 1.0, %v2363_v44  ;;  %v2335_v9 = vld [vmem:[#allocation11 + $0x110] sm:$0xff]   ;;  %v2346_v7 = vld [vmem:[#allocation11 + $0x168] sm:$0xff]   ;;  %s3714_s7 = sld [smem:[#allocation21_spill]] }
 0x1a2   : > { %v826_v26 = vmul.f32 %v825_v41, %v725_v35  ;;  %v902_v13 = vmul.f32 %v3712_v52, %v3267_v46  ;;  %v953_v27 = vsub.f32 %v948_v32, %v952_v24  ;;  %v962_v15 = vsub.f32 %v957_v28, %v961_v10  ;;  %2160 = vmatprep.subr.bf16.mxu1 %v2324_v11  ;;  %v2329_v35 = vld [vmem:[#allocation11 + $0x198] sm:$0xff]   ;;  %v2347_v59 = vld [vmem:[#allocation11 + $0x128] sm:$0xff]   ;;  %v2348_v53 = vld [vmem:[#allocation11 + $0x170] sm:$0xff]  }
 0x1a3   : > { %v944_v43 = vsub.f32 %v3302_v62, %v943_v25  ;;  %v906_v57 = vmul.f32 %v905_v23, %v737_v2  ;;  %2364 = vrcp.f32 %v650_v42  ;;  %v977_v17 = vstv %s3359_s13  ;;  %v2349_v10 = vld [vmem:[#allocation11 + $0x130] sm:$0xff]   ;;  %v2350_v11 = vld [vmem:[#allocation11 + $0x178] sm:$0xff]   ;;  %v2352_v41 = vld [vmem:[#allocation11 + $0x200] sm:$0xff]  }
 0x1a4   : > { %v827_v21 = vsub.f32 %v822_v18, %v826_v26  ;;  %v903_v56 = vmul.f32 %v902_v13, %v3320_v39  ;;  %985 = vst.msk [vmem:[#allocation3 + $0x28] sm:$0xff] %vm328_vm0, %v953_v27  ;;  %986 = vst.msk [vmem:[#allocation3 + $0x30] sm:$0xff] %vm328_vm0, %v962_v15  ;;  %v974_v46 = vmul.f32 %v973_v14, %v3213_v63  ;;  %v2337_v63 = vld [vmem:[#allocation11 + $0x1a8] sm:$0xff]   ;;  %v2351_v18 = vld [vmem:[#allocation11 + $0x138] sm:$0xff]  }
 0x1a5   : > { %984 = vst.msk [vmem:[#allocation3 + $0x20] sm:$0xff] %vm328_vm0, %v944_v43  ;;  %2161 = vmatpush3.bf16.msra.mxu1 %v2325_v50  ;;  %v978_v39 = vmul.f32 %v977_v17, %v737_v2  ;;  %v2338_v2 = vld [vmem:[#allocation11 + $0x158] sm:$0xff]   ;;  %v2353_v32 = vld [vmem:[#allocation11 + $0x208] sm:$0xff]   ;;  %v2354_v24 = vld [vmem:[#allocation11 + $0x210] sm:$0xff]   ;;  %s1913_s28 = sshll.u32 %s3713_s22, 3  ;;  %s1785_s16 = scalar_lea.sflag [#allocation6], %s3713_s22 }
 0x1a6   : > { %v907_v49 = vmul.f32 %v906_v57, %v827_v21  ;;  %2162 = vmatprep.subr.bf16.mxu1 %v2328_v47  ;;  %v975_v51 = vmul.f32 %v974_v46, %v899_v20  ;;  %v2341_v20 = vld [vmem:[#allocation11 + $0x1b0] sm:$0xff]   ;;  %v2355_v28 = vld [vmem:[#allocation11 + $0x218] sm:$0xff]   ;;  %v2356_v25 = vld [vmem:[#allocation11 + $0x220] sm:$0xff]   ;;  %s308_s14 = scalar_lea.vmem [#allocation12], %s1913_s28 }
 0x1a7   : > { %v996_v62 = vld [vmem:[#allocation3 + $0x38] sm:$0xff]  ;;  %v2358_v26 = vld [vmem:[#allocation11 + $0x230] sm:$0xff]   ;;  %v2359_v52 = vld [vmem:[#allocation11 + $0x238] sm:$0xff]   ;;  %s2067_s8 = sshll.u32 %s3714_s7, 7  ;;  %s1798_s10 = sshll.u32 %s308_s14, 4  ;;  %s3411_s10 = int_to_ptr.vmem [resolvable:$true] %s1798_s10 }
 0x1a8   : > { %v908_v29 = vsub.f32 %v903_v56, %v907_v49  ;;  %v1005_v60 = vpack.c.bf16 %v996_v62, %v996_v62  ;;  %v2357_v44 = vld [vmem:[#allocation11 + $0x228] sm:$0xff]   ;;  %s3409_s29 = scalar_lea.hbm %s3716_s11, %s2067_s8  ;;  %s2465_s23 = scalar_lea.vmem %s3411_s10, 128 }
 0x1a9   : > { %2163 = vmatpush3.bf16.msra.mxu1 %v2329_v35  ;;  %p2466_p3 = scmp.ne.s32.totalorder %s3411_s10, %s2465_s23  ;;  %p2472_p12 = scmp.lt.s32.totalorder %s3411_s10, %s2470_s18 }
 0x1aa   : > { %v979_v58 = vmul.f32 %v978_v39, %v908_v29  ;;  %1735 = vmatprep.mubr.bf16.mxu1 %v1005_v60  ;;  %2164 = vmatprep.subr.bf16.mxu1 %v2332_v16  ;;  %p2473_p1 = scmp.lt.s32.totalorder %s2471_s17, %s2465_s23 }
 0x1ab   : > { %v994_v55 = vld [vmem:[#allocation3 + $0x28] sm:$0xff]  ;;  %v995_v36 = vld [vmem:[#allocation3 + $0x30] sm:$0xff]  ;;  %p2467_p5 = pnand %p2466_p3, %p2721_p7 }
 0x1ac   : > { %v980_v30 = vsub.f32 %v975_v51, %v979_v58  ;;  %v1003_v8 = vpack.c.bf16 %v994_v55, %v994_v55  ;;  %v993_v40 = vld [vmem:[#allocation3 + $0x20] sm:$0xff]  ;;  %p2474_p4 = por %p2473_p1, %p2472_p12 }
 0x1ad   : > { %v2365_v5 = vpop.eup %2364  ;;  %2165 = vmatpush3.bf16.msra.mxu1 %v2333_v19  ;;  %v1002_v23 = vpack.c.bf16 %v993_v40, %v993_v40  ;;  %p2468_p10 = pneg %p2467_p5 }
 0x1ae   : > { %988 = vst.msk [vmem:[#allocation3 + $0x40] sm:$0xff] %vm328_vm0, %v980_v30  ;;  %v653_v61 = vmul.f32 %v2365_v5, %v3085_v54  ;;  %2166 = vmatprep.subr.bf16.mxu1 %v2336_v4  ;;  %v1004_v54 = vpack.c.bf16 %v995_v36, %v995_v36 }
 0x1af   : > { %p2475_p13 = pnand %p2474_p4, %p2468_p10 }
 0x1b0   : > { %654 = vst.msk [vmem:[#allocation3] sm:$0xff] %vm328_vm0, %v653_v61  ;;  %vm2548_vm0 = vmmov 0  }
 0x1b1   : > { %2167 = vmatpush3.bf16.msra.mxu1 %v2337_v63 }
 0x1b2   : > { %2168 = vmatprep.subr.bf16.mxu1 %v2340_v31 }
 0x1b5   : > { %2169 = vmatpush3.bf16.msra.mxu1 %v2341_v20  ;;  %v997_v13 = vld [vmem:[#allocation3 + $0x40] sm:$0xff] }
 0x1b6   : > { %2170 = vmatprep.subr.bf16.mxu1 %v2344_v33  ;;  %v1006_v14 = vpack.c.bf16 %v997_v13, %v997_v13 }
 0x1b7   : > { %v989_v37 = vld [vmem:[#allocation3] sm:$0xff] }
 0x1b8   : > { %v998_v3 = vpack.c.bf16 %v989_v37, %v989_v37 }
 0x1b9   : > { %2171 = vmatpush3.bf16.msra.mxu1 %v2345_v34 }
 0x1ba   : > { %1616 = vmatmul.mubr.bf16.vlgmr.msra.gmra.mrb[0].mxu0 %v998_v3 }
 0x1bb   : > { %2135 = vmatpush3.bf16.msra.mxu0 %v2327_v6  ;;  %1695 = vmatprep.mubr.bf16.mxu0 %v1003_v8 }
 0x1bc   : > { %2136 = vmatprep.subr.bf16.mxu0 %v2330_v22  ;;  %1736 = vmatmul.mubr.bf16.vlgmr.msra.gmra.mrb[4].mxu1 %v1004_v54 }
 0x1bf   : > { %2137 = vmatpush3.bf16.msra.mxu0 %v2331_v0 }
 0x1c0   : > { %2138 = vmatprep.subr.bf16.mxu0 %v2334_v12 }
 0x1c3   : > { %2139 = vmatpush3.bf16.msra.mxu0 %v2335_v9 }
 0x1c4   : > { %2140 = vmatprep.subr.bf16.mxu0 %v2338_v2 }
 0x1c7   : > { %2141 = vmatpush3.bf16.msra.mxu0 %v2339_v38 }
 0x1c8   : > { %2142 = vmatprep.subr.bf16.mxu0 %v2342_v48 }
 0x1cb   : > { %2143 = vmatpush3.bf16.msra.mxu0 %v2343_v1 }
 0x1cc   : > { %2144 = vmatprep.subr.bf16.mxu0 %v2346_v7 }
 0x1cf   : > { %2145 = vmatpush3.bf16.msra.mxu0 %v2347_v59 }
 0x1d0   : > { %2146 = vmatprep.subr.bf16.mxu0 %v2348_v53 }
 0x1d3   : > { %2147 = vmatpush3.bf16.msra.mxu0 %v2349_v10 }
 0x1d4   : > { %2148 = vmatprep.subr.bf16.mxu0 %v2350_v11 }
 0x1d7   : > { %2149 = vmatpush3.bf16.msra.mxu0 %v2351_v18 }
 0x1d8   : > { %2187 = vmatprep.subr.bf16.mxu0 %v2547_v45 }
 0x1da   : > { %1696 = vmatmul.mubr.bf16.vlgmr.msra.gmra.mrb[4].mxu0 %v1002_v23 }
 0x1db   : > { %2188 = vmatpush3.bf16.msra.mxu0 %v2352_v41  ;;  %2203 = vmatprep.mubr.msk.bf16.mxu0 %vm2548_vm0, %v2547_v45 }
 0x1dc   : > { %2189 = vmatprep.subr.bf16.mxu0 %v2547_v45 }
 0x1df   : > { %2190 = vmatpush3.bf16.msra.mxu0 %v2353_v32 }
 0x1e0   : > { %2191 = vmatprep.subr.bf16.mxu0 %v2547_v45 }
 0x1e3   : > { %2192 = vmatpush3.bf16.msra.mxu0 %v2354_v24 }
 0x1e4   : > { %2193 = vmatprep.subr.bf16.mxu0 %v2547_v45 }
 0x1e7   : > { %2194 = vmatpush3.bf16.msra.mxu0 %v2355_v28 }
 0x1e8   : > { %2195 = vmatprep.subr.bf16.mxu0 %v2547_v45 }
 0x1eb   : > { %2196 = vmatpush3.bf16.msra.mxu0 %v2356_v25 }
 0x1ec   : > { %2197 = vmatprep.subr.bf16.mxu0 %v2547_v45 }
 0x1ef   : > { %2198 = vmatpush3.bf16.msra.mxu0 %v2357_v44 }
 0x1f0   : > { %2199 = vmatprep.subr.bf16.mxu0 %v2547_v45 }
 0x1f3   : > { %2200 = vmatpush3.bf16.msra.mxu0 %v2358_v26 }
 0x1f4   : > { %2201 = vmatprep.subr.bf16.mxu0 %v2547_v45 }
 0x1f7   : > { %2202 = vmatpush3.bf16.msra.mxu0 %v2359_v52 }
 0x1fa   : > { %2204 = vmatmul.mubr.bf16.vlgmr.msra.gmra.mrb[8].mxu0 %v1006_v14 }
 0x26e   : > { %v2128_v50 = vpop.f32.mrb[0].mxu1 }
 0x26f   : > { %v2129_v42 = vpop.f32.mrb[1].mxu1 }
 0x270   : > { %v2130_v27 = vadd.f32 %v2129_v42, %v2128_v50  ;;  %v2131_v15 = vpop.f32.mrb[2].mxu1 }
 0x271   : > { %v2132_v43 = vpop.f32.mrb[3].mxu1 }
 0x28d   : > { %v2106_v47 = vpop.f32.mrb[0].mxu0 }
 0x28e   : > { %v2107_v21 = vpop.f32.mrb[1].mxu0 }
 0x28f   : > { %v2108_v56 = vadd.f32 %v2107_v21, %v2106_v47  ;;  %v2109_v57 = vpop.f32.mrb[2].mxu0  ;;  %v2172_v17 = vpop.f32.mrb[4].mxu1 }
 0x290   : > { %v2110_v49 = vpop.f32.mrb[3].mxu0  ;;  %v2173_v46 = vpop.f32.mrb[5].mxu1 }
 0x291   : > { %v1658_v35 = vadd.f32 %v2130_v27, %v2108_v56  ;;  %v2174_v45 = vadd.f32 %v2173_v46, %v2172_v17  ;;  %v2175_v62 = vpop.f32.mrb[6].mxu1 }
 0x292   : > { %v2176_v16 = vpop.f32.mrb[7].mxu1 }
 0x2ad   : > { %v2150_v29 = vpop.f32.mrb[4].mxu0 }
 0x2ae   : > { %v2151_v51 = vpop.f32.mrb[5].mxu0 }
 0x2af   : > { %v2152_v39 = vadd.f32 %v2151_v51, %v2150_v29  ;;  %v2153_v60 = vpop.f32.mrb[6].mxu0 }
 0x2b0   : > { %v2154_v58 = vpop.f32.mrb[7].mxu0 }
 0x2b1   : > { %v1698_v19 = vadd.f32 %v2152_v39, %v1658_v35 }
 0x2b3   : > { %v1738_v4 = vadd.f32 %v2174_v45, %v1698_v19 }
 0x2cd   : > { %v1777_v30 = vpop.f32.mrb[8].mxu0 }
 0x2ce   : > { %v1778_v5 = vadd.f32 %v1777_v30, %v1738_v4  ;;  %v2205_v63 = vpop.f32.mrb[9].mxu0 }
 0x2cf   : > { %v1780_v61 = vpop.f32.mrb[10].mxu0 }
 0x2d0   : > { %1783 = vst [vmem:[%s308_s14] sm:$0xff] %v1778_v5  ;;  %v2206_v31 = vpop.f32.mrb[11].mxu0 }
 0x2d1   : > { %2478 = shalt.err (!%p2475_p13)
}
 0x2d2   : > { %s2479_s30 = scalar_lea.hbm %s3409_s29, 128  ;;  %s2483_s1 = scalar_lea.hbm %s3716_s11, 256 }
 0x2d3   : > { %p2480_p9 = scmp.ne.s32.totalorder %s3409_s29, %s2479_s30  ;;  %p2484_p8 = scmp.lt.u32.totalorder %s3409_s29, %s3716_s11 }
 0x2d4   : > { %p2485_p11 = scmp.lt.u32.totalorder %s2483_s1, %s2479_s30  ;;  %p2487_p3 = scmp.lt.u32.totalorder %s2479_s30, %s3409_s29 }
 0x2d5   : > { %p2481_p2 = pnand %p2480_p9, %p2721_p7 }
 0x2d6   : > { %p2486_p0 = por %p2485_p11, %p2484_p8 }
 0x2d7   : > { %p2482_p6 = pneg %p2481_p2 }
 0x2d8   : > { %p2488_p5 = por %p2487_p3, %p2486_p0 }
 0x2da   : > { %p2489_p10 = pnand %p2488_p5, %p2482_p6 }
 0x2dc   : > { %2492 = shalt.err (!%p2489_p10)
}
 0x2dd   : > { %2221 = dma.vmem_to_hbm [thread:$0]  (%p2721_p7), %s3411_s10, 128, %s3409_s29, %s1785_s16  }
 0x2de PF: > { %s3717_s21 = sld [smem:[#allocation17_spill]]  ;;  %s3718_s24 = sld [smem:[#allocation22_spill]] }
 0x2df   : > { %s3719_s25 = sld [smem:[#allocation20_spill]] }
 0x2e4   : > { %s1810_s12 = sand.u32 1, %s3717_s21   ;;  %p3720_p12 = scmp.ne.s32.totalorder %s3718_s24, 0 }
 0x2e5   : > { %p3721_p1 = scmp.ge.s32.totalorder %s3719_s25, 2  ;;  %s1811_s26 = scalar_lea.sflag [#allocation6], %s1810_s12 }
 0x2e7   : > { %p2238_p4 = pnand %p3721_p1, %p3720_p12 }
 0x2e9   : > { %2522 = dma.done.wait (!%p2238_p4), %s1811_s26, 128  }
 0x2ea   : > { %2524 = vsyncadd (!%p2238_p4), %s1811_s26, 4294967168  ;;  %s3722_s24 = sld [smem:[#allocation23_spill]]  ;;  %s3723_s21 = sld [smem:[#allocation18_spill]] }
 0x2eb   : > { %s3724_s22 = sld [smem:[#allocation19_spill]]  ;;  %s3725_s23 = sld [smem:[#allocation24_spill]] }
 0x2f0   : > { %p21_p13 = scmp.ge.s32.totalorder %s3722_s24, 4  }
 0x2f2   :  { %23 = sbr.rel (!%p21_p13) target bundleno = 15 (0xf), region = 102 }
 0x2f9   :  { %1816 = vsyncpa [#allocation5], 1 }
 0x2fa   :  { %1818 = vsyncpa [#allocation5 + $0x1], 1 }
 0x2fb   :  { %1819 = vsyncpa [#allocation10], 1 }
 0x2fc   :  { %1820 = vsyncpa [#allocation6], 1 }
 0x2fd   :  { %1822 = vsyncpa [#allocation6 + $0x1], 1 }
 0x2fe   :  { %1823 = vsyncpa [#allocation7], 1 }
 0x2ff   :  { %1825 = vsyncpa [#allocation7 + $0x1], 1 }

</bundles_post_ra>
